<compile_context>
chip_gen: v5e
topology: v5e:2x2
jax: 0.10.0
libtpu: 0.0.40
codegen_flags: <defaults>
</compile_context>

<pallas_src>
import functools

import numpy as np
import jax
import jax.numpy as jnp
from jax.experimental import pallas as pl
from jax.experimental.pallas import tpu as pltpu


# ---------------------------------------------------------------------------
# deterministic "parameter" setup (mirrors gaussian() / create_window())
# ---------------------------------------------------------------------------
def _gaussian_1d(window_size: int, sigma: float = 1.5) -> np.ndarray:
    x = np.arange(window_size, dtype=np.float32) - np.float32(window_size // 2)
    g = np.exp(-(x ** 2) / np.float32(2.0 * sigma * sigma)).astype(np.float32)
    return (g / g.sum(dtype=np.float32)).astype(np.float32)


def _banded_tap_matrices(g1d: np.ndarray, H: int, W: int):
    """A_col (Ho,H), A_row (W,Wo) such that gconv(X) = A_col @ X @ A_row ("valid")."""
    ws = int(g1d.shape[0])
    Ho, Wo = H - ws + 1, W - ws + 1
    a_col = np.zeros((Ho, H), np.float32)
    a_row = np.zeros((W, Wo), np.float32)
    for d in range(ws):
        a_col[np.arange(Ho), np.arange(Ho) + d] = g1d[d]
        a_row[np.arange(Wo) + d, np.arange(Wo)] = g1d[d]
    return a_col, a_row


def _vmem_capacity_bytes() -> int:
    try:
        info = pltpu.get_tpu_info()
        cap = int(getattr(info, "vmem_capacity_bytes", 0))
        if cap > 0:
            return cap
    except Exception:
        pass
    return 64 * 1024 * 1024  # conservative (v7x-sized) fallback


# ---------------------------------------------------------------------------
# shared elementwise tail + per-plane reduction
# ---------------------------------------------------------------------------
def _ssim_tail(mu1, mu2, s11, s22, s12, C1, C2, o_ref):
    mu1_sq = mu1 * mu1
    mu2_sq = mu2 * mu2
    mu1_mu2 = mu1 * mu2
    sigma1_sq = s11 - mu1_sq
    sigma2_sq = s22 - mu2_sq
    sigma12 = s12 - mu1_mu2

    v1 = 2.0 * sigma12 + C2
    v2 = sigma1_sq + sigma2_sq + C2
    num = (2.0 * mu1_mu2 + C1) * v1
    den = (mu1_sq + mu2_sq + C1) * v2

    inv = pl.reciprocal(den, approx=True)   # EUP slot (idle otherwise)
    inv = inv * (2.0 - den * inv)           # one Newton step -> ~f32 accuracy
    ssim_map = num * inv

    # two-level reduction: lanes first, then sublanes -> one sum per plane
    o_ref[...] = jnp.sum(jnp.sum(ssim_map, axis=2, keepdims=True),
                         axis=1, keepdims=True)


# ---------------------------------------------------------------------------
# kernels: MXU banded-matmul path + VPU shift-accumulate fallback
# ---------------------------------------------------------------------------
def _make_mxu_kernel():
    def kernel(scal_ref, img1_ref, img2_ref, arow_ref, acol_ref, o_ref):
        s1, s2, C1, C2 = scal_ref[0], scal_ref[1], scal_ref[2], scal_ref[3]
        x1 = img1_ref[...].astype(jnp.float32) * s1     # (P, H, W)
        x2 = img2_ref[...].astype(jnp.float32) * s2
        arow = arow_ref[...]                             # (P, W, Wo)
        acol = acol_ref[...]                             # (P, Ho, H)

        def gconv(a):   # separable Gaussian as two batched MXU matmuls
            t = jnp.einsum('phw,pwv->phv', a, arow,
                           preferred_element_type=jnp.float32)
            return jnp.einsum('poh,phv->pov', acol, t,
                              preferred_element_type=jnp.float32)

        mu1 = gconv(x1)
        mu2 = gconv(x2)
        s11 = gconv(x1 * x1)
        s22 = gconv(x2 * x2)
        s12 = gconv(x1 * x2)
        _ssim_tail(mu1, mu2, s11, s22, s12, C1, C2, o_ref)

    return kernel


def _make_vpu_kernel(g1d: np.ndarray, H: int, W: int):
    ws = int(g1d.shape[0])
    Ho, Wo = H - ws + 1, W - ws + 1
    gv = [float(v) for v in g1d]   # compile-time taps

    def kernel(scal_ref, img1_ref, img2_ref, o_ref):
        s1, s2, C1, C2 = scal_ref[0], scal_ref[1], scal_ref[2], scal_ref[3]
        r1 = img1_ref[...].astype(jnp.float32)           # (P, H, W), unscaled
        r2 = img2_ref[...].astype(jnp.float32)

        def gconv(a, scale):
            # row pass (lane axis)
            acc = gv[0] * a[:, :, 0:Wo]
            for dx in range(1, ws):
                acc = acc + gv[dx] * a[:, :, dx:dx + Wo]
            # column pass (sublane axis); normalization scale folded into taps
            out = (scale * gv[0]) * acc[:, 0:Ho, :]
            for dy in range(1, ws):
                out = out + (scale * gv[dy]) * acc[:, dy:dy + Ho, :]
            return out

        mu1 = gconv(r1, s1)
        mu2 = gconv(r2, s2)
        s11 = gconv(r1 * r1, s1 * s1)
        s22 = gconv(r2 * r2, s2 * s2)
        s12 = gconv(r1 * r2, s1 * s2)
        _ssim_tail(mu1, mu2, s11, s22, s12, C1, C2, o_ref)

    return kernel


# ---------------------------------------------------------------------------
# plane-per-step sizing from a VMEM budget
# ---------------------------------------------------------------------------
def _planes_per_step(G, H, W, Ho, Wo, in_itemsize, use_mxu, budget_bytes):
    per_plane = 2 * 2 * H * W * in_itemsize           # 2 inputs x 2 pipeline buffers
    per_plane += 12 * H * W * 4                        # conservative f32 temp working set
    if use_mxu:
        per_plane += 2 * 4 * (W * Wo + Ho * H)         # banded tap matrices (x2 buffers)
    p = max(1, min(G, int(budget_bytes // max(per_plane, 1))))
    if G >= 2:
        p = min(p, (G + 1) // 2)                       # keep >= 2 grid steps (megacore)
    while G % p:                                       # exact divisor -> no ragged blocks
        p -= 1
    return int(p)


# ---------------------------------------------------------------------------
# wrapper (jitted): SSIM(img1, img2), size_average=True
# ---------------------------------------------------------------------------
@functools.partial(jax.jit, static_argnames=("window_size", "val_range"))
def ssim_pallas(img1, img2, window_size: int = 11, val_range=None):
    n, h, w, c = img1.shape
    assert img2.shape == img1.shape
    ws = min(window_size, h, w)
    Ho, Wo = h - ws + 1, w - ws + 1
    G = n * c
    g1d = _gaussian_1d(ws, 1.5)

    # --- data-dependent normalization / dynamic range, hoisted to plain JAX ---
    max1 = jnp.max(img1).astype(jnp.float32)
    max2 = jnp.max(img2).astype(jnp.float32)
    inv255 = jnp.float32(1.0 / 255.0)
    one = jnp.float32(1.0)
    scale1 = jnp.where(max1 > 1.0, inv255, one)        # img1 / 255 if max > 1
    scale2 = jnp.where(max2 > 1.0, inv255, one)        # img2 / 255 if max > 1
    if val_range is None:
        min1 = jnp.min(img1).astype(jnp.float32)       # fused with the max pass under jit
        m1 = max1 * scale1
        n1 = min1 * scale1
        max_val = jnp.where(m1 > 128.0, jnp.float32(255.0), jnp.float32(1.0))
        min_val = jnp.where(n1 < -0.5, jnp.float32(-1.0), jnp.float32(0.0))
        L = max_val - min_val
    else:
        L = jnp.float32(val_range)
    C1 = (0.01 * L) ** 2
    C2 = (0.03 * L) ** 2
    scalars = jnp.stack([scale1, scale2, C1, C2]).astype(jnp.float32)

    # --- lane-dense layout: NHWC -> (N*C, H, W), W in the lane dimension ---
    x1 = jnp.transpose(img1, (0, 3, 1, 2)).reshape(G, h, w)
    x2 = jnp.transpose(img2, (0, 3, 1, 2)).reshape(G, h, w)

    # MXU banded-matmul path unless planes are tiny (or absurdly wide)
    use_mxu = (min(Ho, Wo) >= 32) and (max(h, w) <= 2048)

    vmem_cap = _vmem_capacity_bytes()
    vmem_limit = int(min(100 * 2 ** 20, int(vmem_cap * 0.85)))
    budget = int(vmem_limit * 0.75)
    itemsize = jnp.dtype(img1.dtype).itemsize
    P = _planes_per_step(G, h, w, Ho, Wo, itemsize, use_mxu, budget)
    steps = G // P

    plane_spec = pl.BlockSpec((P, h, w), lambda i: (i, 0, 0))
    in_specs = [
        pl.BlockSpec(memory_space=pltpu.MemorySpace.SMEM),   # [scale1, scale2, C1, C2]
        plane_spec,
        plane_spec,
    ]
    operands = [scalars, x1, x2]

    if use_mxu:
        a_col, a_row = _banded_tap_matrices(g1d, h, w)
        a_row_b = jnp.asarray(
            np.ascontiguousarray(np.broadcast_to(a_row, (P,) + a_row.shape)))
        a_col_b = jnp.asarray(
            np.ascontiguousarray(np.broadcast_to(a_col, (P,) + a_col.shape)))
        in_specs += [
            pl.BlockSpec((P, w, Wo), lambda i: (0, 0, 0)),    # resident across steps
            pl.BlockSpec((P, Ho, h), lambda i: (0, 0, 0)),
        ]
        operands += [a_row_b, a_col_b]
        kernel = _make_mxu_kernel()
    else:
        kernel = _make_vpu_kernel(g1d, h, w)

    partials = pl.pallas_call(
        kernel,
        out_shape=jax.ShapeDtypeStruct((G, 1, 1), jnp.float32),
        grid=(steps,),
        in_specs=in_specs,
        out_specs=pl.BlockSpec((P, 1, 1), lambda i: (i, 0, 0)),
        compiler_params=pltpu.CompilerParams(
            dimension_semantics=("parallel",),
            vmem_limit_bytes=vmem_limit,
        ),
    )(*operands)

    return jnp.sum(partials) / jnp.float32(G * Ho * Wo)


# ---------------------------------------------------------------------------
# pure-numpy reference (mirrors the PyTorch code path) for sanity checks
# ---------------------------------------------------------------------------
def _ssim_ref_numpy(img1, img2, window_size: int = 11):
    img1 = img1.astype(np.float32)
    img2 = img2.astype(np.float32)
    if img1.max() > 1:
        img1 = img1 / 255.0
    if img2.max() > 1:
        img2 = img2 / 255.0
    n, h, w, c = img1.shape
    ws = min(window_size, h, w)
    g = _gaussian_1d(ws, 1.5)
    win = np.outer(g, g).astype(np.float32)
    x1 = np.transpose(img1, (0, 3, 1, 2))  # NCHW
    x2 = np.transpose(img2, (0, 3, 1, 2))
    max_val = 255.0 if x1.max() > 128 else 1.0
    min_val = -1.0 if x1.min() < -0.5 else 0.0
    L = max_val - min_val
    ho, wo = h - ws + 1, w - ws + 1

    def conv(x):
        out = np.zeros((n, c, ho, wo), np.float32)
        for dy in range(ws):
            for dx in range(ws):
                out += win[dy, dx] * x[:, :, dy:dy + ho, dx:dx + wo]
        return out

    mu1 = conv(x1)
    mu2 = conv(x2)
    mu1_sq, mu2_sq, mu1_mu2 = mu1 * mu1, mu2 * mu2, mu1 * mu2
    sigma1_sq = conv(x1 * x1) - mu1_sq
    sigma2_sq = conv(x2 * x2) - mu2_sq
    sigma12 = conv(x1 * x2) - mu1_mu2
    C1 = (0.01 * L) ** 2
    C2 = (0.03 * L) ** 2
    v1 = 2.0 * sigma12 + C2
    v2 = sigma1_sq + sigma2_sq + C2
    ssim_map = (2 * mu1_mu2 + C1) * v1 / ((mu1_sq + mu2_sq + C1) * v2)
    return float(ssim_map.mean())


if __name__ == "__main__":
    key = jax.random.PRNGKey(0)
    k1, k2, k3, k4 = jax.random.split(key, 4)

    # Small shape (exercises the VPU fallback path): N=2, H=W=16, C=3 (NHWC).
    a1 = jax.random.uniform(k1, (2, 16, 16, 3), dtype=jnp.float32)
    a2 = jax.random.uniform(k2, (2, 16, 16, 3), dtype=jnp.float32)
    out_small = jax.block_until_ready(ssim_pallas(a1, a2))
    ref_small = _ssim_ref_numpy(np.asarray(a1), np.asarray(a2))
    assert abs(float(out_small) - ref_small) < 1e-4, (float(out_small), ref_small)

    # Moderate shape (exercises the MXU banded-matmul path): N=2, 96x128, C=3.
    b1 = jax.random.uniform(k3, (2, 96, 128, 3), dtype=jnp.float32)
    b2 = jax.random.uniform(k4, (2, 96, 128, 3), dtype=jnp.float32)
    out_mid = jax.block_until_ready(ssim_pallas(b1, b2))
    ref_mid = _ssim_ref_numpy(np.asarray(b1), np.asarray(b2))
    assert abs(float(out_mid) - ref_mid) < 2e-3, (float(out_mid), ref_mid)

    print("KERNEL_OK")
</pallas_src>

<mosaic_0001>
module attributes {stable_mosaic.version = 11 : i64} {
  func.func @kernel(%arg0: i32, %arg1: memref<4xf32, #tpu.memory_space<smem>>, %arg2: memref<3x16x16xf32, #tpu.memory_space<vmem>>, %arg3: memref<3x16x16xf32, #tpu.memory_space<vmem>>, %arg4: memref<3x1x1xf32, #tpu.memory_space<vmem>>) attributes {dimension_semantics = [#tpu.dimension_semantics<parallel>], iteration_bounds = array<i64: 2>, scalar_prefetch = 0 : i64, scratch_operands = 0 : i64, tpu.core_type = #tpu.core_type<tc>, window_params = [{transform_indices = @transform_0, window_bounds = array<i64: 4>}, {transform_indices = @transform_1, window_bounds = array<i64: 3, 16, 16>}, {transform_indices = @transform_2, window_bounds = array<i64: 3, 16, 16>}, {transform_indices = @transform_3, window_bounds = array<i64: 3, 1, 1>}]} {
    %c0 = arith.constant 0 : index
    %0 = memref.load %arg1[%c0] : memref<4xf32, #tpu.memory_space<smem>>
    %c1 = arith.constant 1 : index
    %1 = memref.load %arg1[%c1] : memref<4xf32, #tpu.memory_space<smem>>
    %c2 = arith.constant 2 : index
    %2 = memref.load %arg1[%c2] : memref<4xf32, #tpu.memory_space<smem>>
    %c3 = arith.constant 3 : index
    %3 = memref.load %arg1[%c3] : memref<4xf32, #tpu.memory_space<smem>>
    %c0_0 = arith.constant 0 : index
    %c0_1 = arith.constant 0 : index
    %c0_2 = arith.constant 0 : index
    %4 = vector.load %arg2[%c0_0, %c0_1, %c0_2] : memref<3x16x16xf32, #tpu.memory_space<vmem>>, vector<3x16x16xf32>
    %c0_3 = arith.constant 0 : index
    %c0_4 = arith.constant 0 : index
    %c0_5 = arith.constant 0 : index
    %5 = vector.load %arg3[%c0_3, %c0_4, %c0_5] : memref<3x16x16xf32, #tpu.memory_space<vmem>>, vector<3x16x16xf32>
    %6 = vector.extract_strided_slice %4 {offsets = [0, 0, 0], sizes = [3, 16, 6], strides = [1, 1, 1]} : vector<3x16x16xf32> to vector<3x16x6xf32>
    %cst = arith.constant 0.00102838036 : f32
    %7 = vector.broadcast %cst : f32 to vector<3x16x6xf32>
    %8 = arith.mulf %7, %6 : vector<3x16x6xf32>
    %9 = vector.extract_strided_slice %4 {offsets = [0, 0, 1], sizes = [3, 16, 6], strides = [1, 1, 1]} : vector<3x16x16xf32> to vector<3x16x6xf32>
    %cst_6 = arith.constant 0.00759875868 : f32
    %10 = vector.broadcast %cst_6 : f32 to vector<3x16x6xf32>
    %11 = arith.mulf %10, %9 : vector<3x16x6xf32>
    %12 = arith.addf %8, %11 : vector<3x16x6xf32>
    %13 = vector.extract_strided_slice %4 {offsets = [0, 0, 2], sizes = [3, 16, 6], strides = [1, 1, 1]} : vector<3x16x16xf32> to vector<3x16x6xf32>
    %cst_7 = arith.constant 0.0360007733 : f32
    %14 = vector.broadcast %cst_7 : f32 to vector<3x16x6xf32>
    %15 = arith.mulf %14, %13 : vector<3x16x6xf32>
    %16 = arith.addf %12, %15 : vector<3x16x6xf32>
    %17 = vector.extract_strided_slice %4 {offsets = [0, 0, 3], sizes = [3, 16, 6], strides = [1, 1, 1]} : vector<3x16x16xf32> to vector<3x16x6xf32>
    %cst_8 = arith.constant 0.109360702 : f32
    %18 = vector.broadcast %cst_8 : f32 to vector<3x16x6xf32>
    %19 = arith.mulf %18, %17 : vector<3x16x6xf32>
    %20 = arith.addf %16, %19 : vector<3x16x6xf32>
    %21 = vector.extract_strided_slice %4 {offsets = [0, 0, 4], sizes = [3, 16, 6], strides = [1, 1, 1]} : vector<3x16x16xf32> to vector<3x16x6xf32>
    %cst_9 = arith.constant 0.213005543 : f32
    %22 = vector.broadcast %cst_9 : f32 to vector<3x16x6xf32>
    %23 = arith.mulf %22, %21 : vector<3x16x6xf32>
    %24 = arith.addf %20, %23 : vector<3x16x6xf32>
    %25 = vector.extract_strided_slice %4 {offsets = [0, 0, 5], sizes = [3, 16, 6], strides = [1, 1, 1]} : vector<3x16x16xf32> to vector<3x16x6xf32>
    %cst_10 = arith.constant 0.266011745 : f32
    %26 = vector.broadcast %cst_10 : f32 to vector<3x16x6xf32>
    %27 = arith.mulf %26, %25 : vector<3x16x6xf32>
    %28 = arith.addf %24, %27 : vector<3x16x6xf32>
    %29 = vector.extract_strided_slice %4 {offsets = [0, 0, 6], sizes = [3, 16, 6], strides = [1, 1, 1]} : vector<3x16x16xf32> to vector<3x16x6xf32>
    %cst_11 = arith.constant 0.213005543 : f32
    %30 = vector.broadcast %cst_11 : f32 to vector<3x16x6xf32>
    %31 = arith.mulf %30, %29 : vector<3x16x6xf32>
    %32 = arith.addf %28, %31 : vector<3x16x6xf32>
    %33 = vector.extract_strided_slice %4 {offsets = [0, 0, 7], sizes = [3, 16, 6], strides = [1, 1, 1]} : vector<3x16x16xf32> to vector<3x16x6xf32>
    %cst_12 = arith.constant 0.109360702 : f32
    %34 = vector.broadcast %cst_12 : f32 to vector<3x16x6xf32>
    %35 = arith.mulf %34, %33 : vector<3x16x6xf32>
    %36 = arith.addf %32, %35 : vector<3x16x6xf32>
    %37 = vector.extract_strided_slice %4 {offsets = [0, 0, 8], sizes = [3, 16, 6], strides = [1, 1, 1]} : vector<3x16x16xf32> to vector<3x16x6xf32>
    %cst_13 = arith.constant 0.0360007733 : f32
    %38 = vector.broadcast %cst_13 : f32 to vector<3x16x6xf32>
    %39 = arith.mulf %38, %37 : vector<3x16x6xf32>
    %40 = arith.addf %36, %39 : vector<3x16x6xf32>
    %41 = vector.extract_strided_slice %4 {offsets = [0, 0, 9], sizes = [3, 16, 6], strides = [1, 1, 1]} : vector<3x16x16xf32> to vector<3x16x6xf32>
    %cst_14 = arith.constant 0.00759875868 : f32
    %42 = vector.broadcast %cst_14 : f32 to vector<3x16x6xf32>
    %43 = arith.mulf %42, %41 : vector<3x16x6xf32>
    %44 = arith.addf %40, %43 : vector<3x16x6xf32>
    %45 = vector.extract_strided_slice %4 {offsets = [0, 0, 10], sizes = [3, 16, 6], strides = [1, 1, 1]} : vector<3x16x16xf32> to vector<3x16x6xf32>
    %cst_15 = arith.constant 0.00102838036 : f32
    %46 = vector.broadcast %cst_15 : f32 to vector<3x16x6xf32>
    %47 = arith.mulf %46, %45 : vector<3x16x6xf32>
    %48 = arith.addf %44, %47 : vector<3x16x6xf32>
    %cst_16 = arith.constant 0.00102838036 : f32
    %49 = arith.mulf %0, %cst_16 : f32
    %50 = vector.extract_strided_slice %48 {offsets = [0, 0, 0], sizes = [3, 6, 6], strides = [1, 1, 1]} : vector<3x16x6xf32> to vector<3x6x6xf32>
    %51 = vector.broadcast %49 : f32 to vector<3x6x6xf32>
    %52 = arith.mulf %51, %50 : vector<3x6x6xf32>
    %cst_17 = arith.constant 0.00759875868 : f32
    %53 = arith.mulf %0, %cst_17 : f32
    %54 = vector.extract_strided_slice %48 {offsets = [0, 1, 0], sizes = [3, 6, 6], strides = [1, 1, 1]} : vector<3x16x6xf32> to vector<3x6x6xf32>
    %55 = vector.broadcast %53 : f32 to vector<3x6x6xf32>
    %56 = arith.mulf %55, %54 : vector<3x6x6xf32>
    %57 = arith.addf %52, %56 : vector<3x6x6xf32>
    %cst_18 = arith.constant 0.0360007733 : f32
    %58 = arith.mulf %0, %cst_18 : f32
    %59 = vector.extract_strided_slice %48 {offsets = [0, 2, 0], sizes = [3, 6, 6], strides = [1, 1, 1]} : vector<3x16x6xf32> to vector<3x6x6xf32>
    %60 = vector.broadcast %58 : f32 to vector<3x6x6xf32>
    %61 = arith.mulf %60, %59 : vector<3x6x6xf32>
    %62 = arith.addf %57, %61 : vector<3x6x6xf32>
    %cst_19 = arith.constant 0.109360702 : f32
    %63 = arith.mulf %0, %cst_19 : f32
    %64 = vector.extract_strided_slice %48 {offsets = [0, 3, 0], sizes = [3, 6, 6], strides = [1, 1, 1]} : vector<3x16x6xf32> to vector<3x6x6xf32>
    %65 = vector.broadcast %63 : f32 to vector<3x6x6xf32>
    %66 = arith.mulf %65, %64 : vector<3x6x6xf32>
    %67 = arith.addf %62, %66 : vector<3x6x6xf32>
    %cst_20 = arith.constant 0.213005543 : f32
    %68 = arith.mulf %0, %cst_20 : f32
    %69 = vector.extract_strided_slice %48 {offsets = [0, 4, 0], sizes = [3, 6, 6], strides = [1, 1, 1]} : vector<3x16x6xf32> to vector<3x6x6xf32>
    %70 = vector.broadcast %68 : f32 to vector<3x6x6xf32>
    %71 = arith.mulf %70, %69 : vector<3x6x6xf32>
    %72 = arith.addf %67, %71 : vector<3x6x6xf32>
    %cst_21 = arith.constant 0.266011745 : f32
    %73 = arith.mulf %0, %cst_21 : f32
    %74 = vector.extract_strided_slice %48 {offsets = [0, 5, 0], sizes = [3, 6, 6], strides = [1, 1, 1]} : vector<3x16x6xf32> to vector<3x6x6xf32>
    %75 = vector.broadcast %73 : f32 to vector<3x6x6xf32>
    %76 = arith.mulf %75, %74 : vector<3x6x6xf32>
    %77 = arith.addf %72, %76 : vector<3x6x6xf32>
    %cst_22 = arith.constant 0.213005543 : f32
    %78 = arith.mulf %0, %cst_22 : f32
    %79 = vector.extract_strided_slice %48 {offsets = [0, 6, 0], sizes = [3, 6, 6], strides = [1, 1, 1]} : vector<3x16x6xf32> to vector<3x6x6xf32>
    %80 = vector.broadcast %78 : f32 to vector<3x6x6xf32>
    %81 = arith.mulf %80, %79 : vector<3x6x6xf32>
    %82 = arith.addf %77, %81 : vector<3x6x6xf32>
    %cst_23 = arith.constant 0.109360702 : f32
    %83 = arith.mulf %0, %cst_23 : f32
    %84 = vector.extract_strided_slice %48 {offsets = [0, 7, 0], sizes = [3, 6, 6], strides = [1, 1, 1]} : vector<3x16x6xf32> to vector<3x6x6xf32>
    %85 = vector.broadcast %83 : f32 to vector<3x6x6xf32>
    %86 = arith.mulf %85, %84 : vector<3x6x6xf32>
    %87 = arith.addf %82, %86 : vector<3x6x6xf32>
    %cst_24 = arith.constant 0.0360007733 : f32
    %88 = arith.mulf %0, %cst_24 : f32
    %89 = vector.extract_strided_slice %48 {offsets = [0, 8, 0], sizes = [3, 6, 6], strides = [1, 1, 1]} : vector<3x16x6xf32> to vector<3x6x6xf32>
    %90 = vector.broadcast %88 : f32 to vector<3x6x6xf32>
    %91 = arith.mulf %90, %89 : vector<3x6x6xf32>
    %92 = arith.addf %87, %91 : vector<3x6x6xf32>
    %cst_25 = arith.constant 0.00759875868 : f32
    %93 = arith.mulf %0, %cst_25 : f32
    %94 = vector.extract_strided_slice %48 {offsets = [0, 9, 0], sizes = [3, 6, 6], strides = [1, 1, 1]} : vector<3x16x6xf32> to vector<3x6x6xf32>
    %95 = vector.broadcast %93 : f32 to vector<3x6x6xf32>
    %96 = arith.mulf %95, %94 : vector<3x6x6xf32>
    %97 = arith.addf %92, %96 : vector<3x6x6xf32>
    %cst_26 = arith.constant 0.00102838036 : f32
    %98 = arith.mulf %0, %cst_26 : f32
    %99 = vector.extract_strided_slice %48 {offsets = [0, 10, 0], sizes = [3, 6, 6], strides = [1, 1, 1]} : vector<3x16x6xf32> to vector<3x6x6xf32>
    %100 = vector.broadcast %98 : f32 to vector<3x6x6xf32>
    %101 = arith.mulf %100, %99 : vector<3x6x6xf32>
    %102 = arith.addf %97, %101 : vector<3x6x6xf32>
    %103 = vector.extract_strided_slice %5 {offsets = [0, 0, 0], sizes = [3, 16, 6], strides = [1, 1, 1]} : vector<3x16x16xf32> to vector<3x16x6xf32>
    %cst_27 = arith.constant 0.00102838036 : f32
    %104 = vector.broadcast %cst_27 : f32 to vector<3x16x6xf32>
    %105 = arith.mulf %104, %103 : vector<3x16x6xf32>
    %106 = vector.extract_strided_slice %5 {offsets = [0, 0, 1], sizes = [3, 16, 6], strides = [1, 1, 1]} : vector<3x16x16xf32> to vector<3x16x6xf32>
    %cst_28 = arith.constant 0.00759875868 : f32
    %107 = vector.broadcast %cst_28 : f32 to vector<3x16x6xf32>
    %108 = arith.mulf %107, %106 : vector<3x16x6xf32>
    %109 = arith.addf %105, %108 : vector<3x16x6xf32>
    %110 = vector.extract_strided_slice %5 {offsets = [0, 0, 2], sizes = [3, 16, 6], strides = [1, 1, 1]} : vector<3x16x16xf32> to vector<3x16x6xf32>
    %cst_29 = arith.constant 0.0360007733 : f32
    %111 = vector.broadcast %cst_29 : f32 to vector<3x16x6xf32>
    %112 = arith.mulf %111, %110 : vector<3x16x6xf32>
    %113 = arith.addf %109, %112 : vector<3x16x6xf32>
    %114 = vector.extract_strided_slice %5 {offsets = [0, 0, 3], sizes = [3, 16, 6], strides = [1, 1, 1]} : vector<3x16x16xf32> to vector<3x16x6xf32>
    %cst_30 = arith.constant 0.109360702 : f32
    %115 = vector.broadcast %cst_30 : f32 to vector<3x16x6xf32>
    %116 = arith.mulf %115, %114 : vector<3x16x6xf32>
    %117 = arith.addf %113, %116 : vector<3x16x6xf32>
    %118 = vector.extract_strided_slice %5 {offsets = [0, 0, 4], sizes = [3, 16, 6], strides = [1, 1, 1]} : vector<3x16x16xf32> to vector<3x16x6xf32>
    %cst_31 = arith.constant 0.213005543 : f32
    %119 = vector.broadcast %cst_31 : f32 to vector<3x16x6xf32>
    %120 = arith.mulf %119, %118 : vector<3x16x6xf32>
    %121 = arith.addf %117, %120 : vector<3x16x6xf32>
    %122 = vector.extract_strided_slice %5 {offsets = [0, 0, 5], sizes = [3, 16, 6], strides = [1, 1, 1]} : vector<3x16x16xf32> to vector<3x16x6xf32>
    %cst_32 = arith.constant 0.266011745 : f32
    %123 = vector.broadcast %cst_32 : f32 to vector<3x16x6xf32>
    %124 = arith.mulf %123, %122 : vector<3x16x6xf32>
    %125 = arith.addf %121, %124 : vector<3x16x6xf32>
    %126 = vector.extract_strided_slice %5 {offsets = [0, 0, 6], sizes = [3, 16, 6], strides = [1, 1, 1]} : vector<3x16x16xf32> to vector<3x16x6xf32>
    %cst_33 = arith.constant 0.213005543 : f32
    %127 = vector.broadcast %cst_33 : f32 to vector<3x16x6xf32>
    %128 = arith.mulf %127, %126 : vector<3x16x6xf32>
    %129 = arith.addf %125, %128 : vector<3x16x6xf32>
    %130 = vector.extract_strided_slice %5 {offsets = [0, 0, 7], sizes = [3, 16, 6], strides = [1, 1, 1]} : vector<3x16x16xf32> to vector<3x16x6xf32>
    %cst_34 = arith.constant 0.109360702 : f32
    %131 = vector.broadcast %cst_34 : f32 to vector<3x16x6xf32>
    %132 = arith.mulf %131, %130 : vector<3x16x6xf32>
    %133 = arith.addf %129, %132 : vector<3x16x6xf32>
    %134 = vector.extract_strided_slice %5 {offsets = [0, 0, 8], sizes = [3, 16, 6], strides = [1, 1, 1]} : vector<3x16x16xf32> to vector<3x16x6xf32>
    %cst_35 = arith.constant 0.0360007733 : f32
    %135 = vector.broadcast %cst_35 : f32 to vector<3x16x6xf32>
    %136 = arith.mulf %135, %134 : vector<3x16x6xf32>
    %137 = arith.addf %133, %136 : vector<3x16x6xf32>
    %138 = vector.extract_strided_slice %5 {offsets = [0, 0, 9], sizes = [3, 16, 6], strides = [1, 1, 1]} : vector<3x16x16xf32> to vector<3x16x6xf32>
    %cst_36 = arith.constant 0.00759875868 : f32
    %139 = vector.broadcast %cst_36 : f32 to vector<3x16x6xf32>
    %140 = arith.mulf %139, %138 : vector<3x16x6xf32>
    %141 = arith.addf %137, %140 : vector<3x16x6xf32>
    %142 = vector.extract_strided_slice %5 {offsets = [0, 0, 10], sizes = [3, 16, 6], strides = [1, 1, 1]} : vector<3x16x16xf32> to vector<3x16x6xf32>
    %cst_37 = arith.constant 0.00102838036 : f32
    %143 = vector.broadcast %cst_37 : f32 to vector<3x16x6xf32>
    %144 = arith.mulf %143, %142 : vector<3x16x6xf32>
    %145 = arith.addf %141, %144 : vector<3x16x6xf32>
    %cst_38 = arith.constant 0.00102838036 : f32
    %146 = arith.mulf %1, %cst_38 : f32
    %147 = vector.extract_strided_slice %145 {offsets = [0, 0, 0], sizes = [3, 6, 6], strides = [1, 1, 1]} : vector<3x16x6xf32> to vector<3x6x6xf32>
    %148 = vector.broadcast %146 : f32 to vector<3x6x6xf32>
    %149 = arith.mulf %148, %147 : vector<3x6x6xf32>
    %cst_39 = arith.constant 0.00759875868 : f32
    %150 = arith.mulf %1, %cst_39 : f32
    %151 = vector.extract_strided_slice %145 {offsets = [0, 1, 0], sizes = [3, 6, 6], strides = [1, 1, 1]} : vector<3x16x6xf32> to vector<3x6x6xf32>
    %152 = vector.broadcast %150 : f32 to vector<3x6x6xf32>
    %153 = arith.mulf %152, %151 : vector<3x6x6xf32>
    %154 = arith.addf %149, %153 : vector<3x6x6xf32>
    %cst_40 = arith.constant 0.0360007733 : f32
    %155 = arith.mulf %1, %cst_40 : f32
    %156 = vector.extract_strided_slice %145 {offsets = [0, 2, 0], sizes = [3, 6, 6], strides = [1, 1, 1]} : vector<3x16x6xf32> to vector<3x6x6xf32>
    %157 = vector.broadcast %155 : f32 to vector<3x6x6xf32>
    %158 = arith.mulf %157, %156 : vector<3x6x6xf32>
    %159 = arith.addf %154, %158 : vector<3x6x6xf32>
    %cst_41 = arith.constant 0.109360702 : f32
    %160 = arith.mulf %1, %cst_41 : f32
    %161 = vector.extract_strided_slice %145 {offsets = [0, 3, 0], sizes = [3, 6, 6], strides = [1, 1, 1]} : vector<3x16x6xf32> to vector<3x6x6xf32>
    %162 = vector.broadcast %160 : f32 to vector<3x6x6xf32>
    %163 = arith.mulf %162, %161 : vector<3x6x6xf32>
    %164 = arith.addf %159, %163 : vector<3x6x6xf32>
    %cst_42 = arith.constant 0.213005543 : f32
    %165 = arith.mulf %1, %cst_42 : f32
    %166 = vector.extract_strided_slice %145 {offsets = [0, 4, 0], sizes = [3, 6, 6], strides = [1, 1, 1]} : vector<3x16x6xf32> to vector<3x6x6xf32>
    %167 = vector.broadcast %165 : f32 to vector<3x6x6xf32>
    %168 = arith.mulf %167, %166 : vector<3x6x6xf32>
    %169 = arith.addf %164, %168 : vector<3x6x6xf32>
    %cst_43 = arith.constant 0.266011745 : f32
    %170 = arith.mulf %1, %cst_43 : f32
    %171 = vector.extract_strided_slice %145 {offsets = [0, 5, 0], sizes = [3, 6, 6], strides = [1, 1, 1]} : vector<3x16x6xf32> to vector<3x6x6xf32>
    %172 = vector.broadcast %170 : f32 to vector<3x6x6xf32>
    %173 = arith.mulf %172, %171 : vector<3x6x6xf32>
    %174 = arith.addf %169, %173 : vector<3x6x6xf32>
    %cst_44 = arith.constant 0.213005543 : f32
    %175 = arith.mulf %1, %cst_44 : f32
    %176 = vector.extract_strided_slice %145 {offsets = [0, 6, 0], sizes = [3, 6, 6], strides = [1, 1, 1]} : vector<3x16x6xf32> to vector<3x6x6xf32>
    %177 = vector.broadcast %175 : f32 to vector<3x6x6xf32>
    %178 = arith.mulf %177, %176 : vector<3x6x6xf32>
    %179 = arith.addf %174, %178 : vector<3x6x6xf32>
    %cst_45 = arith.constant 0.109360702 : f32
    %180 = arith.mulf %1, %cst_45 : f32
    %181 = vector.extract_strided_slice %145 {offsets = [0, 7, 0], sizes = [3, 6, 6], strides = [1, 1, 1]} : vector<3x16x6xf32> to vector<3x6x6xf32>
    %182 = vector.broadcast %180 : f32 to vector<3x6x6xf32>
    %183 = arith.mulf %182, %181 : vector<3x6x6xf32>
    %184 = arith.addf %179, %183 : vector<3x6x6xf32>
    %cst_46 = arith.constant 0.0360007733 : f32
    %185 = arith.mulf %1, %cst_46 : f32
    %186 = vector.extract_strided_slice %145 {offsets = [0, 8, 0], sizes = [3, 6, 6], strides = [1, 1, 1]} : vector<3x16x6xf32> to vector<3x6x6xf32>
    %187 = vector.broadcast %185 : f32 to vector<3x6x6xf32>
    %188 = arith.mulf %187, %186 : vector<3x6x6xf32>
    %189 = arith.addf %184, %188 : vector<3x6x6xf32>
    %cst_47 = arith.constant 0.00759875868 : f32
    %190 = arith.mulf %1, %cst_47 : f32
    %191 = vector.extract_strided_slice %145 {offsets = [0, 9, 0], sizes = [3, 6, 6], strides = [1, 1, 1]} : vector<3x16x6xf32> to vector<3x6x6xf32>
    %192 = vector.broadcast %190 : f32 to vector<3x6x6xf32>
    %193 = arith.mulf %192, %191 : vector<3x6x6xf32>
    %194 = arith.addf %189, %193 : vector<3x6x6xf32>
    %cst_48 = arith.constant 0.00102838036 : f32
    %195 = arith.mulf %1, %cst_48 : f32
    %196 = vector.extract_strided_slice %145 {offsets = [0, 10, 0], sizes = [3, 6, 6], strides = [1, 1, 1]} : vector<3x16x6xf32> to vector<3x6x6xf32>
    %197 = vector.broadcast %195 : f32 to vector<3x6x6xf32>
    %198 = arith.mulf %197, %196 : vector<3x6x6xf32>
    %199 = arith.addf %194, %198 : vector<3x6x6xf32>
    %200 = arith.mulf %4, %4 : vector<3x16x16xf32>
    %201 = arith.mulf %0, %0 : f32
    %202 = vector.extract_strided_slice %200 {offsets = [0, 0, 0], sizes = [3, 16, 6], strides = [1, 1, 1]} : vector<3x16x16xf32> to vector<3x16x6xf32>
    %cst_49 = arith.constant 0.00102838036 : f32
    %203 = vector.broadcast %cst_49 : f32 to vector<3x16x6xf32>
    %204 = arith.mulf %203, %202 : vector<3x16x6xf32>
    %205 = vector.extract_strided_slice %200 {offsets = [0, 0, 1], sizes = [3, 16, 6], strides = [1, 1, 1]} : vector<3x16x16xf32> to vector<3x16x6xf32>
    %cst_50 = arith.constant 0.00759875868 : f32
    %206 = vector.broadcast %cst_50 : f32 to vector<3x16x6xf32>
    %207 = arith.mulf %206, %205 : vector<3x16x6xf32>
    %208 = arith.addf %204, %207 : vector<3x16x6xf32>
    %209 = vector.extract_strided_slice %200 {offsets = [0, 0, 2], sizes = [3, 16, 6], strides = [1, 1, 1]} : vector<3x16x16xf32> to vector<3x16x6xf32>
    %cst_51 = arith.constant 0.0360007733 : f32
    %210 = vector.broadcast %cst_51 : f32 to vector<3x16x6xf32>
    %211 = arith.mulf %210, %209 : vector<3x16x6xf32>
    %212 = arith.addf %208, %211 : vector<3x16x6xf32>
    %213 = vector.extract_strided_slice %200 {offsets = [0, 0, 3], sizes = [3, 16, 6], strides = [1, 1, 1]} : vector<3x16x16xf32> to vector<3x16x6xf32>
    %cst_52 = arith.constant 0.109360702 : f32
    %214 = vector.broadcast %cst_52 : f32 to vector<3x16x6xf32>
    %215 = arith.mulf %214, %213 : vector<3x16x6xf32>
    %216 = arith.addf %212, %215 : vector<3x16x6xf32>
    %217 = vector.extract_strided_slice %200 {offsets = [0, 0, 4], sizes = [3, 16, 6], strides = [1, 1, 1]} : vector<3x16x16xf32> to vector<3x16x6xf32>
    %cst_53 = arith.constant 0.213005543 : f32
    %218 = vector.broadcast %cst_53 : f32 to vector<3x16x6xf32>
    %219 = arith.mulf %218, %217 : vector<3x16x6xf32>
    %220 = arith.addf %216, %219 : vector<3x16x6xf32>
    %221 = vector.extract_strided_slice %200 {offsets = [0, 0, 5], sizes = [3, 16, 6], strides = [1, 1, 1]} : vector<3x16x16xf32> to vector<3x16x6xf32>
    %cst_54 = arith.constant 0.266011745 : f32
    %222 = vector.broadcast %cst_54 : f32 to vector<3x16x6xf32>
    %223 = arith.mulf %222, %221 : vector<3x16x6xf32>
    %224 = arith.addf %220, %223 : vector<3x16x6xf32>
    %225 = vector.extract_strided_slice %200 {offsets = [0, 0, 6], sizes = [3, 16, 6], strides = [1, 1, 1]} : vector<3x16x16xf32> to vector<3x16x6xf32>
    %cst_55 = arith.constant 0.213005543 : f32
    %226 = vector.broadcast %cst_55 : f32 to vector<3x16x6xf32>
    %227 = arith.mulf %226, %225 : vector<3x16x6xf32>
    %228 = arith.addf %224, %227 : vector<3x16x6xf32>
    %229 = vector.extract_strided_slice %200 {offsets = [0, 0, 7], sizes = [3, 16, 6], strides = [1, 1, 1]} : vector<3x16x16xf32> to vector<3x16x6xf32>
    %cst_56 = arith.constant 0.109360702 : f32
    %230 = vector.broadcast %cst_56 : f32 to vector<3x16x6xf32>
    %231 = arith.mulf %230, %229 : vector<3x16x6xf32>
    %232 = arith.addf %228, %231 : vector<3x16x6xf32>
    %233 = vector.extract_strided_slice %200 {offsets = [0, 0, 8], sizes = [3, 16, 6], strides = [1, 1, 1]} : vector<3x16x16xf32> to vector<3x16x6xf32>
    %cst_57 = arith.constant 0.0360007733 : f32
    %234 = vector.broadcast %cst_57 : f32 to vector<3x16x6xf32>
    %235 = arith.mulf %234, %233 : vector<3x16x6xf32>
    %236 = arith.addf %232, %235 : vector<3x16x6xf32>
    %237 = vector.extract_strided_slice %200 {offsets = [0, 0, 9], sizes = [3, 16, 6], strides = [1, 1, 1]} : vector<3x16x16xf32> to vector<3x16x6xf32>
    %cst_58 = arith.constant 0.00759875868 : f32
    %238 = vector.broadcast %cst_58 : f32 to vector<3x16x6xf32>
    %239 = arith.mulf %238, %237 : vector<3x16x6xf32>
    %240 = arith.addf %236, %239 : vector<3x16x6xf32>
    %241 = vector.extract_strided_slice %200 {offsets = [0, 0, 10], sizes = [3, 16, 6], strides = [1, 1, 1]} : vector<3x16x16xf32> to vector<3x16x6xf32>
    %cst_59 = arith.constant 0.00102838036 : f32
    %242 = vector.broadcast %cst_59 : f32 to vector<3x16x6xf32>
    %243 = arith.mulf %242, %241 : vector<3x16x6xf32>
    %244 = arith.addf %240, %243 : vector<3x16x6xf32>
    %cst_60 = arith.constant 0.00102838036 : f32
    %245 = arith.mulf %201, %cst_60 : f32
    %246 = vector.extract_strided_slice %244 {offsets = [0, 0, 0], sizes = [3, 6, 6], strides = [1, 1, 1]} : vector<3x16x6xf32> to vector<3x6x6xf32>
    %247 = vector.broadcast %245 : f32 to vector<3x6x6xf32>
    %248 = arith.mulf %247, %246 : vector<3x6x6xf32>
    %cst_61 = arith.constant 0.00759875868 : f32
    %249 = arith.mulf %201, %cst_61 : f32
    %250 = vector.extract_strided_slice %244 {offsets = [0, 1, 0], sizes = [3, 6, 6], strides = [1, 1, 1]} : vector<3x16x6xf32> to vector<3x6x6xf32>
    %251 = vector.broadcast %249 : f32 to vector<3x6x6xf32>
    %252 = arith.mulf %251, %250 : vector<3x6x6xf32>
    %253 = arith.addf %248, %252 : vector<3x6x6xf32>
    %cst_62 = arith.constant 0.0360007733 : f32
    %254 = arith.mulf %201, %cst_62 : f32
    %255 = vector.extract_strided_slice %244 {offsets = [0, 2, 0], sizes = [3, 6, 6], strides = [1, 1, 1]} : vector<3x16x6xf32> to vector<3x6x6xf32>
    %256 = vector.broadcast %254 : f32 to vector<3x6x6xf32>
    %257 = arith.mulf %256, %255 : vector<3x6x6xf32>
    %258 = arith.addf %253, %257 : vector<3x6x6xf32>
    %cst_63 = arith.constant 0.109360702 : f32
    %259 = arith.mulf %201, %cst_63 : f32
    %260 = vector.extract_strided_slice %244 {offsets = [0, 3, 0], sizes = [3, 6, 6], strides = [1, 1, 1]} : vector<3x16x6xf32> to vector<3x6x6xf32>
    %261 = vector.broadcast %259 : f32 to vector<3x6x6xf32>
    %262 = arith.mulf %261, %260 : vector<3x6x6xf32>
    %263 = arith.addf %258, %262 : vector<3x6x6xf32>
    %cst_64 = arith.constant 0.213005543 : f32
    %264 = arith.mulf %201, %cst_64 : f32
    %265 = vector.extract_strided_slice %244 {offsets = [0, 4, 0], sizes = [3, 6, 6], strides = [1, 1, 1]} : vector<3x16x6xf32> to vector<3x6x6xf32>
    %266 = vector.broadcast %264 : f32 to vector<3x6x6xf32>
    %267 = arith.mulf %266, %265 : vector<3x6x6xf32>
    %268 = arith.addf %263, %267 : vector<3x6x6xf32>
    %cst_65 = arith.constant 0.266011745 : f32
    %269 = arith.mulf %201, %cst_65 : f32
    %270 = vector.extract_strided_slice %244 {offsets = [0, 5, 0], sizes = [3, 6, 6], strides = [1, 1, 1]} : vector<3x16x6xf32> to vector<3x6x6xf32>
    %271 = vector.broadcast %269 : f32 to vector<3x6x6xf32>
    %272 = arith.mulf %271, %270 : vector<3x6x6xf32>
    %273 = arith.addf %268, %272 : vector<3x6x6xf32>
    %cst_66 = arith.constant 0.213005543 : f32
    %274 = arith.mulf %201, %cst_66 : f32
    %275 = vector.extract_strided_slice %244 {offsets = [0, 6, 0], sizes = [3, 6, 6], strides = [1, 1, 1]} : vector<3x16x6xf32> to vector<3x6x6xf32>
    %276 = vector.broadcast %274 : f32 to vector<3x6x6xf32>
    %277 = arith.mulf %276, %275 : vector<3x6x6xf32>
    %278 = arith.addf %273, %277 : vector<3x6x6xf32>
    %cst_67 = arith.constant 0.109360702 : f32
    %279 = arith.mulf %201, %cst_67 : f32
    %280 = vector.extract_strided_slice %244 {offsets = [0, 7, 0], sizes = [3, 6, 6], strides = [1, 1, 1]} : vector<3x16x6xf32> to vector<3x6x6xf32>
    %281 = vector.broadcast %279 : f32 to vector<3x6x6xf32>
    %282 = arith.mulf %281, %280 : vector<3x6x6xf32>
    %283 = arith.addf %278, %282 : vector<3x6x6xf32>
    %cst_68 = arith.constant 0.0360007733 : f32
    %284 = arith.mulf %201, %cst_68 : f32
    %285 = vector.extract_strided_slice %244 {offsets = [0, 8, 0], sizes = [3, 6, 6], strides = [1, 1, 1]} : vector<3x16x6xf32> to vector<3x6x6xf32>
    %286 = vector.broadcast %284 : f32 to vector<3x6x6xf32>
    %287 = arith.mulf %286, %285 : vector<3x6x6xf32>
    %288 = arith.addf %283, %287 : vector<3x6x6xf32>
    %cst_69 = arith.constant 0.00759875868 : f32
    %289 = arith.mulf %201, %cst_69 : f32
    %290 = vector.extract_strided_slice %244 {offsets = [0, 9, 0], sizes = [3, 6, 6], strides = [1, 1, 1]} : vector<3x16x6xf32> to vector<3x6x6xf32>
    %291 = vector.broadcast %289 : f32 to vector<3x6x6xf32>
    %292 = arith.mulf %291, %290 : vector<3x6x6xf32>
    %293 = arith.addf %288, %292 : vector<3x6x6xf32>
    %cst_70 = arith.constant 0.00102838036 : f32
    %294 = arith.mulf %201, %cst_70 : f32
    %295 = vector.extract_strided_slice %244 {offsets = [0, 10, 0], sizes = [3, 6, 6], strides = [1, 1, 1]} : vector<3x16x6xf32> to vector<3x6x6xf32>
    %296 = vector.broadcast %294 : f32 to vector<3x6x6xf32>
    %297 = arith.mulf %296, %295 : vector<3x6x6xf32>
    %298 = arith.addf %293, %297 : vector<3x6x6xf32>
    %299 = arith.mulf %5, %5 : vector<3x16x16xf32>
    %300 = arith.mulf %1, %1 : f32
    %301 = vector.extract_strided_slice %299 {offsets = [0, 0, 0], sizes = [3, 16, 6], strides = [1, 1, 1]} : vector<3x16x16xf32> to vector<3x16x6xf32>
    %cst_71 = arith.constant 0.00102838036 : f32
    %302 = vector.broadcast %cst_71 : f32 to vector<3x16x6xf32>
    %303 = arith.mulf %302, %301 : vector<3x16x6xf32>
    %304 = vector.extract_strided_slice %299 {offsets = [0, 0, 1], sizes = [3, 16, 6], strides = [1, 1, 1]} : vector<3x16x16xf32> to vector<3x16x6xf32>
    %cst_72 = arith.constant 0.00759875868 : f32
    %305 = vector.broadcast %cst_72 : f32 to vector<3x16x6xf32>
    %306 = arith.mulf %305, %304 : vector<3x16x6xf32>
    %307 = arith.addf %303, %306 : vector<3x16x6xf32>
    %308 = vector.extract_strided_slice %299 {offsets = [0, 0, 2], sizes = [3, 16, 6], strides = [1, 1, 1]} : vector<3x16x16xf32> to vector<3x16x6xf32>
    %cst_73 = arith.constant 0.0360007733 : f32
    %309 = vector.broadcast %cst_73 : f32 to vector<3x16x6xf32>
    %310 = arith.mulf %309, %308 : vector<3x16x6xf32>
    %311 = arith.addf %307, %310 : vector<3x16x6xf32>
    %312 = vector.extract_strided_slice %299 {offsets = [0, 0, 3], sizes = [3, 16, 6], strides = [1, 1, 1]} : vector<3x16x16xf32> to vector<3x16x6xf32>
    %cst_74 = arith.constant 0.109360702 : f32
    %313 = vector.broadcast %cst_74 : f32 to vector<3x16x6xf32>
    %314 = arith.mulf %313, %312 : vector<3x16x6xf32>
    %315 = arith.addf %311, %314 : vector<3x16x6xf32>
    %316 = vector.extract_strided_slice %299 {offsets = [0, 0, 4], sizes = [3, 16, 6], strides = [1, 1, 1]} : vector<3x16x16xf32> to vector<3x16x6xf32>
    %cst_75 = arith.constant 0.213005543 : f32
    %317 = vector.broadcast %cst_75 : f32 to vector<3x16x6xf32>
    %318 = arith.mulf %317, %316 : vector<3x16x6xf32>
    %319 = arith.addf %315, %318 : vector<3x16x6xf32>
    %320 = vector.extract_strided_slice %299 {offsets = [0, 0, 5], sizes = [3, 16, 6], strides = [1, 1, 1]} : vector<3x16x16xf32> to vector<3x16x6xf32>
    %cst_76 = arith.constant 0.266011745 : f32
    %321 = vector.broadcast %cst_76 : f32 to vector<3x16x6xf32>
    %322 = arith.mulf %321, %320 : vector<3x16x6xf32>
    %323 = arith.addf %319, %322 : vector<3x16x6xf32>
    %324 = vector.extract_strided_slice %299 {offsets = [0, 0, 6], sizes = [3, 16, 6], strides = [1, 1, 1]} : vector<3x16x16xf32> to vector<3x16x6xf32>
    %cst_77 = arith.constant 0.213005543 : f32
    %325 = vector.broadcast %cst_77 : f32 to vector<3x16x6xf32>
    %326 = arith.mulf %325, %324 : vector<3x16x6xf32>
    %327 = arith.addf %323, %326 : vector<3x16x6xf32>
    %328 = vector.extract_strided_slice %299 {offsets = [0, 0, 7], sizes = [3, 16, 6], strides = [1, 1, 1]} : vector<3x16x16xf32> to vector<3x16x6xf32>
    %cst_78 = arith.constant 0.109360702 : f32
    %329 = vector.broadcast %cst_78 : f32 to vector<3x16x6xf32>
    %330 = arith.mulf %329, %328 : vector<3x16x6xf32>
    %331 = arith.addf %327, %330 : vector<3x16x6xf32>
    %332 = vector.extract_strided_slice %299 {offsets = [0, 0, 8], sizes = [3, 16, 6], strides = [1, 1, 1]} : vector<3x16x16xf32> to vector<3x16x6xf32>
    %cst_79 = arith.constant 0.0360007733 : f32
    %333 = vector.broadcast %cst_79 : f32 to vector<3x16x6xf32>
    %334 = arith.mulf %333, %332 : vector<3x16x6xf32>
    %335 = arith.addf %331, %334 : vector<3x16x6xf32>
    %336 = vector.extract_strided_slice %299 {offsets = [0, 0, 9], sizes = [3, 16, 6], strides = [1, 1, 1]} : vector<3x16x16xf32> to vector<3x16x6xf32>
    %cst_80 = arith.constant 0.00759875868 : f32
    %337 = vector.broadcast %cst_80 : f32 to vector<3x16x6xf32>
    %338 = arith.mulf %337, %336 : vector<3x16x6xf32>
    %339 = arith.addf %335, %338 : vector<3x16x6xf32>
    %340 = vector.extract_strided_slice %299 {offsets = [0, 0, 10], sizes = [3, 16, 6], strides = [1, 1, 1]} : vector<3x16x16xf32> to vector<3x16x6xf32>
    %cst_81 = arith.constant 0.00102838036 : f32
    %341 = vector.broadcast %cst_81 : f32 to vector<3x16x6xf32>
    %342 = arith.mulf %341, %340 : vector<3x16x6xf32>
    %343 = arith.addf %339, %342 : vector<3x16x6xf32>
    %cst_82 = arith.constant 0.00102838036 : f32
    %344 = arith.mulf %300, %cst_82 : f32
    %345 = vector.extract_strided_slice %343 {offsets = [0, 0, 0], sizes = [3, 6, 6], strides = [1, 1, 1]} : vector<3x16x6xf32> to vector<3x6x6xf32>
    %346 = vector.broadcast %344 : f32 to vector<3x6x6xf32>
    %347 = arith.mulf %346, %345 : vector<3x6x6xf32>
    %cst_83 = arith.constant 0.00759875868 : f32
    %348 = arith.mulf %300, %cst_83 : f32
    %349 = vector.extract_strided_slice %343 {offsets = [0, 1, 0], sizes = [3, 6, 6], strides = [1, 1, 1]} : vector<3x16x6xf32> to vector<3x6x6xf32>
    %350 = vector.broadcast %348 : f32 to vector<3x6x6xf32>
    %351 = arith.mulf %350, %349 : vector<3x6x6xf32>
    %352 = arith.addf %347, %351 : vector<3x6x6xf32>
    %cst_84 = arith.constant 0.0360007733 : f32
    %353 = arith.mulf %300, %cst_84 : f32
    %354 = vector.extract_strided_slice %343 {offsets = [0, 2, 0], sizes = [3, 6, 6], strides = [1, 1, 1]} : vector<3x16x6xf32> to vector<3x6x6xf32>
    %355 = vector.broadcast %353 : f32 to vector<3x6x6xf32>
    %356 = arith.mulf %355, %354 : vector<3x6x6xf32>
    %357 = arith.addf %352, %356 : vector<3x6x6xf32>
    %cst_85 = arith.constant 0.109360702 : f32
    %358 = arith.mulf %300, %cst_85 : f32
    %359 = vector.extract_strided_slice %343 {offsets = [0, 3, 0], sizes = [3, 6, 6], strides = [1, 1, 1]} : vector<3x16x6xf32> to vector<3x6x6xf32>
    %360 = vector.broadcast %358 : f32 to vector<3x6x6xf32>
    %361 = arith.mulf %360, %359 : vector<3x6x6xf32>
    %362 = arith.addf %357, %361 : vector<3x6x6xf32>
    %cst_86 = arith.constant 0.213005543 : f32
    %363 = arith.mulf %300, %cst_86 : f32
    %364 = vector.extract_strided_slice %343 {offsets = [0, 4, 0], sizes = [3, 6, 6], strides = [1, 1, 1]} : vector<3x16x6xf32> to vector<3x6x6xf32>
    %365 = vector.broadcast %363 : f32 to vector<3x6x6xf32>
    %366 = arith.mulf %365, %364 : vector<3x6x6xf32>
    %367 = arith.addf %362, %366 : vector<3x6x6xf32>
    %cst_87 = arith.constant 0.266011745 : f32
    %368 = arith.mulf %300, %cst_87 : f32
    %369 = vector.extract_strided_slice %343 {offsets = [0, 5, 0], sizes = [3, 6, 6], strides = [1, 1, 1]} : vector<3x16x6xf32> to vector<3x6x6xf32>
    %370 = vector.broadcast %368 : f32 to vector<3x6x6xf32>
    %371 = arith.mulf %370, %369 : vector<3x6x6xf32>
    %372 = arith.addf %367, %371 : vector<3x6x6xf32>
    %cst_88 = arith.constant 0.213005543 : f32
    %373 = arith.mulf %300, %cst_88 : f32
    %374 = vector.extract_strided_slice %343 {offsets = [0, 6, 0], sizes = [3, 6, 6], strides = [1, 1, 1]} : vector<3x16x6xf32> to vector<3x6x6xf32>
    %375 = vector.broadcast %373 : f32 to vector<3x6x6xf32>
    %376 = arith.mulf %375, %374 : vector<3x6x6xf32>
    %377 = arith.addf %372, %376 : vector<3x6x6xf32>
    %cst_89 = arith.constant 0.109360702 : f32
    %378 = arith.mulf %300, %cst_89 : f32
    %379 = vector.extract_strided_slice %343 {offsets = [0, 7, 0], sizes = [3, 6, 6], strides = [1, 1, 1]} : vector<3x16x6xf32> to vector<3x6x6xf32>
    %380 = vector.broadcast %378 : f32 to vector<3x6x6xf32>
    %381 = arith.mulf %380, %379 : vector<3x6x6xf32>
    %382 = arith.addf %377, %381 : vector<3x6x6xf32>
    %cst_90 = arith.constant 0.0360007733 : f32
    %383 = arith.mulf %300, %cst_90 : f32
    %384 = vector.extract_strided_slice %343 {offsets = [0, 8, 0], sizes = [3, 6, 6], strides = [1, 1, 1]} : vector<3x16x6xf32> to vector<3x6x6xf32>
    %385 = vector.broadcast %383 : f32 to vector<3x6x6xf32>
    %386 = arith.mulf %385, %384 : vector<3x6x6xf32>
    %387 = arith.addf %382, %386 : vector<3x6x6xf32>
    %cst_91 = arith.constant 0.00759875868 : f32
    %388 = arith.mulf %300, %cst_91 : f32
    %389 = vector.extract_strided_slice %343 {offsets = [0, 9, 0], sizes = [3, 6, 6], strides = [1, 1, 1]} : vector<3x16x6xf32> to vector<3x6x6xf32>
    %390 = vector.broadcast %388 : f32 to vector<3x6x6xf32>
    %391 = arith.mulf %390, %389 : vector<3x6x6xf32>
    %392 = arith.addf %387, %391 : vector<3x6x6xf32>
    %cst_92 = arith.constant 0.00102838036 : f32
    %393 = arith.mulf %300, %cst_92 : f32
    %394 = vector.extract_strided_slice %343 {offsets = [0, 10, 0], sizes = [3, 6, 6], strides = [1, 1, 1]} : vector<3x16x6xf32> to vector<3x6x6xf32>
    %395 = vector.broadcast %393 : f32 to vector<3x6x6xf32>
    %396 = arith.mulf %395, %394 : vector<3x6x6xf32>
    %397 = arith.addf %392, %396 : vector<3x6x6xf32>
    %398 = arith.mulf %4, %5 : vector<3x16x16xf32>
    %399 = arith.mulf %0, %1 : f32
    %400 = vector.extract_strided_slice %398 {offsets = [0, 0, 0], sizes = [3, 16, 6], strides = [1, 1, 1]} : vector<3x16x16xf32> to vector<3x16x6xf32>
    %cst_93 = arith.constant 0.00102838036 : f32
    %401 = vector.broadcast %cst_93 : f32 to vector<3x16x6xf32>
    %402 = arith.mulf %401, %400 : vector<3x16x6xf32>
    %403 = vector.extract_strided_slice %398 {offsets = [0, 0, 1], sizes = [3, 16, 6], strides = [1, 1, 1]} : vector<3x16x16xf32> to vector<3x16x6xf32>
    %cst_94 = arith.constant 0.00759875868 : f32
    %404 = vector.broadcast %cst_94 : f32 to vector<3x16x6xf32>
    %405 = arith.mulf %404, %403 : vector<3x16x6xf32>
    %406 = arith.addf %402, %405 : vector<3x16x6xf32>
    %407 = vector.extract_strided_slice %398 {offsets = [0, 0, 2], sizes = [3, 16, 6], strides = [1, 1, 1]} : vector<3x16x16xf32> to vector<3x16x6xf32>
    %cst_95 = arith.constant 0.0360007733 : f32
    %408 = vector.broadcast %cst_95 : f32 to vector<3x16x6xf32>
    %409 = arith.mulf %408, %407 : vector<3x16x6xf32>
    %410 = arith.addf %406, %409 : vector<3x16x6xf32>
    %411 = vector.extract_strided_slice %398 {offsets = [0, 0, 3], sizes = [3, 16, 6], strides = [1, 1, 1]} : vector<3x16x16xf32> to vector<3x16x6xf32>
    %cst_96 = arith.constant 0.109360702 : f32
    %412 = vector.broadcast %cst_96 : f32 to vector<3x16x6xf32>
    %413 = arith.mulf %412, %411 : vector<3x16x6xf32>
    %414 = arith.addf %410, %413 : vector<3x16x6xf32>
    %415 = vector.extract_strided_slice %398 {offsets = [0, 0, 4], sizes = [3, 16, 6], strides = [1, 1, 1]} : vector<3x16x16xf32> to vector<3x16x6xf32>
    %cst_97 = arith.constant 0.213005543 : f32
    %416 = vector.broadcast %cst_97 : f32 to vector<3x16x6xf32>
    %417 = arith.mulf %416, %415 : vector<3x16x6xf32>
    %418 = arith.addf %414, %417 : vector<3x16x6xf32>
    %419 = vector.extract_strided_slice %398 {offsets = [0, 0, 5], sizes = [3, 16, 6], strides = [1, 1, 1]} : vector<3x16x16xf32> to vector<3x16x6xf32>
    %cst_98 = arith.constant 0.266011745 : f32
    %420 = vector.broadcast %cst_98 : f32 to vector<3x16x6xf32>
    %421 = arith.mulf %420, %419 : vector<3x16x6xf32>
    %422 = arith.addf %418, %421 : vector<3x16x6xf32>
    %423 = vector.extract_strided_slice %398 {offsets = [0, 0, 6], sizes = [3, 16, 6], strides = [1, 1, 1]} : vector<3x16x16xf32> to vector<3x16x6xf32>
    %cst_99 = arith.constant 0.213005543 : f32
    %424 = vector.broadcast %cst_99 : f32 to vector<3x16x6xf32>
    %425 = arith.mulf %424, %423 : vector<3x16x6xf32>
    %426 = arith.addf %422, %425 : vector<3x16x6xf32>
    %427 = vector.extract_strided_slice %398 {offsets = [0, 0, 7], sizes = [3, 16, 6], strides = [1, 1, 1]} : vector<3x16x16xf32> to vector<3x16x6xf32>
    %cst_100 = arith.constant 0.109360702 : f32
    %428 = vector.broadcast %cst_100 : f32 to vector<3x16x6xf32>
    %429 = arith.mulf %428, %427 : vector<3x16x6xf32>
    %430 = arith.addf %426, %429 : vector<3x16x6xf32>
    %431 = vector.extract_strided_slice %398 {offsets = [0, 0, 8], sizes = [3, 16, 6], strides = [1, 1, 1]} : vector<3x16x16xf32> to vector<3x16x6xf32>
    %cst_101 = arith.constant 0.0360007733 : f32
    %432 = vector.broadcast %cst_101 : f32 to vector<3x16x6xf32>
    %433 = arith.mulf %432, %431 : vector<3x16x6xf32>
    %434 = arith.addf %430, %433 : vector<3x16x6xf32>
    %435 = vector.extract_strided_slice %398 {offsets = [0, 0, 9], sizes = [3, 16, 6], strides = [1, 1, 1]} : vector<3x16x16xf32> to vector<3x16x6xf32>
    %cst_102 = arith.constant 0.00759875868 : f32
    %436 = vector.broadcast %cst_102 : f32 to vector<3x16x6xf32>
    %437 = arith.mulf %436, %435 : vector<3x16x6xf32>
    %438 = arith.addf %434, %437 : vector<3x16x6xf32>
    %439 = vector.extract_strided_slice %398 {offsets = [0, 0, 10], sizes = [3, 16, 6], strides = [1, 1, 1]} : vector<3x16x16xf32> to vector<3x16x6xf32>
    %cst_103 = arith.constant 0.00102838036 : f32
    %440 = vector.broadcast %cst_103 : f32 to vector<3x16x6xf32>
    %441 = arith.mulf %440, %439 : vector<3x16x6xf32>
    %442 = arith.addf %438, %441 : vector<3x16x6xf32>
    %cst_104 = arith.constant 0.00102838036 : f32
    %443 = arith.mulf %399, %cst_104 : f32
    %444 = vector.extract_strided_slice %442 {offsets = [0, 0, 0], sizes = [3, 6, 6], strides = [1, 1, 1]} : vector<3x16x6xf32> to vector<3x6x6xf32>
    %445 = vector.broadcast %443 : f32 to vector<3x6x6xf32>
    %446 = arith.mulf %445, %444 : vector<3x6x6xf32>
    %cst_105 = arith.constant 0.00759875868 : f32
    %447 = arith.mulf %399, %cst_105 : f32
    %448 = vector.extract_strided_slice %442 {offsets = [0, 1, 0], sizes = [3, 6, 6], strides = [1, 1, 1]} : vector<3x16x6xf32> to vector<3x6x6xf32>
    %449 = vector.broadcast %447 : f32 to vector<3x6x6xf32>
    %450 = arith.mulf %449, %448 : vector<3x6x6xf32>
    %451 = arith.addf %446, %450 : vector<3x6x6xf32>
    %cst_106 = arith.constant 0.0360007733 : f32
    %452 = arith.mulf %399, %cst_106 : f32
    %453 = vector.extract_strided_slice %442 {offsets = [0, 2, 0], sizes = [3, 6, 6], strides = [1, 1, 1]} : vector<3x16x6xf32> to vector<3x6x6xf32>
    %454 = vector.broadcast %452 : f32 to vector<3x6x6xf32>
    %455 = arith.mulf %454, %453 : vector<3x6x6xf32>
    %456 = arith.addf %451, %455 : vector<3x6x6xf32>
    %cst_107 = arith.constant 0.109360702 : f32
    %457 = arith.mulf %399, %cst_107 : f32
    %458 = vector.extract_strided_slice %442 {offsets = [0, 3, 0], sizes = [3, 6, 6], strides = [1, 1, 1]} : vector<3x16x6xf32> to vector<3x6x6xf32>
    %459 = vector.broadcast %457 : f32 to vector<3x6x6xf32>
    %460 = arith.mulf %459, %458 : vector<3x6x6xf32>
    %461 = arith.addf %456, %460 : vector<3x6x6xf32>
    %cst_108 = arith.constant 0.213005543 : f32
    %462 = arith.mulf %399, %cst_108 : f32
    %463 = vector.extract_strided_slice %442 {offsets = [0, 4, 0], sizes = [3, 6, 6], strides = [1, 1, 1]} : vector<3x16x6xf32> to vector<3x6x6xf32>
    %464 = vector.broadcast %462 : f32 to vector<3x6x6xf32>
    %465 = arith.mulf %464, %463 : vector<3x6x6xf32>
    %466 = arith.addf %461, %465 : vector<3x6x6xf32>
    %cst_109 = arith.constant 0.266011745 : f32
    %467 = arith.mulf %399, %cst_109 : f32
    %468 = vector.extract_strided_slice %442 {offsets = [0, 5, 0], sizes = [3, 6, 6], strides = [1, 1, 1]} : vector<3x16x6xf32> to vector<3x6x6xf32>
    %469 = vector.broadcast %467 : f32 to vector<3x6x6xf32>
    %470 = arith.mulf %469, %468 : vector<3x6x6xf32>
    %471 = arith.addf %466, %470 : vector<3x6x6xf32>
    %cst_110 = arith.constant 0.213005543 : f32
    %472 = arith.mulf %399, %cst_110 : f32
    %473 = vector.extract_strided_slice %442 {offsets = [0, 6, 0], sizes = [3, 6, 6], strides = [1, 1, 1]} : vector<3x16x6xf32> to vector<3x6x6xf32>
    %474 = vector.broadcast %472 : f32 to vector<3x6x6xf32>
    %475 = arith.mulf %474, %473 : vector<3x6x6xf32>
    %476 = arith.addf %471, %475 : vector<3x6x6xf32>
    %cst_111 = arith.constant 0.109360702 : f32
    %477 = arith.mulf %399, %cst_111 : f32
    %478 = vector.extract_strided_slice %442 {offsets = [0, 7, 0], sizes = [3, 6, 6], strides = [1, 1, 1]} : vector<3x16x6xf32> to vector<3x6x6xf32>
    %479 = vector.broadcast %477 : f32 to vector<3x6x6xf32>
    %480 = arith.mulf %479, %478 : vector<3x6x6xf32>
    %481 = arith.addf %476, %480 : vector<3x6x6xf32>
    %cst_112 = arith.constant 0.0360007733 : f32
    %482 = arith.mulf %399, %cst_112 : f32
    %483 = vector.extract_strided_slice %442 {offsets = [0, 8, 0], sizes = [3, 6, 6], strides = [1, 1, 1]} : vector<3x16x6xf32> to vector<3x6x6xf32>
    %484 = vector.broadcast %482 : f32 to vector<3x6x6xf32>
    %485 = arith.mulf %484, %483 : vector<3x6x6xf32>
    %486 = arith.addf %481, %485 : vector<3x6x6xf32>
    %cst_113 = arith.constant 0.00759875868 : f32
    %487 = arith.mulf %399, %cst_113 : f32
    %488 = vector.extract_strided_slice %442 {offsets = [0, 9, 0], sizes = [3, 6, 6], strides = [1, 1, 1]} : vector<3x16x6xf32> to vector<3x6x6xf32>
    %489 = vector.broadcast %487 : f32 to vector<3x6x6xf32>
    %490 = arith.mulf %489, %488 : vector<3x6x6xf32>
    %491 = arith.addf %486, %490 : vector<3x6x6xf32>
    %cst_114 = arith.constant 0.00102838036 : f32
    %492 = arith.mulf %399, %cst_114 : f32
    %493 = vector.extract_strided_slice %442 {offsets = [0, 10, 0], sizes = [3, 6, 6], strides = [1, 1, 1]} : vector<3x16x6xf32> to vector<3x6x6xf32>
    %494 = vector.broadcast %492 : f32 to vector<3x6x6xf32>
    %495 = arith.mulf %494, %493 : vector<3x6x6xf32>
    %496 = arith.addf %491, %495 : vector<3x6x6xf32>
    %497 = arith.mulf %102, %102 : vector<3x6x6xf32>
    %498 = arith.mulf %199, %199 : vector<3x6x6xf32>
    %499 = arith.mulf %102, %199 : vector<3x6x6xf32>
    %500 = arith.subf %298, %497 : vector<3x6x6xf32>
    %501 = arith.subf %397, %498 : vector<3x6x6xf32>
    %502 = arith.subf %496, %499 : vector<3x6x6xf32>
    %cst_115 = arith.constant 2.000000e+00 : f32
    %503 = vector.broadcast %cst_115 : f32 to vector<3x6x6xf32>
    %504 = arith.mulf %503, %502 : vector<3x6x6xf32>
    %505 = vector.broadcast %3 : f32 to vector<3x6x6xf32>
    %506 = arith.addf %504, %505 : vector<3x6x6xf32>
    %507 = arith.addf %500, %501 : vector<3x6x6xf32>
    %508 = vector.broadcast %3 : f32 to vector<3x6x6xf32>
    %509 = arith.addf %507, %508 : vector<3x6x6xf32>
    %cst_116 = arith.constant 2.000000e+00 : f32
    %510 = vector.broadcast %cst_116 : f32 to vector<3x6x6xf32>
    %511 = arith.mulf %510, %499 : vector<3x6x6xf32>
    %512 = vector.broadcast %2 : f32 to vector<3x6x6xf32>
    %513 = arith.addf %511, %512 : vector<3x6x6xf32>
    %514 = arith.mulf %513, %506 : vector<3x6x6xf32>
    %515 = arith.addf %497, %498 : vector<3x6x6xf32>
    %516 = vector.broadcast %2 : f32 to vector<3x6x6xf32>
    %517 = arith.addf %515, %516 : vector<3x6x6xf32>
    %518 = arith.mulf %517, %509 : vector<3x6x6xf32>
    %519 = tpu.reciprocal %518 {approx = true} : vector<3x6x6xf32> -> vector<3x6x6xf32>
    %520 = arith.mulf %518, %519 : vector<3x6x6xf32>
    %cst_117 = arith.constant 2.000000e+00 : f32
    %521 = vector.broadcast %cst_117 : f32 to vector<3x6x6xf32>
    %522 = arith.subf %521, %520 : vector<3x6x6xf32>
    %523 = arith.mulf %519, %522 : vector<3x6x6xf32>
    %524 = arith.mulf %514, %523 : vector<3x6x6xf32>
    %cst_118 = arith.constant dense<0.000000e+00> : vector<3x6xf32>
    %525 = vector.multi_reduction <add>, %524, %cst_118 [2] : vector<3x6x6xf32> to vector<3x6xf32>
    %526 = vector.shape_cast %525 : vector<3x6xf32> to vector<3x6x1xf32>
    %cst_119 = arith.constant dense<0.000000e+00> : vector<3x1xf32>
    %527 = vector.multi_reduction <add>, %526, %cst_119 [1] : vector<3x6x1xf32> to vector<3x1xf32>
    %528 = vector.shape_cast %527 : vector<3x1xf32> to vector<3x1x1xf32>
    %c0_120 = arith.constant 0 : index
    %c0_121 = arith.constant 0 : index
    %c0_122 = arith.constant 0 : index
    %529 = vector.load %arg4[%c0_120, %c0_121, %c0_122] : memref<3x1x1xf32, #tpu.memory_space<vmem>>, vector<3x1x1xf32>
    tpu.vector_store %arg4[%c0_120, %c0_121, %c0_122], %528 {strides = array<i32>} : memref<3x1x1xf32, #tpu.memory_space<vmem>>, vector<3x1x1xf32>,
    return
  }
  func.func @transform_0(%arg0: i32) -> i32 {
    %c0_i32 = arith.constant 0 : i32
    %c0_i32_0 = arith.constant 0 : i32
    return %c0_i32 : i32
  }
  func.func @transform_1(%arg0: i32) -> (i32, i32, i32) {
    %c0_i32 = arith.constant 0 : i32
    %c0_i32_0 = arith.constant 0 : i32
    %c0_i32_1 = arith.constant 0 : i32
    return %arg0, %c0_i32, %c0_i32_0 : i32, i32, i32
  }
  func.func @transform_2(%arg0: i32) -> (i32, i32, i32) {
    %c0_i32 = arith.constant 0 : i32
    %c0_i32_0 = arith.constant 0 : i32
    %c0_i32_1 = arith.constant 0 : i32
    return %arg0, %c0_i32, %c0_i32_0 : i32, i32, i32
  }
  func.func @transform_3(%arg0: i32) -> (i32, i32, i32) {
    %c0_i32 = arith.constant 0 : i32
    %c0_i32_0 = arith.constant 0 : i32
    %c0_i32_1 = arith.constant 0 : i32
    return %arg0, %c0_i32, %c0_i32_0 : i32, i32, i32
  }
}

</mosaic_0001>

<bundles_post_ra>
// kernel: ssim_pallas.1
= control target key start
LH: loop header
LB: loop body
LE: loop exit
PB: predicated region body
PF: predicated region fallthrough
CT: control target
= control target key end

     0   :  { %8 = vsyncpa [#allocation3], 0  ;;  %s3074_s12 = smov 0   ;;  %s5422_s0 = inlined_call_operand.vmem [shape: f32[4], index: 0, kind: input, shape index: {}]   ;;  %s5423_s1 = inlined_call_operand.vmem [shape: f32[6,16,16], index: 1, kind: input, shape index: {}]   ;;  %s5424_s2 = inlined_call_operand.vmem [shape: f32[6,16,16], index: 2, kind: input, shape index: {}]   ;;  %s5425_s3 = inlined_call_operand.vmem [shape: f32[6,1,1], index: 3, kind: output, shape index: {}]  }
   0x1 LB: > { %s2951_s13 = sadd.s32 4294967295, %s3041_s12   ;;  %p2953_p0 = scmp.ge.s32.totalorder %s3041_s12, 1  ;;  %s3041_s12 = sphi %s3074_s12, %s14_s12  }
   0x2   : > { %p118_p1 = scmp.lt.s32.totalorder %s3041_s12, 3  ;;  %s130_s16 = sshll.u32 %s5422_s0, 4  ;;  %s131_s16 = int_to_ptr.vmem [resolvable:$true] %s130_s16 }
   0x3   : > { %p2977_p3 = scmp.eq.s32.totalorder %s2951_s13, 0  ;;  %s3043_s17 = smov [#allocation2]  }
   0x4   : > { %p119_p2 = pnand %p2953_p0, %p118_p1 }
   0x6   : > { %p2973_p4 = pneg %p119_p2  ;;  %163 = sbr.rel (%p119_p2) target bundleno = 1096 (0x448), region = 32 }
   0x8   : > { %p2974_p5 = pnand %p2977_p3, %p2973_p4 }
   0xa   : > { %2976 = dma.vmem_to_smem (!%p2974_p5), %s131_s16, 16, %s3043_s17, [#allocation3]  }
   0xb   : > { %3036 = dma.done.wait (%p2977_p3), [#allocation3], 16  }
   0xc   : > { %3038 = vsyncadd (%p2977_p3), [#allocation3], 4294967280 }
   0xd   : > { %170 = sfence }
   0xe   : > { %s195_s18 = smul.u32 3, %s2951_s13  ;;  %s3044_s23 = smov 127   ;;  %vm595_vm0 = vcmask 1044480   ;;  %vm625_vm1 = vcmask 1043456   ;;  %vm655_vm2 = vcmask 1042432   ;;  %vm671_vm3 = vcmask 1041408  }
   0xf   : > { %s3045_s24 = smov 126   ;;  %s3046_s25 = smov 125   ;;  %vm687_vm4 = vcmask 1040384   ;;  %vm2841_vm5 = vcmask 46080   ;;  %vm2851_vm6 = vcmask 1045504   ;;  %vm2873_vm7 = vcmask 0  }
  0x10   : > { %p196_p6 = scmp.lt.s32.totalorder %s195_s18, 5  ;;  %s3047_s26 = smov 124  }
  0x11   : > { %s3048_s27 = smov 123   ;;  %s3049_s28 = smov 122  }
  0x12   : > { %s5699_s18 = smov (!%p196_p6, %s195_s18), 5  ;;  %s3050_s29 = smov 121  }
  0x13   : > { %s2967_s19 = sshll.u32 %s5699_s18, 4  ;;  %s3051_s30 = smov 120  }
  0x14   : > { %s3093_s22 = scalar_lea.vmem %s5423_s1, %s2967_s19  ;;  %s3052_s4 = smov 119  }
  0x15   : > { %v3096_v0 = vld [vmem:[%s3093_s22 + $0x20] sm:$0xff]  ;;  %v3099_v1 = vld [vmem:[%s3093_s22 + $0x10] sm:$0xff]  ;;  %v3120_v6 = vld [vmem:[%s3093_s22 + $0x28] sm:$0xff]  ;;  %s3053_s5 = smov 118   ;;  %s3301_s8 = scalar_lea.vmem %s5424_s2, %s2967_s19 }
  0x16   : > { %5500 = vst [vmem:[#allocation5_spill] sm:$0xff] %v3096_v0  ;;  %v3102_v2 = vld [vmem:[%s3093_s22] sm:$0xff]  ;;  %v3105_v3 = vmul.f32 0.0075987587, %v3096_v0  ;;  %v3108_v4 = vmul.f32 0.0075987587, %v3099_v1 }
  0x17   : > { %5501 = vst [vmem:[#allocation6_spill] sm:$0xff] %v3099_v1  ;;  %v3111_v5 = vmul.f32 0.0075987587, %v3102_v2  ;;  %v3123_v7 = vld [vmem:[%s3093_s22 + $0x18] sm:$0xff]  ;;  %v3126_v8 = vld [vmem:[%s3093_s22 + $0x8] sm:$0xff]  ;;  %v3319_v60 = vld [vmem:[%s3301_s8 + $0x10] sm:$0xff] }
  0x18   : > { %5502 = vst [vmem:[#allocation7_spill] sm:$0xff] %v3102_v2  ;;  %256 = vrot.lane.b32.xlu2 %v3105_v3, %s3044_s23  ;;  %252 = vrot.lane.b32.xlu1 %v3108_v4, %s3044_s23  ;;  %v3129_v9 = vmul.f32 0.0075987587, %v3120_v6  ;;  %v3132_v10 = vmul.f32 0.0075987587, %v3123_v7  ;;  %v3322_v61 = vld [vmem:[%s3301_s8 + $0x8] sm:$0xff] }
  0x19   : > { %248 = vrot.lane.b32.xlu0 %v3111_v5, %s3044_s23  ;;  %5503 = vst [vmem:[#allocation8_spill] sm:$0xff] %v3120_v6  ;;  %v3135_v11 = vmul.f32 0.0075987587, %v3126_v8  ;;  %v3144_v12 = vmul.f32 0.036000773, %v3099_v1  ;;  %s3522_s9 = sld [smem:[#allocation2]] }
  0x1a   : > { %5504 = vst [vmem:[#allocation9_spill] sm:$0xff] %v3123_v7  ;;  %v3147_v13 = vmul.f32 0.036000773, %v3126_v8  ;;  %v3150_v14 = vmul.f32 0.036000773, %v3102_v2  ;;  %s4045_s17 = sld [smem:[#allocation2 + $0x1]] }
  0x1b   : > { %5505 = vst [vmem:[#allocation10_spill] sm:$0xff] %v3126_v8  ;;  %v3159_v15 = vmul.f32 0.036000773, %v3120_v6  ;;  %v3162_v16 = vmul.f32 0.036000773, %v3096_v0 }
  0x1c   : > { %v3165_v17 = vmul.f32 0.036000773, %v3123_v7  ;;  %v310_v18 = vmul.f32 0.1093607, %v3099_v1  ;;  %v309_v19 = vmul.f32 0.1093607, %v3126_v8 }
  0x1d   : > { %v308_v20 = vmul.f32 0.1093607, %v3102_v2  ;;  %v313_v21 = vmul.f32 0.1093607, %v3120_v6  ;;  %v312_v22 = vmul.f32 0.1093607, %v3096_v0 }
  0x1e   : > { %v311_v23 = vmul.f32 0.1093607, %v3123_v7  ;;  %v346_v24 = vmul.f32 0.21300554, %v3099_v1  ;;  %v345_v25 = vmul.f32 0.21300554, %v3126_v8 }
  0x1f   : > { %v344_v26 = vmul.f32 0.21300554, %v3102_v2  ;;  %v349_v27 = vmul.f32 0.21300554, %v3120_v6  ;;  %v348_v28 = vmul.f32 0.21300554, %v3096_v0 }
  0x20   : > { %258 = vrot.lane.b32.xlu2 %v3129_v9, %s3044_s23  ;;  %254 = vrot.lane.b32.xlu1 %v3132_v10, %s3044_s23  ;;  %v347_v29 = vmul.f32 0.21300554, %v3123_v7  ;;  %v382_v30 = vmul.f32 0.26601174, %v3099_v1  ;;  %v381_v31 = vmul.f32 0.26601174, %v3126_v8 }
  0x21   : > { %250 = vrot.lane.b32.xlu0 %v3135_v11, %s3044_s23  ;;  %v380_v32 = vmul.f32 0.26601174, %v3102_v2  ;;  %v385_v33 = vmul.f32 0.26601174, %v3120_v6  ;;  %v384_v34 = vmul.f32 0.26601174, %v3096_v0 }
  0x22   : > { %v383_v35 = vmul.f32 0.26601174, %v3123_v7  ;;  %v3276_v51 = vmul.f32 0.0010283804, %v3099_v1  ;;  %v3279_v52 = vmul.f32 0.0010283804, %v3126_v8 }
  0x23   : > { %v3282_v53 = vmul.f32 0.0010283804, %v3102_v2  ;;  %v3304_v57 = vmul.f32 0.0010283804, %v3096_v0  ;;  %v3307_v58 = vmul.f32 0.0010283804, %v3120_v6 }
  0x24   : > { %v3310_v59 = vmul.f32 0.0010283804, %v3123_v7  ;;  %5506 = vst [vmem:[#allocation11_spill] sm:$0xff] %v3319_v60  ;;  %v3430_v7 = vmul.f32 0.1093607, %v3322_v61 }
  0x25   : > { %5507 = vst [vmem:[#allocation12_spill] sm:$0xff] %v3322_v61  ;;  %s547_s10 = smul.f32 0.0075987587, %s3522_s9 }
  0x26   : > { %5522 = vst [vmem:[#allocation27_spill] sm:$0xff] %v3430_v7  ;;  %s542_s11 = smul.f32 0.0010283804, %s3522_s9 }
  0x27   : > { %s564_s13 = smul.f32 0.036000773, %s3522_s9 }
  0x28   : > { %288 = vrot.lane.b32.xlu2 %v3144_v12, %s3045_s24  ;;  %286 = vrot.lane.b32.xlu1 %v3147_v13, %s3045_s24  ;;  %s581_s14 = smul.f32 0.1093607, %s3522_s9 }
  0x29   : > { %284 = vrot.lane.b32.xlu0 %v3150_v14, %s3045_s24  ;;  %s611_s15 = smul.f32 0.21300554, %s3522_s9 }
  0x2a   : > { %s641_s16 = smul.f32 0.26601174, %s3522_s9 }
  0x2b   : > { %s1056_s19 = smul.f32 0.0075987587, %s4045_s17 }
  0x2c   : > { %s1051_s20 = smul.f32 0.0010283804, %s4045_s17 }
  0x2d   : > { %s1073_s21 = smul.f32 0.036000773, %s4045_s17 }
  0x2e   : > { %s1090_s6 = smul.f32 0.1093607, %s4045_s17 }
  0x2f   : > { %s1119_s7 = smul.f32 0.21300554, %s4045_s17 }
  0x30   : > { %294 = vrot.lane.b32.xlu2 %v3159_v15, %s3045_s24  ;;  %292 = vrot.lane.b32.xlu1 %v3162_v16, %s3045_s24 }
  0x31   : > { %290 = vrot.lane.b32.xlu0 %v3165_v17, %s3045_s24 }
  0x38   : > { %324 = vrot.lane.b32.xlu2 %v310_v18, %s3046_s25  ;;  %322 = vrot.lane.b32.xlu1 %v309_v19, %s3046_s25 }
  0x39   : > { %320 = vrot.lane.b32.xlu0 %v308_v20, %s3046_s25 }
  0x40   : > { %330 = vrot.lane.b32.xlu2 %v313_v21, %s3046_s25  ;;  %328 = vrot.lane.b32.xlu1 %v312_v22, %s3046_s25 }
  0x41   : > { %326 = vrot.lane.b32.xlu0 %v311_v23, %s3046_s25 }
  0x48   : > { %360 = vrot.lane.b32.xlu2 %v346_v24, %s3047_s26  ;;  %358 = vrot.lane.b32.xlu1 %v345_v25, %s3047_s26 }
  0x49   : > { %356 = vrot.lane.b32.xlu0 %v344_v26, %s3047_s26 }
  0x50   : > { %366 = vrot.lane.b32.xlu2 %v349_v27, %s3047_s26  ;;  %364 = vrot.lane.b32.xlu1 %v348_v28, %s3047_s26 }
  0x51   : > { %362 = vrot.lane.b32.xlu0 %v347_v29, %s3047_s26 }
  0x58   : > { %396 = vrot.lane.b32.xlu2 %v382_v30, %s3048_s27  ;;  %394 = vrot.lane.b32.xlu1 %v381_v31, %s3048_s27 }
  0x59   : > { %392 = vrot.lane.b32.xlu0 %v380_v32, %s3048_s27 }
  0x60   : > { %402 = vrot.lane.b32.xlu2 %v385_v33, %s3048_s27  ;;  %400 = vrot.lane.b32.xlu1 %v384_v34, %s3048_s27 }
  0x61   : > { %398 = vrot.lane.b32.xlu0 %v383_v35, %s3048_s27  ;;  %v3427_v35 = vmul.f32 0.1093607, %v3319_v60 }
  0x63   : > { %5521 = vst [vmem:[#allocation26_spill] sm:$0xff] %v3427_v35 }
  0x68   : > { %420 = vrot.lane.b32.xlu2 %v346_v24, %s3049_s28  ;;  %418 = vrot.lane.b32.xlu1 %v345_v25, %s3049_s28  ;;  %v3388_v24 = vmul.f32 0.036000773, %v3322_v61 }
  0x69   : > { %416 = vrot.lane.b32.xlu0 %v344_v26, %s3049_s28 }
  0x6a   : > { %5516 = vst [vmem:[#allocation21_spill] sm:$0xff] %v3388_v24 }
  0x70   : > { %426 = vrot.lane.b32.xlu2 %v349_v27, %s3049_s28  ;;  %424 = vrot.lane.b32.xlu1 %v348_v28, %s3049_s28 }
  0x71   : > { %422 = vrot.lane.b32.xlu0 %v347_v29, %s3049_s28 }
  0x72   : > { %v3215_v36 = vpop.permute.xlu2 %256 }
  0x78   : > { %444 = vrot.lane.b32.xlu2 %v310_v18, %s3050_s29  ;;  %442 = vrot.lane.b32.xlu1 %v309_v19, %s3050_s29 }
  0x79   : > { %440 = vrot.lane.b32.xlu0 %v308_v20, %s3050_s29 }
  0x7a   : > { %v3220_v37 = vpop.permute.xlu2 %258 }
  0x80   : > { %450 = vrot.lane.b32.xlu2 %v313_v21, %s3050_s29  ;;  %448 = vrot.lane.b32.xlu1 %v312_v22, %s3050_s29 }
  0x81   : > { %446 = vrot.lane.b32.xlu0 %v311_v23, %s3050_s29  ;;  %v3385_v23 = vmul.f32 0.036000773, %v3319_v60 }
  0x82   : > { %v3225_v38 = vpop.permute.xlu2 %288 }
  0x83   : > { %5515 = vst [vmem:[#allocation20_spill] sm:$0xff] %v3385_v23 }
  0x88   : > { %468 = vrot.lane.b32.xlu2 %v3144_v12, %s3051_s30  ;;  %466 = vrot.lane.b32.xlu1 %v3147_v13, %s3051_s30  ;;  %v3352_v12 = vld [vmem:[%s3301_s8 + $0x20] sm:$0xff] }
  0x89   : > { %464 = vrot.lane.b32.xlu0 %v3150_v14, %s3051_s30  ;;  %v3367_v18 = vmul.f32 0.0075987587, %v3352_v12  ;;  %v3409_v30 = vmul.f32 0.036000773, %v3352_v12 }
  0x8a   : > { %v3233_v39 = vpop.permute.xlu2 %294  ;;  %v3235_v40 = vpop.permute.xlu1 %252 }
  0x8b   : > { %v3237_v41 = vpop.permute.xlu0 %248  ;;  %5513 = vst [vmem:[#allocation18_spill] sm:$0xff] %v3367_v18 }
  0x8c   : > { %5519 = vst [vmem:[#allocation24_spill] sm:$0xff] %v3409_v30 }
  0x90   : > { %474 = vrot.lane.b32.xlu2 %v3159_v15, %s3051_s30  ;;  %472 = vrot.lane.b32.xlu1 %v3162_v16, %s3051_s30  ;;  %v3359_v15 = vld [vmem:[%s3301_s8 + $0x18] sm:$0xff] }
  0x91   : > { %470 = vrot.lane.b32.xlu0 %v3165_v17, %s3051_s30  ;;  %v3370_v19 = vmul.f32 0.0075987587, %v3359_v15  ;;  %v3412_v31 = vmul.f32 0.036000773, %v3359_v15 }
  0x92   : > { %v3245_v42 = vpop.permute.xlu2 %324  ;;  %v3247_v43 = vpop.permute.xlu1 %254 }
  0x93   : > { %v3249_v44 = vpop.permute.xlu0 %250  ;;  %5514 = vst [vmem:[#allocation19_spill] sm:$0xff] %v3370_v19 }
  0x94   : > { %5520 = vst [vmem:[#allocation25_spill] sm:$0xff] %v3412_v31 }
  0x98   : > { %492 = vrot.lane.b32.xlu2 %v3108_v4, %s3052_s4  ;;  %490 = vrot.lane.b32.xlu1 %v3135_v11, %s3052_s4  ;;  %v3349_v11 = vld [vmem:[%s3301_s8 + $0x28] sm:$0xff] }
  0x99   : > { %488 = vrot.lane.b32.xlu0 %v3111_v5, %s3052_s4  ;;  %v3334_v5 = vmul.f32 0.0075987587, %v3319_v60  ;;  %v3364_v17 = vmul.f32 0.0075987587, %v3349_v11  ;;  %v3406_v29 = vmul.f32 0.036000773, %v3349_v11 }
  0x9a   : > { %v3257_v45 = vpop.permute.xlu2 %330  ;;  %v3259_v46 = vpop.permute.xlu1 %286  ;;  %v3448_v1 = vmul.f32 0.1093607, %v3349_v11 }
  0x9b   : > { %v3261_v47 = vpop.permute.xlu0 %284  ;;  %5509 = vst [vmem:[#allocation14_spill] sm:$0xff] %v3334_v5 }
  0x9c   : > { %5512 = vst [vmem:[#allocation17_spill] sm:$0xff] %v3364_v17 }
  0x9d   : > { %5518 = vst [vmem:[#allocation23_spill] sm:$0xff] %v3406_v29 }
  0x9e   : > { %5524 = vst [vmem:[#allocation29_spill] sm:$0xff] %v3448_v1 }
  0xa0   : > { %498 = vrot.lane.b32.xlu2 %v3129_v9, %s3052_s4  ;;  %496 = vrot.lane.b32.xlu1 %v3105_v3, %s3052_s4  ;;  %v3329_v3 = vld [vmem:[%s3301_s8] sm:$0xff]  ;;  %v3337_v9 = vmul.f32 0.0075987587, %v3322_v61 }
  0xa1   : > { %494 = vrot.lane.b32.xlu0 %v3132_v10, %s3052_s4  ;;  %5508 = vst [vmem:[#allocation13_spill] sm:$0xff] %v3329_v3  ;;  %v3340_v10 = vmul.f32 0.0075987587, %v3329_v3  ;;  %v3391_v25 = vmul.f32 0.036000773, %v3329_v3 }
  0xa2   : > { %v3269_v48 = vpop.permute.xlu2 %360  ;;  %v3271_v49 = vpop.permute.xlu1 %292  ;;  %5510 = vst [vmem:[#allocation15_spill] sm:$0xff] %v3337_v9  ;;  %v3433_v0 = vmul.f32 0.1093607, %v3329_v3 }
  0xa3   : > { %v3273_v50 = vpop.permute.xlu0 %290  ;;  %5511 = vst [vmem:[#allocation16_spill] sm:$0xff] %v3340_v10 }
  0xa4   : > { %5517 = vst [vmem:[#allocation22_spill] sm:$0xff] %v3391_v25 }
  0xa5   : > { %5523 = vst [vmem:[#allocation28_spill] sm:$0xff] %v3433_v0 }
  0xa8   : > { %522 = vrot.lane.b32.xlu2 %v3276_v51, %s3053_s5  ;;  %520 = vrot.lane.b32.xlu1 %v3279_v52, %s3053_s5 }
  0xa9   : > { %518 = vrot.lane.b32.xlu0 %v3282_v53, %s3053_s5 }
  0xaa   : > { %v3290_v54 = vpop.permute.xlu2 %366  ;;  %v3292_v55 = vpop.permute.xlu1 %322 }
  0xab   : > { %v3294_v56 = vpop.permute.xlu0 %320 }
  0xb0   : > { %528 = vrot.lane.b32.xlu2 %v3307_v58, %s3053_s5  ;;  %526 = vrot.lane.b32.xlu1 %v3304_v57, %s3053_s5 }
  0xb1   : > { %524 = vrot.lane.b32.xlu0 %v3310_v59, %s3053_s5 }
  0xb2   : > { %v3324_v62 = vpop.permute.xlu2 %396  ;;  %v3326_v63 = vpop.permute.xlu1 %328 }
  0xb3   : > { %v3331_v4 = vpop.permute.xlu0 %326 }
  0xb8   : > { %761 = vrot.lane.b32.xlu2 %v3334_v5, %s3044_s23  ;;  %759 = vrot.lane.b32.xlu1 %v3337_v9, %s3044_s23  ;;  %v855_v5 = vmul.f32 0.21300554, %v3319_v60 }
  0xb9   : > { %757 = vrot.lane.b32.xlu0 %v3340_v10, %s3044_s23 }
  0xba   : > { %v3354_v13 = vpop.permute.xlu2 %402  ;;  %v3356_v14 = vpop.permute.xlu1 %358 }
  0xbb   : > { %v3361_v16 = vpop.permute.xlu0 %356 }
  0xc0   : > { %767 = vrot.lane.b32.xlu2 %v3364_v17, %s3044_s23  ;;  %765 = vrot.lane.b32.xlu1 %v3367_v18, %s3044_s23  ;;  %v3454_v18 = vmul.f32 0.1093607, %v3359_v15 }
  0xc1   : > { %763 = vrot.lane.b32.xlu0 %v3370_v19, %s3044_s23  ;;  %v3451_v19 = vmul.f32 0.1093607, %v3352_v12 }
  0xc2   : > { %v3378_v20 = vpop.permute.xlu2 %420  ;;  %v3380_v21 = vpop.permute.xlu1 %364  ;;  %5526 = vst [vmem:[#allocation31_spill] sm:$0xff] %v3454_v18 }
  0xc3   : > { %v3382_v22 = vpop.permute.xlu0 %362  ;;  %5525 = vst [vmem:[#allocation30_spill] sm:$0xff] %v3451_v19 }
  0xc8   : > { %797 = vrot.lane.b32.xlu2 %v3385_v23, %s3045_s24  ;;  %795 = vrot.lane.b32.xlu1 %v3388_v24, %s3045_s24  ;;  %v3479_v23 = vmul.f32 0.21300554, %v3349_v11 }
  0xc9   : > { %793 = vrot.lane.b32.xlu0 %v3391_v25, %s3045_s24 }
  0xca   : > { %v3399_v26 = vpop.permute.xlu2 %426  ;;  %v3401_v27 = vpop.permute.xlu1 %394 }
  0xcb   : > { %v3403_v28 = vpop.permute.xlu0 %392 }
  0xd0   : > { %803 = vrot.lane.b32.xlu2 %v3406_v29, %s3045_s24  ;;  %801 = vrot.lane.b32.xlu1 %v3409_v30, %s3045_s24  ;;  %v853_v30 = vmul.f32 0.21300554, %v3329_v3 }
  0xd1   : > { %799 = vrot.lane.b32.xlu0 %v3412_v31, %s3045_s24  ;;  %v854_v31 = vmul.f32 0.21300554, %v3322_v61 }
  0xd2   : > { %v3420_v32 = vpop.permute.xlu2 %444  ;;  %v3422_v33 = vpop.permute.xlu1 %400 }
  0xd3   : > { %v3424_v34 = vpop.permute.xlu0 %398 }
  0xd8   : > { %833 = vrot.lane.b32.xlu2 %v3427_v35, %s3046_s25  ;;  %831 = vrot.lane.b32.xlu1 %v3430_v7, %s3046_s25  ;;  %v891_v35 = vmul.f32 0.26601174, %v3319_v60 }
  0xd9   : > { %829 = vrot.lane.b32.xlu0 %v3433_v0, %s3046_s25 }
  0xda   : > { %v3441_v6 = vpop.permute.xlu2 %450  ;;  %v3443_v2 = vpop.permute.xlu1 %418 }
  0xdb   : > { %v3445_v8 = vpop.permute.xlu0 %416 }
  0xe0   : > { %839 = vrot.lane.b32.xlu2 %v3448_v1, %s3046_s25  ;;  %837 = vrot.lane.b32.xlu1 %v3451_v19, %s3046_s25  ;;  %v3485_v19 = vmul.f32 0.21300554, %v3359_v15 }
  0xe1   : > { %835 = vrot.lane.b32.xlu0 %v3454_v18, %s3046_s25  ;;  %v3482_v18 = vmul.f32 0.21300554, %v3352_v12 }
  0xe2   : > { %v469_v17 = vpop.permute.xlu2 %468  ;;  %v3462_v10 = vpop.permute.xlu1 %424 }
  0xe3   : > { %5527 = vst [vmem:[#allocation32_spill] sm:$0xff] %v3462_v10  ;;  %v3464_v9 = vpop.permute.xlu0 %422 }
  0xe4   : > { %5528 = vst [vmem:[#allocation33_spill] sm:$0xff] %v3464_v9  ;;  %v268_v9 = vadd.f32 %v3235_v40, %v3276_v51  ;;  %v892_v40 = vmul.f32 0.26601174, %v3359_v15 }
  0xe6   : > { %v304_v60 = vadd.f32 %v3225_v38, %v268_v9 }
  0xe8   : > { %869 = vrot.lane.b32.xlu2 %v855_v5, %s3047_s26  ;;  %867 = vrot.lane.b32.xlu1 %v854_v31, %s3047_s26  ;;  %v340_v51 = vadd.f32 %v3245_v42, %v304_v60 }
  0xe9   : > { %865 = vrot.lane.b32.xlu0 %v853_v30, %s3047_s26 }
  0xea   : > { %v3472_v29 = vpop.permute.xlu2 %474  ;;  %v3474_v25 = vpop.permute.xlu1 %442 }
  0xeb   : > { %5529 = vst [vmem:[#allocation34_spill] sm:$0xff] %v3474_v25  ;;  %v3476_v24 = vpop.permute.xlu0 %440  ;;  %v889_v25 = vmul.f32 0.26601174, %v3329_v3  ;;  %v893_v3 = vmul.f32 0.26601174, %v3352_v12 }
  0xec   : > { %5530 = vst [vmem:[#allocation35_spill] sm:$0xff] %v3476_v24  ;;  %v890_v24 = vmul.f32 0.26601174, %v3322_v61  ;;  %v894_v61 = vmul.f32 0.26601174, %v3349_v11 }
  0xf0   : > { %875 = vrot.lane.b32.xlu2 %v3479_v23, %s3047_s26  ;;  %873 = vrot.lane.b32.xlu1 %v3482_v18, %s3047_s26 }
  0xf1   : > { %871 = vrot.lane.b32.xlu0 %v3485_v19, %s3047_s26 }
  0xf2   : > { %v493_v1 = vpop.permute.xlu2 %492  ;;  %v3493_v0 = vpop.permute.xlu1 %448 }
  0xf3   : > { %5531 = vst [vmem:[#allocation36_spill] sm:$0xff] %v3493_v0  ;;  %v3495_v7 = vpop.permute.xlu0 %446 }
  0xf4   : > { %5532 = vst [vmem:[#allocation37_spill] sm:$0xff] %v3495_v7 }
  0xf8   : > { %905 = vrot.lane.b32.xlu2 %v891_v35, %s3048_s27  ;;  %903 = vrot.lane.b32.xlu1 %v890_v24, %s3048_s27  ;;  %v271_v24 = vadd.f32 %v3220_v37, %v3307_v58 }
  0xf9   : > { %901 = vrot.lane.b32.xlu0 %v889_v25, %s3048_s27  ;;  %v376_v25 = vadd.f32 %v3269_v48, %v340_v51 }
  0xfa   : > { %v3505_v10 = vpop.permute.xlu2 %498  ;;  %v3507_v0 = vpop.permute.xlu1 %466  ;;  %v307_v37 = vadd.f32 %v3233_v39, %v271_v24  ;;  %v270_v39 = vadd.f32 %v3215_v36, %v3304_v57 }
  0xfb   : > { %v3509_v7 = vpop.permute.xlu0 %464  ;;  %v412_v38 = vadd.f32 %v3324_v62, %v376_v25  ;;  %v266_v62 = vadd.f32 %v3237_v41, %v3282_v53 }
  0xfc   : > { %v343_v58 = vadd.f32 %v3257_v45, %v307_v37  ;;  %v269_v45 = vadd.f32 %v3247_v43, %v3310_v59  ;;  %v306_v36 = vadd.f32 %v3271_v49, %v270_v39  ;;  %v3562_v49 = vstv %s547_s10  ;;  %s1148_s10 = smul.f32 0.26601174, %s4045_s17 }
  0xfd   : > { %v436_v48 = vadd.f32 %v3378_v20, %v412_v38  ;;  %v302_v41 = vadd.f32 %v3261_v47, %v266_v62  ;;  %v5536_v38 = vld [vmem:[#allocation35_spill] sm:$0xff]  ;;  %v3605_v37 = vstv %s641_s16 }
  0xfe   : > { %v305_v57 = vadd.f32 %v3273_v50, %v269_v45 }
  0xff   : > { %v460_v60 = vadd.f32 %v3420_v32, %v436_v48  ;;  %v338_v59 = vadd.f32 %v3294_v56, %v302_v41  ;;  %v3595_v32 = vstv %s611_s15  ;;  %v5537_v48 = vld [vmem:[#allocation36_spill] sm:$0xff] }
 0x100   : > { %911 = vrot.lane.b32.xlu2 %v894_v61, %s3048_s27  ;;  %909 = vrot.lane.b32.xlu1 %v893_v3, %s3048_s27  ;;  %v267_v61 = vadd.f32 %v3249_v44, %v3279_v52  ;;  %v379_v3 = vadd.f32 %v3290_v54, %v343_v58 }
 0x101   : > { %907 = vrot.lane.b32.xlu0 %v892_v40, %s3048_s27  ;;  %v484_v40 = vadd.f32 %v469_v17, %v460_v60  ;;  %v374_v50 = vadd.f32 %v3361_v16, %v338_v59  ;;  %v5538_v60 = vld [vmem:[#allocation37_spill] sm:$0xff] }
 0x102   : > { %v523_v9 = vpop.permute.xlu2 %522  ;;  %v3525_v35 = vpop.permute.xlu1 %472  ;;  %v303_v20 = vadd.f32 %v3259_v46, %v267_v61  ;;  %v415_v44 = vadd.f32 %v3354_v13, %v379_v3  ;;  %v341_v13 = vadd.f32 %v3331_v4, %v305_v57 }
 0x103   : > { %v3527_v42 = vpop.permute.xlu0 %470  ;;  %v508_v52 = vadd.f32 %v493_v1, %v484_v40  ;;  %v342_v1 = vadd.f32 %v3326_v63, %v306_v36  ;;  %v410_v63 = vadd.f32 %v3403_v28, %v374_v50 }
 0x104   : > { %v339_v43 = vadd.f32 %v3292_v55, %v303_v20  ;;  %v439_v47 = vadd.f32 %v3399_v26, %v415_v44  ;;  %v377_v26 = vadd.f32 %v3382_v22, %v341_v13 }
 0x105   : > { %v378_v56 = vadd.f32 %v3380_v21, %v342_v1  ;;  %v434_v22 = vadd.f32 %v3445_v8, %v410_v63 }
 0x106   : > { %v375_v17 = vadd.f32 %v3356_v14, %v339_v43  ;;  %v463_v55 = vadd.f32 %v3441_v6, %v439_v47  ;;  %v413_v16 = vadd.f32 %v3424_v34, %v377_v26  ;;  %v5541_v43 = vld [vmem:[#allocation28_spill] sm:$0xff] }
 0x107   : > { %v414_v6 = vadd.f32 %v3422_v33, %v378_v56  ;;  %v5533_v33 = vld [vmem:[#allocation32_spill] sm:$0xff] }
 0x108   : > { %929 = vrot.lane.b32.xlu2 %v855_v5, %s3049_s28  ;;  %927 = vrot.lane.b32.xlu1 %v854_v31, %s3049_s28  ;;  %v538_v5 = vadd.f32 %v523_v9, %v508_v52  ;;  %v487_v4 = vadd.f32 %v3472_v29, %v463_v55  ;;  %v3589_v29 = vstv %s542_s11  ;;  %v3593_v31 = vstv %s581_s14 }
 0x109   : > { %925 = vrot.lane.b32.xlu0 %v853_v30, %s3049_s28  ;;  %v411_v30 = vadd.f32 %v3401_v27, %v375_v17  ;;  %v438_v34 = vadd.f32 %v5533_v33, %v414_v6  ;;  %v458_v9 = vadd.f32 %v5536_v38, %v434_v22  ;;  %v5543_v38 = vld [vmem:[#allocation30_spill] sm:$0xff] }
 0x10a   : > { %v529_v53 = vpop.permute.xlu2 %528  ;;  %v3549_v54 = vpop.permute.xlu1 %490  ;;  %v550_v14 = vmul.f32 %v3562_v49, %v538_v5  ;;  %v511_v27 = vadd.f32 %v3505_v10, %v487_v4  ;;  %v5535_v10 = vld [vmem:[#allocation34_spill] sm:$0xff]  ;;  %v545_v62 = vmul.f32 %v3589_v29, %v538_v5  ;;  %v3614_v45 = vmul.f32 %v3593_v31, %v538_v5 }
 0x10b   : > { %v3554_v46 = vpop.permute.xlu0 %488  ;;  %v435_v21 = vadd.f32 %v3443_v2, %v411_v30  ;;  %v5534_v2 = vld [vmem:[#allocation33_spill] sm:$0xff]  ;;  %v462_v58 = vadd.f32 %v5537_v48, %v438_v34  ;;  %v482_v39 = vadd.f32 %v3509_v7, %v458_v9  ;;  %v3617_v20 = vmul.f32 %v3595_v32, %v538_v5 }
 0x10c   : > { %v437_v51 = vadd.f32 %v5534_v2, %v413_v16  ;;  %v556_v8 = vrot.slane %v550_v14, 1  ;;  %v3601_v24 = vadd.f32 %v529_v53, %v511_v27  ;;  %v5539_v53 = vld [vmem:[#allocation26_spill] sm:$0xff]  ;;  %v3629_v7 = vmul.f32 %v3605_v37, %v538_v5 }
 0x10d   : > { %v459_v25 = vadd.f32 %v5535_v10, %v435_v21  ;;  %v486_v44 = vadd.f32 %v3525_v35, %v462_v58  ;;  %v506_v1 = vadd.f32 %v3554_v46, %v482_v39  ;;  %v629_v17 = vrot.slane %v3617_v20, 4 }
 0x10e   : > { %v461_v61 = vadd.f32 %v5538_v60, %v437_v51  ;;  %v562_v41 = vadd.f32 %v556_v8, %v545_v62  ;;  %v3622_v52 = vmul.f32 %v3593_v31, %v3601_v24  ;;  %v3634_v57 = vmul.f32 %v3595_v32, %v3601_v24  ;;  %v5544_v60 = vld [vmem:[#allocation31_spill] sm:$0xff] }
 0x10f   : > { %v483_v40 = vadd.f32 %v3507_v0, %v459_v25  ;;  %v5540_v0 = vld [vmem:[#allocation27_spill] sm:$0xff]  ;;  %v3641_v47 = vmul.f32 %v3605_v37, %v3601_v24  ;;  %v5542_v25 = vld [vmem:[#allocation29_spill] sm:$0xff] }
 0x110   : > { %935 = vrot.lane.b32.xlu2 %v3479_v23, %s3049_s28  ;;  %933 = vrot.lane.b32.xlu1 %v3482_v18, %s3049_s28  ;;  %v3591_v18 = vstv %s564_s13  ;;  %v485_v36 = vadd.f32 %v3527_v42, %v461_v61  ;;  %v599_v42 = vrot.slane %v3614_v45, 3  ;;  %v603_v56 = vrot.slane %v3622_v52, 3 }
 0x111   : > { %931 = vrot.lane.b32.xlu0 %v3485_v19, %s3049_s28  ;;  %v567_v3 = vmul.f32 %v3591_v18, %v538_v5  ;;  %v507_v35 = vadd.f32 %v3549_v54, %v483_v40  ;;  %v633_v46 = vrot.slane %v3634_v57, 4  ;;  %v663_v14 = vrot.slane %v3641_v47, 5 }
 0x112   : > { %v3587_v28 = vpop.permute.xlu2 %761  ;;  %v497_v23 = vpop.permute.xlu1 %496 }
 0x113   : > { %v3597_v19 = vpop.permute.xlu0 %494  ;;  %v573_v59 = vrot.slane %v567_v3, 2  ;;  %v510_v22 = vadd.f32 %v497_v23, %v486_v44  ;;  %v679_v44 = vrot.slane %v3634_v57, 6  ;;  %v675_v57 = vrot.slane %v3617_v20, 6 }
 0x114   : > { %v509_v61 = vadd.f32 %v3597_v19, %v485_v36  ;;  %v695_v19 = vrot.slane %v3622_v52, 7 }
 0x115   : > { %v3650_v55 = vadd.f32 %v573_v59, %v562_v41 }
 0x118   : > { %953 = vrot.lane.b32.xlu2 %v5539_v53, %s3050_s29  ;;  %951 = vrot.lane.b32.xlu1 %v5540_v0, %s3050_s29 }
 0x119   : > { %949 = vrot.lane.b32.xlu0 %v5541_v43, %s3050_s29 }
 0x11a   : > { %v3644_v5 = vpop.permute.xlu2 %767  ;;  %v521_v13 = vpop.permute.xlu1 %520 }
 0x11b   : > { %v3648_v54 = vadd.f32 %v521_v13, %v507_v35  ;;  %v519_v50 = vpop.permute.xlu0 %518 }
 0x11c   : > { %v536_v26 = vadd.f32 %v519_v50, %v506_v1 }
 0x11d   : > { %v584_v30 = vmul.f32 %v3593_v31, %v3648_v54  ;;  %v614_v63 = vmul.f32 %v3595_v32, %v3648_v54  ;;  %v644_v4 = vmul.f32 %v3605_v37, %v3648_v54 }
 0x11e   : > { %v549_v6 = vmul.f32 %v3562_v49, %v536_v26  ;;  %v566_v16 = vmul.f32 %v3591_v18, %v536_v26  ;;  %v583_v21 = vmul.f32 %v3593_v31, %v536_v26  ;;  %v544_v34 = vmul.f32 %v3589_v29, %v536_v26 }
 0x11f   : > { %v597_v27 = vrot.slane %v584_v30, 3  ;;  %v627_v33 = vrot.slane %v614_v63, 4  ;;  %v657_v2 = vrot.slane %v644_v4, 5  ;;  %v689_v51 = vrot.slane %v584_v30, 7 }
 0x120   : > { %v555_v8 = vrot.slane %v549_v6, 1  ;;  %v596_v10 = vrot.slane %v583_v21, 3  ;;  %959 = vrot.lane.b32.xlu2 %v5542_v25, %s3050_s29  ;;  %957 = vrot.lane.b32.xlu1 %v5543_v38, %s3050_s29  ;;  %v673_v9 = vrot.slane %v614_v63, 6  ;;  %v613_v48 = vmul.f32 %v3595_v32, %v536_v26  ;;  %v5546_v25 = vld [vmem:[#allocation21_spill] sm:$0xff] }
 0x121   : > { %v643_v58 = vmul.f32 %v3605_v37, %v536_v26  ;;  %v688_v23 = vrot.slane %v583_v21, 7  ;;  %955 = vrot.lane.b32.xlu0 %v5544_v60, %s3050_s29  ;;  %v572_v3 = vrot.slane %v566_v16, 2 }
 0x122   : > { %v561_v62 = vadd.f32 %v555_v8, %v544_v34  ;;  %v598_v40 = vsel %vm595_vm0, %v596_v10, %v597_v27  ;;  %v3675_v39 = vpop.permute.xlu2 %797  ;;  %v527_v41 = vpop.permute.xlu1 %526  ;;  %v626_v53 = vrot.slane %v613_v48, 4  ;;  %v672_v35 = vrot.slane %v613_v48, 6  ;;  %v5545_v10 = vld [vmem:[#allocation20_spill] sm:$0xff] }
 0x123   : > { %v656_v0 = vrot.slane %v643_v58, 5  ;;  %v525_v43 = vpop.permute.xlu0 %524  ;;  %v540_v1 = vadd.f32 %v527_v41, %v510_v22  ;;  %v3681_v50 = vsel %vm687_vm4, %v688_v23, %v689_v51 }
 0x124   : > { %v578_v59 = vadd.f32 %v572_v3, %v561_v62  ;;  %v3678_v13 = vadd.f32 %v525_v43, %v509_v61  ;;  %v628_v36 = vsel %vm625_vm1, %v626_v53, %v627_v33  ;;  %v3687_v30 = vsel %vm671_vm3, %v672_v35, %v673_v9 }
 0x125   : > { %v658_v26 = vsel %vm655_vm2, %v656_v0, %v657_v2  ;;  %v546_v4 = vmul.f32 %v3589_v29, %v540_v1  ;;  %v551_v6 = vmul.f32 %v3562_v49, %v540_v1  ;;  %v568_v16 = vmul.f32 %v3591_v18, %v540_v1 }
 0x126   : > { %v608_v63 = vadd.f32 %v598_v40, %v578_v59  ;;  %v587_v21 = vmul.f32 %v3593_v31, %v540_v1  ;;  %v617_v22 = vmul.f32 %v3595_v32, %v540_v1  ;;  %v647_v27 = vmul.f32 %v3605_v37, %v540_v1 }
 0x127   : > { %v586_v33 = vmul.f32 %v3593_v31, %v3678_v13  ;;  %v557_v34 = vrot.slane %v551_v6, 1  ;;  %v574_v2 = vrot.slane %v568_v16, 2  ;;  %v616_v51 = vmul.f32 %v3595_v32, %v3678_v13  ;;  %v5547_v31 = vld [vmem:[#allocation22_spill] sm:$0xff] }
 0x128   : > { %v646_v8 = vmul.f32 %v3605_v37, %v3678_v13  ;;  %977 = vrot.lane.b32.xlu2 %v5545_v10, %s3051_s30  ;;  %975 = vrot.lane.b32.xlu1 %v5546_v25, %s3051_s30  ;;  %v602_v38 = vrot.slane %v587_v21, 3  ;;  %v632_v9 = vrot.slane %v617_v22, 4  ;;  %v662_v48 = vrot.slane %v647_v27, 5 }
 0x129   : > { %v678_v58 = vrot.slane %v617_v22, 6  ;;  %973 = vrot.lane.b32.xlu0 %v5547_v31, %s3051_s30  ;;  %v563_v23 = vadd.f32 %v557_v34, %v546_v4  ;;  %v694_v60 = vrot.slane %v587_v21, 7  ;;  %v600_v61 = vrot.slane %v586_v33, 3 }
 0x12a   : > { %v630_v32 = vrot.slane %v616_v51, 4  ;;  %v3707_v62 = vpop.permute.xlu2 %803  ;;  %v3709_v37 = vpop.permute.xlu1 %759  ;;  %v604_v3 = vsel %vm595_vm0, %v602_v38, %v603_v56  ;;  %v634_v40 = vsel %vm625_vm1, %v632_v9, %v633_v46  ;;  %v660_v41 = vrot.slane %v646_v8, 5 }
 0x12b   : > { %v676_v53 = vrot.slane %v616_v51, 6  ;;  %v3717_v0 = vpop.permute.xlu0 %757  ;;  %v580_v35 = vadd.f32 %v574_v2, %v563_v23  ;;  %v601_v43 = vsel %vm595_vm0, %v599_v42, %v600_v61  ;;  %v692_v52 = vrot.slane %v586_v33, 7  ;;  %v5551_v61 = vld [vmem:[#allocation14_spill] sm:$0xff] }
 0x12c   : > { %v631_v59 = vsel %vm625_vm1, %v629_v17, %v630_v32  ;;  %v659_v56 = vrot.slane %v3629_v7, 5  ;;  %v691_v46 = vrot.slane %v3614_v45, 7  ;;  %v609_v1 = vadd.f32 %v601_v43, %v3650_v55  ;;  %v5548_v45 = vld [vmem:[#allocation23_spill] sm:$0xff]  ;;  %v5549_v55 = vld [vmem:[#allocation24_spill] sm:$0xff] }
 0x12d   : > { %v610_v4 = vadd.f32 %v604_v3, %v580_v35  ;;  %v664_v6 = vsel %vm655_vm2, %v662_v48, %v663_v14  ;;  %v680_v42 = vsel %vm671_vm3, %v678_v58, %v679_v44  ;;  %v696_v16 = vsel %vm687_vm4, %v694_v60, %v695_v19  ;;  %v5550_v14 = vld [vmem:[#allocation25_spill] sm:$0xff]  ;;  %v5552_v32 = vld [vmem:[#allocation15_spill] sm:$0xff] }
 0x12e   : > { %v639_v21 = vadd.f32 %v631_v59, %v609_v1  ;;  %v661_v17 = vsel %vm655_vm2, %v659_v56, %v660_v41  ;;  %v677_v7 = vsel %vm671_vm3, %v675_v57, %v676_v53  ;;  %v693_v20 = vsel %vm687_vm4, %v691_v46, %v692_v52 }
 0x12f   : > { %v640_v47 = vadd.f32 %v634_v40, %v610_v4  ;;  %v638_v22 = vadd.f32 %v628_v36, %v608_v63  ;;  %v710_v51 = vmul.f32 %v3562_v49, %v3678_v13  ;;  %v711_v10 = vmul.f32 %v3562_v49, %v3601_v24 }
 0x130   : > { %983 = vrot.lane.b32.xlu2 %v5548_v45, %s3051_s30  ;;  %981 = vrot.lane.b32.xlu1 %v5549_v55, %s3051_s30  ;;  %v669_v44 = vadd.f32 %v661_v17, %v639_v21  ;;  %v704_v36 = vmul.f32 %v3591_v18, %v3678_v13  ;;  %v725_v63 = vmul.f32 %v3589_v29, %v3678_v13  ;;  %v5561_v45 = vld [vmem:[#allocation12_spill] sm:$0xff] }
 0x131   : > { %979 = vrot.lane.b32.xlu0 %v5550_v14, %s3051_s30  ;;  %v670_v33 = vadd.f32 %v664_v6, %v640_v47  ;;  %v668_v25 = vadd.f32 %v658_v26, %v638_v22  ;;  %v705_v48 = vmul.f32 %v3591_v18, %v3601_v24  ;;  %v726_v58 = vmul.f32 %v3589_v29, %v3601_v24  ;;  %v5553_v24 = vld [vmem:[#allocation16_spill] sm:$0xff]  ;;  %v5562_v47 = vld [vmem:[#allocation13_spill] sm:$0xff] }
 0x132   : > { %v3743_v19 = vpop.permute.xlu2 %833  ;;  %v3745_v27 = vpop.permute.xlu1 %765  ;;  %v685_v2 = vadd.f32 %v677_v7, %v669_v44  ;;  %v716_v60 = vrot.slane %v710_v51, 1  ;;  %v709_v26 = vmul.f32 %v3562_v49, %v3648_v54  ;;  %v717_v3 = vrot.slane %v711_v10, 1  ;;  %v5560_v7 = vld [vmem:[#allocation11_spill] sm:$0xff]  ;;  %v5563_v10 = vld [vmem:[#allocation6_spill] sm:$0xff] }
 0x133   : > { %v3747_v34 = vpop.permute.xlu0 %763  ;;  %v686_v8 = vadd.f32 %v680_v42, %v670_v33  ;;  %v684_v31 = vadd.f32 %v3687_v30, %v668_v25  ;;  %v703_v40 = vmul.f32 %v3591_v18, %v3648_v54  ;;  %v731_v41 = vrot.slane %v725_v63, 2  ;;  %v5559_v42 = vld [vmem:[#allocation19_spill] sm:$0xff] }
 0x134   : > { %v701_v38 = vadd.f32 %v693_v20, %v685_v2  ;;  %v724_v49 = vmul.f32 %v3589_v29, %v3648_v54  ;;  %v732_v52 = vrot.slane %v726_v58, 2  ;;  %v715_v46 = vrot.slane %v709_v26, 1  ;;  %v5557_v29 = vld [vmem:[#allocation17_spill] sm:$0xff]  ;;  %v5558_v54 = vld [vmem:[#allocation18_spill] sm:$0xff] }
 0x135   : > { %v702_v9 = vadd.f32 %v696_v16, %v686_v8  ;;  %v700_v53 = vadd.f32 %v3681_v50, %v684_v31  ;;  %v3800_v20 = vmul.f32 0.0010283804, %v5560_v7  ;;  %v3803_v55 = vmul.f32 0.0010283804, %v5561_v45  ;;  %v5573_v26 = vld [vmem:[#allocation5_spill] sm:$0xff] }
 0x136   : > { %v707_v23 = vadd.f32 %v704_v36, %v701_v38  ;;  %v730_v6 = vrot.slane %v724_v49, 2  ;;  %v3806_v14 = vmul.f32 0.0010283804, %v5562_v47  ;;  %v3821_v2 = vmul.f32 0.0010283804, %v3349_v11  ;;  %v5565_v38 = vld [vmem:[#allocation10_spill] sm:$0xff] }
 0x137   : > { %v708_v13 = vadd.f32 %v705_v48, %v702_v9  ;;  %v706_v18 = vadd.f32 %v703_v40, %v700_v53  ;;  %v3824_v51 = vmul.f32 0.0010283804, %v3352_v12  ;;  %v3827_v8 = vmul.f32 0.0010283804, %v3359_v15  ;;  %v5567_v12 = vld [vmem:[#allocation7_spill] sm:$0xff] }
 0x138   : > { %1001 = vrot.lane.b32.xlu2 %v5551_v61, %s3052_s4  ;;  %999 = vrot.lane.b32.xlu1 %v5552_v32, %s3052_s4  ;;  %v722_v30 = vadd.f32 %v716_v60, %v707_v23  ;;  %v3835_v25 = vmul.f32 %v5563_v10, %v5563_v10  ;;  %v3839_v11 = vmul.f32 %v5565_v38, %v5565_v38  ;;  %v5572_v23 = vld [vmem:[#allocation8_spill] sm:$0xff]  ;;  %v5574_v32 = vld [vmem:[#allocation9_spill] sm:$0xff] }
 0x139   : > { %997 = vrot.lane.b32.xlu0 %v5553_v24, %s3052_s4  ;;  %v723_v59 = vadd.f32 %v717_v3, %v708_v13  ;;  %v721_v4 = vadd.f32 %v715_v46, %v706_v18  ;;  %v3845_v15 = vmul.f32 %v5567_v12, %v5567_v12  ;;  %v3868_v60 = vmul.f32 %v5572_v23, %v5572_v23 }
 0x13a   : > { %v3775_v35 = vpop.permute.xlu2 %839  ;;  %v3777_v43 = vpop.permute.xlu1 %795  ;;  %v3781_v57 = vadd.f32 %v731_v41, %v722_v30  ;;  %5564 = vst [vmem:[#allocation35_spill] sm:$0xff] %v3835_v25  ;;  %v3854_v48 = vmul.f32 0.0075987587, %v3835_v25  ;;  %v3857_v58 = vmul.f32 0.0075987587, %v3839_v11  ;;  %v3872_v61 = vmul.f32 %v5573_v26, %v5573_v26 }
 0x13b   : > { %v3779_v56 = vpop.permute.xlu0 %793  ;;  %v3783_v1 = vadd.f32 %v732_v52, %v723_v59  ;;  %v3785_v50 = vadd.f32 %v730_v6, %v721_v4  ;;  %5566 = vst [vmem:[#allocation36_spill] sm:$0xff] %v3839_v11  ;;  %v3860_v31 = vmul.f32 0.0075987587, %v3845_v15  ;;  %v3878_v13 = vmul.f32 %v5574_v32, %v5574_v32 }
 0x13c   : > { %5554 = vst [vmem:[#allocation32_spill] sm:$0xff] %v3781_v57  ;;  %v3887_v30 = vmul.f32 0.0075987587, %v3868_v60  ;;  %v3890_v41 = vmul.f32 0.0075987587, %v3872_v61 }
 0x13d   : > { %5555 = vst [vmem:[#allocation33_spill] sm:$0xff] %v3783_v1  ;;  %v3893_v53 = vmul.f32 0.0075987587, %v3878_v13  ;;  %v3908_v18 = vmul.f32 0.036000773, %v3835_v25 }
 0x13e   : > { %5556 = vst [vmem:[#allocation34_spill] sm:$0xff] %v3785_v50  ;;  %v3911_v46 = vmul.f32 0.036000773, %v3839_v11  ;;  %v3914_v4 = vmul.f32 0.036000773, %v3845_v15 }
 0x13f   : > { %5568 = vst [vmem:[#allocation37_spill] sm:$0xff] %v3845_v15  ;;  %v3932_v7 = vmul.f32 0.036000773, %v3872_v61  ;;  %v3935_v45 = vmul.f32 0.036000773, %v3878_v13 }
 0x140   : > { %1007 = vrot.lane.b32.xlu2 %v5557_v29, %s3052_s4  ;;  %1005 = vrot.lane.b32.xlu1 %v5558_v54, %s3052_s4  ;;  %5569 = vst [vmem:[#allocation26_spill] sm:$0xff] %v3854_v48  ;;  %v3950_v12 = vmul.f32 0.1093607, %v3835_v25  ;;  %v3953_v23 = vmul.f32 0.1093607, %v3839_v11 }
 0x141   : > { %1003 = vrot.lane.b32.xlu0 %v5559_v42, %s3052_s4  ;;  %5570 = vst [vmem:[#allocation27_spill] sm:$0xff] %v3857_v58  ;;  %v3929_v42 = vmul.f32 0.036000773, %v3868_v60  ;;  %v3956_v26 = vmul.f32 0.1093607, %v3845_v15 }
 0x142   : > { %v3793_v16 = vpop.permute.xlu2 %869  ;;  %v3795_v21 = vpop.permute.xlu1 %801  ;;  %5571 = vst [vmem:[#allocation28_spill] sm:$0xff] %v3860_v31  ;;  %v3977_v1 = vmul.f32 0.1093607, %v3878_v13 }
 0x143   : > { %v3797_v17 = vpop.permute.xlu0 %799  ;;  %5575 = vst [vmem:[#allocation29_spill] sm:$0xff] %v3887_v30 }
 0x144   : > { %5576 = vst [vmem:[#allocation30_spill] sm:$0xff] %v3890_v41 }
 0x145   : > { %5577 = vst [vmem:[#allocation31_spill] sm:$0xff] %v3893_v53 }
 0x146   : > { %5578 = vst [vmem:[#allocation20_spill] sm:$0xff] %v3908_v18 }
 0x147   : > { %5579 = vst [vmem:[#allocation21_spill] sm:$0xff] %v3911_v46 }
 0x148   : > { %1031 = vrot.lane.b32.xlu2 %v3800_v20, %s3053_s5  ;;  %1029 = vrot.lane.b32.xlu1 %v3803_v55, %s3053_s5  ;;  %5580 = vst [vmem:[#allocation22_spill] sm:$0xff] %v3914_v4 }
 0x149   : > { %1027 = vrot.lane.b32.xlu0 %v3806_v14, %s3053_s5  ;;  %5581 = vst [vmem:[#allocation23_spill] sm:$0xff] %v3929_v42 }
 0x14a   : > { %v3814_v44 = vpop.permute.xlu2 %875  ;;  %v3816_v22 = vpop.permute.xlu1 %831  ;;  %5582 = vst [vmem:[#allocation24_spill] sm:$0xff] %v3932_v7 }
 0x14b   : > { %v3818_v33 = vpop.permute.xlu0 %829  ;;  %5583 = vst [vmem:[#allocation25_spill] sm:$0xff] %v3935_v45 }
 0x14c   : > { %5584 = vst [vmem:[#allocation14_spill] sm:$0xff] %v3950_v12 }
 0x14d   : > { %5585 = vst [vmem:[#allocation15_spill] sm:$0xff] %v3953_v23 }
 0x14e   : > { %5586 = vst [vmem:[#allocation16_spill] sm:$0xff] %v3956_v26 }
 0x14f   : > { %5589 = vst [vmem:[#allocation19_spill] sm:$0xff] %v3977_v1 }
 0x150   : > { %1037 = vrot.lane.b32.xlu2 %v3821_v2, %s3053_s5  ;;  %1035 = vrot.lane.b32.xlu1 %v3824_v51, %s3053_s5 }
 0x151   : > { %1033 = vrot.lane.b32.xlu0 %v3827_v8, %s3053_s5 }
 0x152   : > { %v3847_v36 = vpop.permute.xlu2 %905  ;;  %v3849_v63 = vpop.permute.xlu1 %837 }
 0x153   : > { %v3851_v9 = vpop.permute.xlu0 %835 }
 0x158   : > { %1272 = vrot.lane.b32.xlu2 %v3854_v48, %s3044_s23  ;;  %1270 = vrot.lane.b32.xlu1 %v3857_v58, %s3044_s23  ;;  %v1366_v48 = vmul.f32 0.21300554, %v3835_v25 }
 0x159   : > { %1268 = vrot.lane.b32.xlu0 %v3860_v31, %s3044_s23 }
 0x15a   : > { %v3880_v3 = vpop.permute.xlu2 %911  ;;  %v3882_v40 = vpop.permute.xlu1 %867 }
 0x15b   : > { %v3884_v24 = vpop.permute.xlu0 %865 }
 0x160   : > { %1278 = vrot.lane.b32.xlu2 %v3887_v30, %s3044_s23  ;;  %1276 = vrot.lane.b32.xlu1 %v3890_v41, %s3044_s23  ;;  %v3971_v41 = vmul.f32 0.1093607, %v3868_v60  ;;  %v3974_v30 = vmul.f32 0.1093607, %v3872_v61 }
 0x161   : > { %1274 = vrot.lane.b32.xlu0 %v3893_v53, %s3044_s23 }
 0x162   : > { %v3901_v49 = vpop.permute.xlu2 %929  ;;  %v3903_v59 = vpop.permute.xlu1 %873  ;;  %5587 = vst [vmem:[#allocation17_spill] sm:$0xff] %v3971_v41 }
 0x163   : > { %v3905_v52 = vpop.permute.xlu0 %871  ;;  %5588 = vst [vmem:[#allocation18_spill] sm:$0xff] %v3974_v30 }
 0x168   : > { %1308 = vrot.lane.b32.xlu2 %v3908_v18, %s3045_s24  ;;  %1306 = vrot.lane.b32.xlu1 %v3911_v46, %s3045_s24  ;;  %v4002_v18 = vmul.f32 0.21300554, %v3868_v60 }
 0x169   : > { %1304 = vrot.lane.b32.xlu0 %v3914_v4, %s3045_s24 }
 0x16a   : > { %v3922_v6 = vpop.permute.xlu2 %935  ;;  %v3924_v29 = vpop.permute.xlu1 %903 }
 0x16b   : > { %v3926_v54 = vpop.permute.xlu0 %901 }
 0x170   : > { %1314 = vrot.lane.b32.xlu2 %v3929_v42, %s3045_s24  ;;  %1312 = vrot.lane.b32.xlu1 %v3932_v7, %s3045_s24  ;;  %v1364_v7 = vmul.f32 0.21300554, %v3845_v15 }
 0x171   : > { %1310 = vrot.lane.b32.xlu0 %v3935_v45, %s3045_s24  ;;  %v1365_v45 = vmul.f32 0.21300554, %v3839_v11 }
 0x172   : > { %v3943_v47 = vpop.permute.xlu2 %953  ;;  %v3945_v10 = vpop.permute.xlu1 %909 }
 0x173   : > { %v3947_v38 = vpop.permute.xlu0 %907 }
 0x178   : > { %1344 = vrot.lane.b32.xlu2 %v3950_v12, %s3046_s25  ;;  %1342 = vrot.lane.b32.xlu1 %v3953_v23, %s3046_s25  ;;  %v1402_v12 = vmul.f32 0.26601174, %v3835_v25 }
 0x179   : > { %1340 = vrot.lane.b32.xlu0 %v3956_v26, %s3046_s25 }
 0x17a   : > { %v3964_v32 = vpop.permute.xlu2 %959  ;;  %v3966_v50 = vpop.permute.xlu1 %927 }
 0x17b   : > { %v3968_v53 = vpop.permute.xlu0 %925 }
 0x180   : > { %1350 = vrot.lane.b32.xlu2 %v3971_v41, %s3046_s25  ;;  %1348 = vrot.lane.b32.xlu1 %v3974_v30, %s3046_s25  ;;  %v4008_v30 = vmul.f32 0.21300554, %v3878_v13 }
 0x181   : > { %1346 = vrot.lane.b32.xlu0 %v3977_v1, %s3046_s25  ;;  %v4005_v1 = vmul.f32 0.21300554, %v3872_v61 }
 0x182   : > { %v978_v57 = vpop.permute.xlu2 %977  ;;  %v3985_v31 = vpop.permute.xlu1 %933 }
 0x183   : > { %5590 = vst [vmem:[#allocation11_spill] sm:$0xff] %v3985_v31  ;;  %v3987_v58 = vpop.permute.xlu0 %931 }
 0x184   : > { %5591 = vst [vmem:[#allocation12_spill] sm:$0xff] %v3987_v58  ;;  %v1401_v58 = vmul.f32 0.26601174, %v3839_v11  ;;  %v1405_v11 = vmul.f32 0.26601174, %v3868_v60 }
 0x188   : > { %1380 = vrot.lane.b32.xlu2 %v1366_v48, %s3047_s26  ;;  %1378 = vrot.lane.b32.xlu1 %v1365_v45, %s3047_s26 }
 0x189   : > { %1376 = vrot.lane.b32.xlu0 %v1364_v7, %s3047_s26 }
 0x18a   : > { %v3995_v42 = vpop.permute.xlu2 %983  ;;  %v3997_v4 = vpop.permute.xlu1 %951 }
 0x18b   : > { %5592 = vst [vmem:[#allocation13_spill] sm:$0xff] %v3997_v4  ;;  %v3999_v46 = vpop.permute.xlu0 %949  ;;  %v777_v4 = vadd.f32 %v3587_v28, %v3800_v20  ;;  %v1403_v28 = vmul.f32 0.26601174, %v3878_v13 }
 0x18c   : > { %5593 = vst [vmem:[#allocation6_spill] sm:$0xff] %v3999_v46  ;;  %v1400_v46 = vmul.f32 0.26601174, %v3845_v15  ;;  %v1404_v15 = vmul.f32 0.26601174, %v3872_v61 }
 0x18d   : > { %v813_v25 = vadd.f32 %v3675_v39, %v777_v4 }
 0x18f   : > { %v849_v20 = vadd.f32 %v3743_v19, %v813_v25 }
 0x190   : > { %1386 = vrot.lane.b32.xlu2 %v4002_v18, %s3047_s26  ;;  %1384 = vrot.lane.b32.xlu1 %v4005_v1, %s3047_s26 }
 0x191   : > { %1382 = vrot.lane.b32.xlu0 %v4008_v30, %s3047_s26 }
 0x192   : > { %v1002_v41 = vpop.permute.xlu2 %1001  ;;  %v4016_v26 = vpop.permute.xlu1 %957 }
 0x193   : > { %5594 = vst [vmem:[#allocation10_spill] sm:$0xff] %v4016_v26  ;;  %v4018_v23 = vpop.permute.xlu0 %955 }
 0x194   : > { %5595 = vst [vmem:[#allocation7_spill] sm:$0xff] %v4018_v23 }
 0x198   : > { %1416 = vrot.lane.b32.xlu2 %v1402_v12, %s3048_s27  ;;  %1414 = vrot.lane.b32.xlu1 %v1401_v58, %s3048_s27  ;;  %v780_v58 = vadd.f32 %v3644_v5, %v3821_v2 }
 0x199   : > { %1412 = vrot.lane.b32.xlu0 %v1400_v46, %s3048_s27  ;;  %v885_v46 = vadd.f32 %v3793_v16, %v849_v20 }
 0x19a   : > { %v4028_v31 = vpop.permute.xlu2 %1007  ;;  %v4030_v26 = vpop.permute.xlu1 %975  ;;  %v816_v5 = vadd.f32 %v3707_v62, %v780_v58  ;;  %v779_v62 = vadd.f32 %v3745_v27, %v3824_v51  ;;  %v5597_v58 = vld [vmem:[#allocation13_spill] sm:$0xff] }
 0x19b   : > { %v4032_v23 = vpop.permute.xlu0 %973  ;;  %v921_v39 = vadd.f32 %v3847_v36, %v885_v46  ;;  %v776_v36 = vadd.f32 %v3709_v37, %v3803_v55  ;;  %v5598_v46 = vld [vmem:[#allocation6_spill] sm:$0xff] }
 0x19c   : > { %v852_v2 = vadd.f32 %v3775_v35, %v816_v5 }
 0x19d   : > { %v945_v16 = vadd.f32 %v3901_v49, %v921_v39  ;;  %v778_v49 = vadd.f32 %v3747_v34, %v3827_v8  ;;  %v812_v37 = vadd.f32 %v3777_v43, %v776_v36  ;;  %v4083_v8 = vstv %s1056_s19 }
 0x19e   : > { %v4128_v39 = vstv %s1119_s7 }
 0x19f   : > { %v969_v25 = vadd.f32 %v3943_v47, %v945_v16 }
 0x1a0   : > { %1422 = vrot.lane.b32.xlu2 %v1405_v11, %s3048_s27  ;;  %1420 = vrot.lane.b32.xlu1 %v1404_v15, %s3048_s27  ;;  %v888_v11 = vadd.f32 %v3814_v44, %v852_v2  ;;  %v5600_v2 = vld [vmem:[#allocation10_spill] sm:$0xff] }
 0x1a1   : > { %1418 = vrot.lane.b32.xlu0 %v1403_v28, %s3048_s27  ;;  %v993_v15 = vadd.f32 %v978_v57, %v969_v25  ;;  %v775_v28 = vadd.f32 %v3717_v0, %v3806_v14  ;;  %v815_v14 = vadd.f32 %v3795_v21, %v779_v62 }
 0x1a2   : > { %v1032_v4 = vpop.permute.xlu2 %1031  ;;  %v4048_v12 = vpop.permute.xlu1 %981  ;;  %v924_v35 = vadd.f32 %v3880_v3, %v888_v11  ;;  %v814_v3 = vadd.f32 %v3797_v17, %v778_v49 }
 0x1a3   : > { %v4050_v19 = vpop.permute.xlu0 %979  ;;  %v1017_v44 = vadd.f32 %v1002_v41, %v993_v15  ;;  %v811_v0 = vadd.f32 %v3779_v56, %v775_v28  ;;  %v848_v41 = vadd.f32 %v3816_v22, %v812_v37  ;;  %v851_v43 = vadd.f32 %v3849_v63, %v815_v14  ;;  %v5604_v14 = vld [vmem:[#allocation16_spill] sm:$0xff] }
 0x1a4   : > { %v948_v27 = vadd.f32 %v3922_v6, %v924_v35  ;;  %v850_v21 = vadd.f32 %v3851_v9, %v814_v3  ;;  %v4142_v28 = vstv %s1148_s10 }
 0x1a5   : > { %v4078_v51 = vadd.f32 %v1032_v4, %v1017_v44  ;;  %v847_v34 = vadd.f32 %v3818_v33, %v811_v0  ;;  %v884_v6 = vadd.f32 %v3882_v40, %v848_v41  ;;  %v887_v17 = vadd.f32 %v3903_v59, %v851_v43  ;;  %v5599_v4 = vld [vmem:[#allocation12_spill] sm:$0xff] }
 0x1a6   : > { %v972_v56 = vadd.f32 %v3964_v32, %v948_v27  ;;  %v886_v40 = vadd.f32 %v3905_v52, %v850_v21  ;;  %v4120_v52 = vstv %s1090_s6  ;;  %v5596_v32 = vld [vmem:[#allocation11_spill] sm:$0xff] }
 0x1a7   : > { %v1059_v33 = vmul.f32 %v4083_v8, %v4078_v51  ;;  %v920_v63 = vadd.f32 %v3924_v29, %v884_v6  ;;  %v4140_v36 = vmul.f32 %v4120_v52, %v4078_v51  ;;  %v4146_v35 = vmul.f32 %v4128_v39, %v4078_v51 }
 0x1a8   : > { %1440 = vrot.lane.b32.xlu2 %v1366_v48, %s3049_s28  ;;  %1438 = vrot.lane.b32.xlu1 %v1365_v45, %s3049_s28  ;;  %v996_v22 = vadd.f32 %v3995_v42, %v972_v56  ;;  %v4113_v45 = vstv %s1051_s20 }
 0x1a9   : > { %1436 = vrot.lane.b32.xlu0 %v1364_v7, %s3049_s28  ;;  %v883_v7 = vadd.f32 %v3884_v24, %v847_v34  ;;  %v923_v24 = vadd.f32 %v3945_v10, %v887_v17  ;;  %v1065_v10 = vrot.slane %v1059_v33, 1  ;;  %v1054_v16 = vmul.f32 %v4113_v45, %v4078_v51 }
 0x1aa   : > { %v1038_v57 = vpop.permute.xlu2 %1037  ;;  %v4068_v48 = vpop.permute.xlu1 %999  ;;  %v1020_v59 = vadd.f32 %v4028_v31, %v996_v22  ;;  %v1107_v21 = vrot.slane %v4140_v36, 3  ;;  %v1136_v22 = vrot.slane %v4146_v35, 4 }
 0x1ab   : > { %v4074_v55 = vpop.permute.xlu0 %997  ;;  %v919_v9 = vadd.f32 %v3926_v54, %v883_v7  ;;  %v4115_v54 = vstv %s1073_s21  ;;  %v947_v20 = vadd.f32 %v5596_v32, %v923_v24  ;;  %v1071_v62 = vadd.f32 %v1065_v10, %v1054_v16 }
 0x1ac   : > { %v4123_v31 = vadd.f32 %v1038_v57, %v1020_v59  ;;  %v5601_v57 = vld [vmem:[#allocation14_spill] sm:$0xff] }
 0x1ad   : > { %v943_v29 = vadd.f32 %v3968_v53, %v919_v9  ;;  %v971_v25 = vadd.f32 %v5600_v2, %v947_v20  ;;  %v5607_v2 = vld [vmem:[#allocation19_spill] sm:$0xff] }
 0x1ae   : > { %v4150_v44 = vmul.f32 %v4120_v52, %v4123_v31  ;;  %v4159_v37 = vmul.f32 %v4128_v39, %v4123_v31  ;;  %v4167_v41 = vmul.f32 %v4142_v28, %v4123_v31 }
 0x1af   : > { %v967_v53 = vadd.f32 %v5598_v46, %v943_v29  ;;  %v995_v3 = vadd.f32 %v4048_v12, %v971_v25 }
 0x1b0   : > { %1446 = vrot.lane.b32.xlu2 %v4002_v18, %s3049_s28  ;;  %1444 = vrot.lane.b32.xlu1 %v4005_v1, %s3049_s28  ;;  %v944_v1 = vadd.f32 %v3966_v50, %v920_v63  ;;  %v1140_v63 = vrot.slane %v4159_v37, 4 }
 0x1b1   : > { %1442 = vrot.lane.b32.xlu0 %v4008_v30, %s3049_s28  ;;  %v922_v30 = vadd.f32 %v3947_v38, %v886_v40  ;;  %v1076_v38 = vmul.f32 %v4115_v54, %v4078_v51  ;;  %v991_v15 = vadd.f32 %v4032_v23, %v967_v53  ;;  %v5602_v23 = vld [vmem:[#allocation15_spill] sm:$0xff]  ;;  %v1169_v40 = vrot.slane %v4167_v41, 5  ;;  %v5605_v53 = vld [vmem:[#allocation17_spill] sm:$0xff] }
 0x1b2   : > { %v4109_v42 = vpop.permute.xlu2 %1272  ;;  %v1006_v18 = vpop.permute.xlu1 %1005  ;;  %v968_v50 = vadd.f32 %v5597_v58, %v944_v1 }
 0x1b3   : > { %v4117_v47 = vpop.permute.xlu0 %1003  ;;  %v946_v5 = vadd.f32 %v5599_v4, %v922_v30  ;;  %v1082_v27 = vrot.slane %v1076_v38, 2  ;;  %v1015_v34 = vadd.f32 %v4074_v55, %v991_v15  ;;  %v1111_v55 = vrot.slane %v4150_v44, 3  ;;  %v5606_v4 = vld [vmem:[#allocation18_spill] sm:$0xff] }
 0x1b4   : > { %v992_v11 = vadd.f32 %v4030_v26, %v968_v50  ;;  %v5603_v26 = vld [vmem:[#allocation7_spill] sm:$0xff]  ;;  %v1019_v29 = vadd.f32 %v1006_v18, %v995_v3  ;;  %v1199_v3 = vrot.slane %v4150_v44, 7 }
 0x1b5   : > { %v970_v49 = vadd.f32 %v5603_v26, %v946_v5  ;;  %v4180_v17 = vadd.f32 %v1082_v27, %v1071_v62  ;;  %v1184_v26 = vrot.slane %v4159_v37, 6  ;;  %v1180_v37 = vrot.slane %v4146_v35, 6 }
 0x1b6   : > { %v1016_v0 = vadd.f32 %v4068_v48, %v992_v11  ;;  %v4175_v48 = vmul.f32 %v4142_v28, %v4078_v51 }
 0x1b7   : > { %v994_v6 = vadd.f32 %v4050_v19, %v970_v49 }
 0x1b8   : > { %1464 = vrot.lane.b32.xlu2 %v5601_v57, %s3050_s29  ;;  %1462 = vrot.lane.b32.xlu1 %v5602_v23, %s3050_s29 }
 0x1b9   : > { %1460 = vrot.lane.b32.xlu0 %v5604_v14, %s3050_s29  ;;  %v1018_v25 = vadd.f32 %v4117_v47, %v994_v6 }
 0x1ba   : > { %v4170_v43 = vpop.permute.xlu2 %1278  ;;  %v1030_v56 = vpop.permute.xlu1 %1029 }
 0x1bb   : > { %v4178_v7 = vadd.f32 %v1030_v56, %v1016_v0  ;;  %v1028_v12 = vpop.permute.xlu0 %1027 }
 0x1bc   : > { %v1045_v33 = vadd.f32 %v1028_v12, %v1015_v34 }
 0x1bd   : > { %v1093_v9 = vmul.f32 %v4120_v52, %v4178_v7  ;;  %v1122_v51 = vmul.f32 %v4128_v39, %v4178_v7  ;;  %v1151_v19 = vmul.f32 %v4142_v28, %v4178_v7 }
 0x1be   : > { %v1058_v24 = vmul.f32 %v4083_v8, %v1045_v33  ;;  %v1075_v59 = vmul.f32 %v4115_v54, %v1045_v33  ;;  %v1092_v1 = vmul.f32 %v4120_v52, %v1045_v33  ;;  %v1053_v32 = vmul.f32 %v4113_v45, %v1045_v33 }
 0x1bf   : > { %v1105_v30 = vrot.slane %v1093_v9, 3  ;;  %v1134_v10 = vrot.slane %v1122_v51, 4  ;;  %v1163_v20 = vrot.slane %v1151_v19, 5  ;;  %v1178_v58 = vrot.slane %v1122_v51, 6 }
 0x1c0   : > { %v1064_v50 = vrot.slane %v1058_v24, 1  ;;  %v1104_v46 = vrot.slane %v1092_v1, 3  ;;  %1470 = vrot.lane.b32.xlu2 %v5605_v53, %s3050_s29  ;;  %1468 = vrot.lane.b32.xlu1 %v5606_v4, %s3050_s29  ;;  %v1193_v5 = vrot.slane %v1093_v9, 7  ;;  %v1121_v16 = vmul.f32 %v4128_v39, %v1045_v33  ;;  %v5609_v53 = vld [vmem:[#allocation21_spill] sm:$0xff] }
 0x1c1   : > { %v1150_v38 = vmul.f32 %v4142_v28, %v1045_v33  ;;  %v1192_v18 = vrot.slane %v1092_v1, 7  ;;  %1466 = vrot.lane.b32.xlu0 %v5607_v2, %s3050_s29  ;;  %v1081_v15 = vrot.slane %v1075_v59, 2 }
 0x1c2   : > { %v1070_v11 = vadd.f32 %v1064_v50, %v1053_v32  ;;  %v1106_v62 = vsel %vm595_vm0, %v1104_v46, %v1105_v30  ;;  %v4206_v57 = vpop.permute.xlu2 %1308  ;;  %v1036_v23 = vpop.permute.xlu1 %1035  ;;  %v1133_v49 = vrot.slane %v1121_v16, 4  ;;  %v1177_v14 = vrot.slane %v1121_v16, 6  ;;  %v5608_v46 = vld [vmem:[#allocation20_spill] sm:$0xff] }
 0x1c3   : > { %v1162_v0 = vrot.slane %v1150_v38, 5  ;;  %v1034_v27 = vpop.permute.xlu0 %1033  ;;  %v1049_v56 = vadd.f32 %v1036_v23, %v1019_v29  ;;  %v4220_v9 = vsel %vm687_vm4, %v1192_v18, %v1193_v5 }
 0x1c4   : > { %v1087_v34 = vadd.f32 %v1081_v15, %v1070_v11  ;;  %v4210_v12 = vadd.f32 %v1034_v27, %v1018_v25  ;;  %v1135_v47 = vsel %vm625_vm1, %v1133_v49, %v1134_v10  ;;  %v4217_v33 = vsel %vm671_vm3, %v1177_v14, %v1178_v58 }
 0x1c5   : > { %v4214_v6 = vsel %vm655_vm2, %v1162_v0, %v1163_v20  ;;  %v1055_v19 = vmul.f32 %v4113_v45, %v1049_v56  ;;  %v1060_v24 = vmul.f32 %v4083_v8, %v1049_v56  ;;  %v1077_v59 = vmul.f32 %v4115_v54, %v1049_v56 }
 0x1c6   : > { %v1116_v51 = vadd.f32 %v1106_v62, %v1087_v34  ;;  %v1096_v1 = vmul.f32 %v4120_v52, %v1049_v56  ;;  %v1125_v29 = vmul.f32 %v4128_v39, %v1049_v56  ;;  %v1154_v30 = vmul.f32 %v4142_v28, %v1049_v56 }
 0x1c7   : > { %v1095_v10 = vmul.f32 %v4120_v52, %v4210_v12  ;;  %v1066_v32 = vrot.slane %v1060_v24, 1  ;;  %v1083_v20 = vrot.slane %v1077_v59, 2  ;;  %v1124_v58 = vmul.f32 %v4128_v39, %v4210_v12  ;;  %v5610_v52 = vld [vmem:[#allocation22_spill] sm:$0xff] }
 0x1c8   : > { %v1153_v50 = vmul.f32 %v4142_v28, %v4210_v12  ;;  %1488 = vrot.lane.b32.xlu2 %v5608_v46, %s3051_s30  ;;  %1486 = vrot.lane.b32.xlu1 %v5609_v53, %s3051_s30  ;;  %v1110_v4 = vrot.slane %v1096_v1, 3  ;;  %v1139_v5 = vrot.slane %v1125_v29, 4  ;;  %v1168_v16 = vrot.slane %v1154_v30, 5 }
 0x1c9   : > { %v1183_v38 = vrot.slane %v1125_v29, 6  ;;  %1484 = vrot.lane.b32.xlu0 %v5610_v52, %s3051_s30  ;;  %v1072_v18 = vadd.f32 %v1066_v32, %v1055_v19  ;;  %v1198_v2 = vrot.slane %v1096_v1, 7  ;;  %v1108_v25 = vrot.slane %v1095_v10, 3 }
 0x1ca   : > { %v1137_v39 = vrot.slane %v1124_v58, 4  ;;  %v4240_v11 = vpop.permute.xlu2 %1314  ;;  %v4242_v28 = vpop.permute.xlu1 %1270  ;;  %v1112_v15 = vsel %vm595_vm0, %v1110_v4, %v1111_v55  ;;  %v1141_v62 = vsel %vm625_vm1, %v1139_v5, %v1140_v63  ;;  %v1166_v23 = vrot.slane %v1153_v50, 5 }
 0x1cb   : > { %v1181_v49 = vrot.slane %v1124_v58, 6  ;;  %v4250_v0 = vpop.permute.xlu0 %1268  ;;  %v1089_v14 = vadd.f32 %v1083_v20, %v1072_v18  ;;  %v1109_v27 = vsel %vm595_vm0, %v1107_v21, %v1108_v25  ;;  %v1196_v44 = vrot.slane %v1095_v10, 7  ;;  %v5614_v25 = vld [vmem:[#allocation26_spill] sm:$0xff] }
 0x1cc   : > { %v1138_v34 = vsel %vm625_vm1, %v1136_v22, %v1137_v39  ;;  %v1165_v55 = vrot.slane %v4175_v48, 5  ;;  %v1195_v63 = vrot.slane %v4140_v36, 7  ;;  %v1117_v56 = vadd.f32 %v1109_v27, %v4180_v17  ;;  %v5611_v36 = vld [vmem:[#allocation23_spill] sm:$0xff]  ;;  %v5612_v17 = vld [vmem:[#allocation24_spill] sm:$0xff] }
 0x1cd   : > { %v1118_v19 = vadd.f32 %v1112_v15, %v1089_v14  ;;  %v1170_v24 = vsel %vm655_vm2, %v1168_v16, %v1169_v40  ;;  %v1185_v21 = vsel %vm671_vm3, %v1183_v38, %v1184_v26  ;;  %v1200_v59 = vsel %vm687_vm4, %v1198_v2, %v1199_v3  ;;  %v5613_v40 = vld [vmem:[#allocation25_spill] sm:$0xff]  ;;  %v5615_v39 = vld [vmem:[#allocation27_spill] sm:$0xff] }
 0x1ce   : > { %v1146_v1 = vadd.f32 %v1138_v34, %v1117_v56  ;;  %v1167_v22 = vsel %vm655_vm2, %v1165_v55, %v1166_v23  ;;  %v1182_v48 = vsel %vm671_vm3, %v1180_v37, %v1181_v49  ;;  %v1197_v35 = vsel %vm687_vm4, %v1195_v63, %v1196_v44 }
 0x1cf   : > { %v1147_v41 = vadd.f32 %v1141_v62, %v1118_v19  ;;  %v1145_v29 = vadd.f32 %v1135_v47, %v1116_v51  ;;  %v1214_v58 = vmul.f32 %v4083_v8, %v4210_v12  ;;  %v1215_v46 = vmul.f32 %v4083_v8, %v4123_v31  ;;  %v5617_v19 = vld [vmem:[#allocation32_spill] sm:$0xff] }
 0x1d0   : > { %1494 = vrot.lane.b32.xlu2 %v5611_v36, %s3051_s30  ;;  %1492 = vrot.lane.b32.xlu1 %v5612_v17, %s3051_s30  ;;  %v1175_v26 = vadd.f32 %v1167_v22, %v1146_v1  ;;  %v1208_v47 = vmul.f32 %v4115_v54, %v4210_v12  ;;  %v1229_v51 = vmul.f32 %v4113_v45, %v4210_v12  ;;  %v5625_v17 = vld [vmem:[#allocation29_spill] sm:$0xff] }
 0x1d1   : > { %1490 = vrot.lane.b32.xlu0 %v5613_v40, %s3051_s30  ;;  %v1176_v10 = vadd.f32 %v1170_v24, %v1147_v41  ;;  %v1174_v53 = vadd.f32 %v4214_v6, %v1145_v29  ;;  %v1209_v16 = vmul.f32 %v4115_v54, %v4123_v31  ;;  %v1230_v38 = vmul.f32 %v4113_v45, %v4123_v31  ;;  %v5616_v31 = vld [vmem:[#allocation28_spill] sm:$0xff]  ;;  %v5626_v41 = vld [vmem:[#allocation30_spill] sm:$0xff] }
 0x1d2   : > { %v4276_v3 = vpop.permute.xlu2 %1344  ;;  %v4278_v30 = vpop.permute.xlu1 %1276  ;;  %v1190_v20 = vadd.f32 %v1182_v48, %v1175_v26  ;;  %v1220_v2 = vrot.slane %v1214_v58, 1  ;;  %v1213_v6 = vmul.f32 %v4083_v8, %v4178_v7  ;;  %v1221_v15 = vrot.slane %v1215_v46, 1  ;;  %v5628_v26 = vld [vmem:[#allocation31_spill] sm:$0xff]  ;;  %v5629_v29 = vld [vmem:[#allocation34_spill] sm:$0xff] }
 0x1d3   : > { %v4280_v32 = vpop.permute.xlu0 %1274  ;;  %v1191_v50 = vadd.f32 %v1185_v21, %v1176_v10  ;;  %v1189_v52 = vadd.f32 %v4217_v33, %v1174_v53  ;;  %v1207_v62 = vmul.f32 %v4115_v54, %v4178_v7  ;;  %v1235_v23 = vrot.slane %v1229_v51, 2 }
 0x1d4   : > { %v1205_v4 = vadd.f32 %v1197_v35, %v1190_v20  ;;  %v1228_v8 = vmul.f32 %v4113_v45, %v4178_v7  ;;  %v1236_v44 = vrot.slane %v1230_v38, 2  ;;  %v1219_v63 = vrot.slane %v1213_v6, 1  ;;  %v5635_v38 = vld [vmem:[#allocation37_spill] sm:$0xff] }
 0x1d5   : > { %v1206_v5 = vadd.f32 %v1200_v59, %v1191_v50  ;;  %v1204_v49 = vadd.f32 %v4220_v9, %v1189_v52  ;;  %v4317_v24 = vmul.f32 %v5617_v19, %v5617_v19  ;;  %v5621_v59 = vld [vmem:[#allocation33_spill] sm:$0xff]  ;;  %v4349_v10 = vmul.f32 %v5629_v29, %v5629_v29 }
 0x1d6   : > { %v1211_v18 = vadd.f32 %v1208_v47, %v1205_v4  ;;  %v1234_v21 = vrot.slane %v1228_v8, 2  ;;  %v4326_v1 = vmul.f32 %v5621_v59, %v5621_v59  ;;  %v5633_v47 = vld [vmem:[#allocation35_spill] sm:$0xff]  ;;  %v4371_v52 = vmul.f32 0.0010283804, %v5635_v38 }
 0x1d7   : > { %v1212_v12 = vadd.f32 %v1209_v16, %v1206_v5  ;;  %v1210_v54 = vadd.f32 %v1207_v62, %v1204_v49  ;;  %5618 = vst [vmem:[#allocation8_spill] sm:$0xff] %v4317_v24  ;;  %v1252_v51 = vmul.f32 0.0010283804, %v5633_v47  ;;  %v5634_v5 = vld [vmem:[#allocation36_spill] sm:$0xff] }
 0x1d8   : > { %1512 = vrot.lane.b32.xlu2 %v5614_v25, %s3052_s4  ;;  %1510 = vrot.lane.b32.xlu1 %v5615_v39, %s3052_s4  ;;  %v1226_v33 = vadd.f32 %v1220_v2, %v1211_v18  ;;  %v4368_v16 = vmul.f32 0.0010283804, %v5634_v5  ;;  %v1255_v25 = vmul.f32 0.0010283804, %v3868_v60  ;;  %v4386_v39 = vmul.f32 0.0010283804, %v3872_v61 }
 0x1d9   : > { %1508 = vrot.lane.b32.xlu0 %v5616_v31, %s3052_s4  ;;  %v1227_v34 = vadd.f32 %v1221_v15, %v1212_v12  ;;  %v1225_v7 = vadd.f32 %v1219_v63, %v1210_v54  ;;  %v4389_v12 = vmul.f32 0.0010283804, %v3878_v13  ;;  %v4395_v15 = vld [vmem:[%s3301_s8 + $0x10] sm:$0xff]  ;;  %v4402_v60 = vld [vmem:[%s3301_s8 + $0x8] sm:$0xff]  ;;  %v4411_v13 = vld [vmem:[%s3301_s8] sm:$0xff] }
 0x1da   : > { %v4309_v14 = vpop.permute.xlu2 %1350  ;;  %v4311_v27 = vpop.permute.xlu1 %1306  ;;  %v1241_v37 = vadd.f32 %v1235_v23, %v1226_v33  ;;  %5636 = vst [vmem:[#allocation7_spill] sm:$0xff] %v4395_v15  ;;  %v4399_v62 = vmul.f32 %v4395_v15, %v4395_v15  ;;  %v4406_v61 = vmul.f32 %v4402_v60, %v4402_v60  ;;  %v4415_v31 = vmul.f32 %v4411_v13, %v4411_v13  ;;  %v4442_v63 = vld [vmem:[%s3301_s8 + $0x20] sm:$0xff] }
 0x1db   : > { %v4313_v55 = vpop.permute.xlu0 %1304  ;;  %v1242_v56 = vadd.f32 %v1236_v44, %v1227_v34  ;;  %v1240_v36 = vadd.f32 %v1234_v21, %v1225_v7  ;;  %5637 = vst [vmem:[#allocation16_spill] sm:$0xff] %v4402_v60 }
 0x1dc   : > { %v4319_v9 = vmul.f32 %v1241_v37, %v1241_v37  ;;  %v4322_v45 = vmul.f32 %v1241_v37, %v5617_v19  ;;  %5638 = vst [vmem:[#allocation17_spill] sm:$0xff] %v4411_v13  ;;  %v4422_v8 = vmul.f32 0.0075987587, %v4399_v62  ;;  %v4425_v34 = vmul.f32 0.0075987587, %v4406_v61  ;;  %v4435_v37 = vld [vmem:[%s3301_s8 + $0x28] sm:$0xff] }
 0x1dd   : > { %v4328_v22 = vmul.f32 %v1242_v56, %v1242_v56  ;;  %v4331_v48 = vmul.f32 %v1242_v56, %v5621_v59  ;;  %v4351_v20 = vmul.f32 %v1240_v36, %v1240_v36  ;;  %v4354_v58 = vmul.f32 %v1240_v36, %v5629_v29  ;;  %5639 = vst [vmem:[#allocation18_spill] sm:$0xff] %v4435_v37  ;;  %v4451_v19 = vld [vmem:[%s3301_s8 + $0x18] sm:$0xff]  ;;  %s4603_s8 = smul.f32 %s3522_s9, %s3522_s9 }
 0x1de   : > { %5619 = vst [vmem:[#allocation5_spill] sm:$0xff] %v4319_v9  ;;  %v4335_v35 = vadd.f32 %v4319_v9, %v4317_v24  ;;  %v4428_v44 = vmul.f32 0.0075987587, %v4415_v31  ;;  %v4439_v54 = vmul.f32 %v4435_v37, %v4435_v37  ;;  %v4446_v56 = vmul.f32 %v4442_v63, %v4442_v63 }
 0x1df   : > { %5620 = vst [vmem:[#allocation9_spill] sm:$0xff] %v4322_v45  ;;  %v4343_v40 = vadd.f32 %v4328_v22, %v4326_v1  ;;  %v4364_v4 = vadd.f32 %v4351_v20, %v4349_v10  ;;  %v4455_v7 = vmul.f32 %v4451_v19, %v4451_v19  ;;  %v4481_v38 = vmul.f32 0.036000773, %v4399_v62  ;;  %s1567_s11 = smul.f32 0.0075987587, %s4603_s8 }
 0x1e0   : > { %5622 = vst [vmem:[#allocation11_spill] sm:$0xff] %v4328_v22  ;;  %1518 = vrot.lane.b32.xlu2 %v5625_v17, %s3052_s4  ;;  %1516 = vrot.lane.b32.xlu1 %v5626_v41, %s3052_s4  ;;  %v4462_v17 = vmul.f32 0.0075987587, %v4439_v54  ;;  %v4465_v41 = vmul.f32 0.0075987587, %v4446_v56  ;;  %v1288_v45 = vadd.f32 %v4109_v42, %v1252_v51 }
 0x1e1   : > { %5623 = vst [vmem:[#allocation13_spill] sm:$0xff] %v4331_v48  ;;  %1514 = vrot.lane.b32.xlu0 %v5628_v26, %s3052_s4  ;;  %v4468_v26 = vmul.f32 0.0075987587, %v4455_v7  ;;  %v4488_v48 = vmul.f32 0.036000773, %v4415_v31 }
 0x1e2   : > { %5624 = vst [vmem:[#allocation6_spill] sm:$0xff] %v4335_v35  ;;  %v4356_v50 = vpop.permute.xlu2 %1380  ;;  %v4358_v46 = vpop.permute.xlu1 %1312  ;;  %v1324_v35 = vadd.f32 %v4206_v57, %v1288_v45  ;;  %v4499_v42 = vmul.f32 0.036000773, %v4439_v54  ;;  %v4507_v57 = vmul.f32 0.036000773, %v4455_v7 }
 0x1e3   : > { %5627 = vst [vmem:[#allocation12_spill] sm:$0xff] %v4343_v40  ;;  %v4360_v53 = vpop.permute.xlu0 %1310  ;;  %v4560_v60 = vmul.f32 0.21300554, %v4406_v61  ;;  %s1562_s13 = smul.f32 0.0010283804, %s4603_s8 }
 0x1e4   : > { %5630 = vst [vmem:[#allocation10_spill] sm:$0xff] %v4351_v20  ;;  %v1291_v20 = vadd.f32 %v4170_v43, %v1255_v25  ;;  %s1584_s14 = smul.f32 0.036000773, %s4603_s8 }
 0x1e5   : > { %5631 = vst [vmem:[#allocation14_spill] sm:$0xff] %v4354_v58  ;;  %v4484_v58 = vmul.f32 0.036000773, %v4406_v61  ;;  %s1601_s15 = smul.f32 0.1093607, %s4603_s8 }
 0x1e6   : > { %5632 = vst [vmem:[#allocation15_spill] sm:$0xff] %v4364_v4  ;;  %v1360_v4 = vadd.f32 %v4276_v3, %v1324_v35  ;;  %v1327_v3 = vadd.f32 %v4240_v11, %v1291_v20  ;;  %v4525_v11 = vmul.f32 0.1093607, %v4415_v31  ;;  %s1630_s16 = smul.f32 0.21300554, %s4603_s8 }
 0x1e7   : > { %5640 = vst [vmem:[#allocation19_spill] sm:$0xff] %v4442_v63  ;;  %s1659_s19 = smul.f32 0.26601174, %s4603_s8  ;;  %s212_s8 = scalar_lea.vmem %s5425_s3, %s5699_s18 }
 0x1e8   : > { %1542 = vrot.lane.b32.xlu2 %v1252_v51, %s3053_s5  ;;  %1540 = vrot.lane.b32.xlu1 %v4368_v16, %s3053_s5  ;;  %5641 = vst [vmem:[#allocation20_spill] sm:$0xff] %v4451_v19  ;;  %v4502_v51 = vmul.f32 0.036000773, %v4446_v56  ;;  %v1396_v19 = vadd.f32 %v4356_v50, %v1360_v4  ;;  %v1363_v50 = vadd.f32 %v4309_v14, %v1327_v3 }
 0x1e9   : > { %1538 = vrot.lane.b32.xlu0 %v4371_v52, %s3053_s5  ;;  %5642 = vst [vmem:[#allocation21_spill] sm:$0xff] %v4465_v41 }
 0x1ea   : > { %v4378_v18 = vpop.permute.xlu2 %1386  ;;  %v4380_v2 = vpop.permute.xlu1 %1342  ;;  %5643 = vst [vmem:[#allocation22_spill] sm:$0xff] %v4468_v26 }
 0x1eb   : > { %v4382_v6 = vpop.permute.xlu0 %1340  ;;  %v1399_v37 = vadd.f32 %v4378_v18, %v1363_v50  ;;  %v4534_v18 = vmul.f32 0.1093607, %v4439_v54 }
 0x1f0   : > { %1548 = vrot.lane.b32.xlu2 %v1255_v25, %s3053_s5  ;;  %1546 = vrot.lane.b32.xlu1 %v4386_v39, %s3053_s5 }
 0x1f1   : > { %1544 = vrot.lane.b32.xlu0 %v4389_v12, %s3053_s5 }
 0x1f2   : > { %v1417_v33 = vpop.permute.xlu2 %1416  ;;  %v4417_v23 = vpop.permute.xlu1 %1348 }
 0x1f3   : > { %v4419_v49 = vpop.permute.xlu0 %1346  ;;  %v1432_v45 = vadd.f32 %v1417_v33, %v1396_v19  ;;  %v4518_v33 = vmul.f32 0.1093607, %v4399_v62  ;;  %v4521_v19 = vmul.f32 0.1093607, %v4406_v61 }
 0x1f8   : > { %1783 = vrot.lane.b32.xlu2 %v4422_v8, %s3044_s23  ;;  %1781 = vrot.lane.b32.xlu1 %v4425_v34, %s3044_s23 }
 0x1f9   : > { %1779 = vrot.lane.b32.xlu0 %v4428_v44, %s3044_s23 }
 0x1fa   : > { %v1423_v21 = vpop.permute.xlu2 %1422  ;;  %v4457_v59 = vpop.permute.xlu1 %1378 }
 0x1fb   : > { %v4459_v36 = vpop.permute.xlu0 %1376  ;;  %v1435_v20 = vadd.f32 %v1423_v21, %v1399_v37  ;;  %v4540_v37 = vmul.f32 0.1093607, %v4455_v7  ;;  %v1287_v21 = vadd.f32 %v4242_v28, %v4368_v16 }
 0x1fd   : > { %v1323_v50 = vadd.f32 %v4311_v27, %v1287_v21  ;;  %v4564_v21 = vmul.f32 0.21300554, %v4415_v31 }
 0x1ff   : > { %v1359_v28 = vadd.f32 %v4380_v2, %v1323_v50  ;;  %v1290_v2 = vadd.f32 %v4278_v30, %v4386_v39 }
 0x200   : > { %1789 = vrot.lane.b32.xlu2 %v4462_v17, %s3044_s23  ;;  %1787 = vrot.lane.b32.xlu1 %v4465_v41, %s3044_s23 }
 0x201   : > { %1785 = vrot.lane.b32.xlu0 %v4468_v26, %s3044_s23  ;;  %v1395_v27 = vadd.f32 %v4457_v59, %v1359_v28  ;;  %v1326_v59 = vadd.f32 %v4358_v46, %v1290_v2  ;;  %v1879_v46 = vmul.f32 0.21300554, %v4446_v56 }
 0x202   : > { %v1441_v29 = vpop.permute.xlu2 %1440  ;;  %v4476_v47 = vpop.permute.xlu1 %1384 }
 0x203   : > { %v4478_v5 = vpop.permute.xlu0 %1382  ;;  %v1456_v35 = vadd.f32 %v1441_v29, %v1432_v45 }
 0x208   : > { %1819 = vrot.lane.b32.xlu2 %v4481_v38, %s3045_s24  ;;  %1817 = vrot.lane.b32.xlu1 %v4484_v58, %s3045_s24 }
 0x209   : > { %1815 = vrot.lane.b32.xlu0 %v4488_v48, %s3045_s24 }
 0x20a   : > { %v1447_v40 = vpop.permute.xlu2 %1446  ;;  %v1415_v9 = vpop.permute.xlu1 %1414 }
 0x20b   : > { %v1413_v22 = vpop.permute.xlu0 %1412  ;;  %v1459_v14 = vadd.f32 %v1447_v40, %v1435_v20  ;;  %v1286_v40 = vadd.f32 %v4250_v0, %v4371_v52  ;;  %v4557_v52 = vmul.f32 0.21300554, %v4399_v62 }
 0x20d   : > { %v1322_v20 = vadd.f32 %v4313_v55, %v1286_v40 }
 0x20f   : > { %v1358_v0 = vadd.f32 %v4382_v6, %v1322_v20  ;;  %v1289_v6 = vadd.f32 %v4280_v32, %v4389_v12  ;;  %v1362_v32 = vadd.f32 %v4417_v23, %v1326_v59  ;;  %v1913_v59 = vmul.f32 0.26601174, %v4399_v62 }
 0x210   : > { %1825 = vrot.lane.b32.xlu2 %v4499_v42, %s3045_s24  ;;  %1823 = vrot.lane.b32.xlu1 %v4502_v51, %s3045_s24 }
 0x211   : > { %1821 = vrot.lane.b32.xlu0 %v4507_v57, %s3045_s24  ;;  %v1394_v55 = vadd.f32 %v4459_v36, %v1358_v0  ;;  %v1325_v36 = vadd.f32 %v4360_v53, %v1289_v6  ;;  %v1880_v0 = vmul.f32 0.21300554, %v4439_v54 }
 0x212   : > { %v1465_v63 = vpop.permute.xlu2 %1464  ;;  %v1421_v43 = vpop.permute.xlu1 %1420 }
 0x213   : > { %v1480_v4 = vadd.f32 %v1465_v63, %v1456_v35  ;;  %v1419_v25 = vpop.permute.xlu0 %1418  ;;  %v4537_v35 = vmul.f32 0.1093607, %v4446_v56  ;;  %v1430_v40 = vadd.f32 %v1413_v22, %v1394_v55 }
 0x218   : > { %1855 = vrot.lane.b32.xlu2 %v4518_v33, %s3046_s25  ;;  %1853 = vrot.lane.b32.xlu1 %v4521_v19, %s3046_s25 }
 0x219   : > { %1851 = vrot.lane.b32.xlu0 %v4525_v11, %s3046_s25 }
 0x21a   : > { %v1471_v63 = vpop.permute.xlu2 %1470  ;;  %v1439_v29 = vpop.permute.xlu1 %1438 }
 0x21b   : > { %v1483_v45 = vadd.f32 %v1471_v63, %v1459_v14  ;;  %v1437_v3 = vpop.permute.xlu0 %1436 }
 0x21c   : > { %v1454_v30 = vadd.f32 %v1437_v3, %v1430_v40 }
 0x220   : > { %1861 = vrot.lane.b32.xlu2 %v4534_v18, %s3046_s25  ;;  %1859 = vrot.lane.b32.xlu1 %v4537_v35, %s3046_s25 }
 0x221   : > { %1857 = vrot.lane.b32.xlu0 %v4540_v37, %s3046_s25 }
 0x222   : > { %v1489_v14 = vpop.permute.xlu2 %1488  ;;  %v1445_v63 = vpop.permute.xlu1 %1444 }
 0x223   : > { %v1504_v16 = vadd.f32 %v1489_v14, %v1480_v4  ;;  %v1443_v13 = vpop.permute.xlu0 %1442  ;;  %v1431_v4 = vadd.f32 %v1415_v9, %v1395_v27  ;;  %v1361_v14 = vadd.f32 %v4419_v49, %v1325_v36  ;;  %v1878_v27 = vmul.f32 0.21300554, %v4455_v7 }
 0x225   : > { %v1455_v50 = vadd.f32 %v1439_v29, %v1431_v4  ;;  %v1398_v29 = vadd.f32 %v4476_v47, %v1362_v32  ;;  %v1397_v53 = vadd.f32 %v4478_v5, %v1361_v14  ;;  %v1912_v5 = vmul.f32 0.26601174, %v4406_v61 }
 0x227   : > { %v1434_v3 = vadd.f32 %v1421_v43, %v1398_v29  ;;  %v1433_v55 = vadd.f32 %v1419_v25, %v1397_v53  ;;  %v1911_v43 = vmul.f32 0.26601174, %v4415_v31 }
 0x228   : > { %1891 = vrot.lane.b32.xlu2 %v4557_v52, %s3047_s26  ;;  %1889 = vrot.lane.b32.xlu1 %v4560_v60, %s3047_s26 }
 0x229   : > { %1887 = vrot.lane.b32.xlu0 %v4564_v21, %s3047_s26  ;;  %v1458_v23 = vadd.f32 %v1445_v63, %v1434_v3  ;;  %v1457_v49 = vadd.f32 %v1443_v13, %v1433_v55 }
 0x22a   : > { %v1495_v9 = vpop.permute.xlu2 %1494  ;;  %v1463_v39 = vpop.permute.xlu1 %1462 }
 0x22b   : > { %v1507_v22 = vadd.f32 %v1495_v9, %v1483_v45  ;;  %v1479_v12 = vadd.f32 %v1463_v39, %v1455_v50  ;;  %v1461_v20 = vpop.permute.xlu0 %1460  ;;  %v1915_v9 = vmul.f32 0.26601174, %v4446_v56  ;;  %v1914_v39 = vmul.f32 0.26601174, %v4455_v7 }
 0x22c   : > { %v1478_v28 = vadd.f32 %v1461_v20, %v1454_v30  ;;  %v1916_v30 = vmul.f32 0.26601174, %v4439_v54 }
 0x230   : > { %1897 = vrot.lane.b32.xlu2 %v1880_v0, %s3047_s26  ;;  %1895 = vrot.lane.b32.xlu1 %v1879_v46, %s3047_s26 }
 0x231   : > { %1893 = vrot.lane.b32.xlu0 %v1878_v27, %s3047_s26 }
 0x232   : > { %v1513_v45 = vpop.permute.xlu2 %1512  ;;  %v1469_v2 = vpop.permute.xlu1 %1468 }
 0x233   : > { %v1528_v4 = vadd.f32 %v1513_v45, %v1504_v16  ;;  %v1482_v6 = vadd.f32 %v1469_v2, %v1458_v23  ;;  %v1467_v40 = vpop.permute.xlu0 %1466  ;;  %v4615_v45 = vstv %s1567_s11 }
 0x234   : > { %v1481_v47 = vadd.f32 %v1467_v40, %v1457_v49 }
 0x238   : > { %1927 = vrot.lane.b32.xlu2 %v1913_v59, %s3048_s27  ;;  %1925 = vrot.lane.b32.xlu1 %v1912_v5, %s3048_s27  ;;  %v4643_v59 = vstv %s1659_s19 }
 0x239   : > { %1923 = vrot.lane.b32.xlu0 %v1911_v43, %s3048_s27 }
 0x23a   : > { %v1519_v25 = vpop.permute.xlu2 %1518  ;;  %v1487_v13 = vpop.permute.xlu1 %1486 }
 0x23b   : > { %v1531_v63 = vadd.f32 %v1519_v25, %v1507_v22  ;;  %v1503_v16 = vadd.f32 %v1487_v13, %v1479_v12  ;;  %v1485_v50 = vpop.permute.xlu0 %1484  ;;  %v4647_v25 = vmul.f32 0.0010283804, %v4439_v54 }
 0x23c   : > { %v1502_v36 = vadd.f32 %v1485_v50, %v1478_v28 }
 0x23d   : > { %5645 = vst [vmem:[#allocation24_spill] sm:$0xff] %v4647_v25 }
 0x240   : > { %1933 = vrot.lane.b32.xlu2 %v1916_v30, %s3048_s27  ;;  %1931 = vrot.lane.b32.xlu1 %v1915_v9, %s3048_s27 }
 0x241   : > { %1929 = vrot.lane.b32.xlu0 %v1914_v39, %s3048_s27 }
 0x242   : > { %v1543_v32 = vpop.permute.xlu2 %1542  ;;  %v1493_v20 = vpop.permute.xlu1 %1492 }
 0x243   : > { %v1558_v14 = vadd.f32 %v1543_v32, %v1528_v4  ;;  %v1506_v22 = vadd.f32 %v1493_v20, %v1482_v6  ;;  %v1491_v29 = vpop.permute.xlu0 %1490  ;;  %v4628_v4 = vstv %s1584_s14 }
 0x244   : > { %v1505_v12 = vadd.f32 %v1491_v29, %v1481_v47 }
 0x245   : > { %v1587_v43 = vmul.f32 %v4628_v4, %v1558_v14  ;;  %v4661_v50 = vmul.f32 %v4643_v59, %v1558_v14 }
 0x248   : > { %1951 = vrot.lane.b32.xlu2 %v4557_v52, %s3049_s28  ;;  %1949 = vrot.lane.b32.xlu1 %v4560_v60, %s3049_s28  ;;  %v4619_v52 = vmul.f32 0.0010283804, %v4399_v62  ;;  %v1570_v60 = vmul.f32 %v4615_v45, %v1558_v14 }
 0x249   : > { %1947 = vrot.lane.b32.xlu0 %v4564_v21, %s3049_s28 }
 0x24a   : > { %v1549_v28 = vpop.permute.xlu2 %1548  ;;  %v1511_v53 = vpop.permute.xlu1 %1510  ;;  %5644 = vst [vmem:[#allocation23_spill] sm:$0xff] %v4619_v52  ;;  %v1576_v5 = vrot.slane %v1570_v60, 1 }
 0x24b   : > { %v4612_v3 = vadd.f32 %v1549_v28, %v1531_v63  ;;  %v1527_v55 = vadd.f32 %v1511_v53, %v1503_v16  ;;  %v1509_v23 = vpop.permute.xlu0 %1508 }
 0x24c   : > { %v1526_v49 = vadd.f32 %v1509_v23, %v1502_v36  ;;  %v1593_v36 = vrot.slane %v1587_v43, 2 }
 0x250   : > { %1957 = vrot.lane.b32.xlu2 %v1880_v0, %s3049_s28  ;;  %1955 = vrot.lane.b32.xlu1 %v1879_v46, %s3049_s28  ;;  %v4637_v0 = vstv %s1562_s13  ;;  %v4639_v46 = vstv %s1601_s15 }
 0x251   : > { %1953 = vrot.lane.b32.xlu0 %v1878_v27, %s3049_s28  ;;  %v4641_v27 = vstv %s1630_s16  ;;  %v1565_v13 = vmul.f32 %v4637_v0, %v1558_v14  ;;  %v4651_v63 = vmul.f32 %v4639_v46, %v1558_v14  ;;  %v4667_v30 = vmul.f32 %v4639_v46, %v4612_v3 }
 0x252   : > { %v1784_v21 = vpop.permute.xlu2 %1783  ;;  %v1517_v2 = vpop.permute.xlu1 %1516  ;;  %v4654_v16 = vmul.f32 %v4641_v27, %v1558_v14 }
 0x253   : > { %v4631_v6 = vadd.f32 %v1784_v21, %v4619_v52  ;;  %v4633_v62 = vadd.f32 %v1517_v2, %v1506_v22  ;;  %v1515_v40 = vpop.permute.xlu0 %1514  ;;  %v1582_v54 = vadd.f32 %v1576_v5, %v1565_v13 }
 0x254   : > { %v4635_v47 = vadd.f32 %v1515_v40, %v1505_v12 }
 0x255   : > { %v4692_v60 = vadd.f32 %v1593_v36, %v1582_v54 }
 0x258   : > { %1975 = vrot.lane.b32.xlu2 %v4518_v33, %s3050_s29  ;;  %1973 = vrot.lane.b32.xlu1 %v4521_v19, %s3050_s29  ;;  %v4671_v33 = vmul.f32 %v4641_v27, %v4612_v3  ;;  %v4675_v19 = vmul.f32 %v4643_v59, %v4612_v3 }
 0x259   : > { %1971 = vrot.lane.b32.xlu0 %v4525_v11, %s3050_s29 }
 0x25a   : > { %v1790_v9 = vpop.permute.xlu2 %1789  ;;  %v1541_v39 = vpop.permute.xlu1 %1540 }
 0x25b   : > { %v4678_v32 = vadd.f32 %v1790_v9, %v4647_v25  ;;  %v4680_v11 = vadd.f32 %v1541_v39, %v1527_v55  ;;  %v1539_v20 = vpop.permute.xlu0 %1538 }
 0x25c   : > { %v1556_v12 = vadd.f32 %v1539_v20, %v1526_v49  ;;  %v1651_v49 = vrot.slane %v4671_v33, 4 }
 0x25d   : > { %v1604_v53 = vmul.f32 %v4639_v46, %v4680_v11  ;;  %v1633_v23 = vmul.f32 %v4641_v27, %v4680_v11  ;;  %v1662_v55 = vmul.f32 %v4643_v59, %v4680_v11 }
 0x25e   : > { %v1569_v40 = vmul.f32 %v4615_v45, %v1556_v12  ;;  %v1564_v13 = vmul.f32 %v4637_v0, %v1556_v12  ;;  %v1586_v54 = vmul.f32 %v4628_v4, %v1556_v12  ;;  %v1603_v36 = vmul.f32 %v4639_v46, %v1556_v12 }
 0x25f   : > { %v1616_v9 = vrot.slane %v1604_v53, 3  ;;  %v1645_v39 = vrot.slane %v1633_v23, 4  ;;  %v1674_v20 = vrot.slane %v1662_v55, 5  ;;  %v1632_v21 = vmul.f32 %v4641_v27, %v1556_v12 }
 0x260   : > { %v1575_v28 = vrot.slane %v1569_v40, 1  ;;  %1981 = vrot.lane.b32.xlu2 %v4534_v18, %s3050_s29  ;;  %1979 = vrot.lane.b32.xlu1 %v4537_v35, %s3050_s29  ;;  %v1661_v22 = vmul.f32 %v4643_v59, %v1556_v12  ;;  %v1710_v55 = vrot.slane %v4667_v30, 7  ;;  %v1689_v40 = vrot.slane %v1633_v23, 6 }
 0x261   : > { %1977 = vrot.lane.b32.xlu0 %v4540_v37, %s3050_s29  ;;  %v1704_v29 = vrot.slane %v1604_v53, 7  ;;  %v1592_v5 = vrot.slane %v1586_v54, 2  ;;  %v1615_v35 = vrot.slane %v1603_v36, 3  ;;  %v1644_v2 = vrot.slane %v1632_v21, 4 }
 0x262   : > { %v1581_v14 = vadd.f32 %v1575_v28, %v1564_v13  ;;  %v1820_v18 = vpop.permute.xlu2 %1819  ;;  %v1547_v43 = vpop.permute.xlu1 %1546  ;;  %v1673_v15 = vrot.slane %v1661_v22, 5  ;;  %v1688_v52 = vrot.slane %v1632_v21, 6  ;;  %v1703_v26 = vrot.slane %v1603_v36, 7 }
 0x263   : > { %v1545_v25 = vpop.permute.xlu0 %1544  ;;  %v4713_v24 = vadd.f32 %v1820_v18, %v4631_v6  ;;  %v1560_v12 = vadd.f32 %v1547_v43, %v4633_v62  ;;  %v1617_v41 = vsel %vm595_vm0, %v1615_v35, %v1616_v9  ;;  %v1646_v53 = vsel %vm625_vm1, %v1644_v2, %v1645_v39 }
 0x264   : > { %v1598_v37 = vadd.f32 %v1592_v5, %v1581_v14  ;;  %v1675_v28 = vsel %vm655_vm2, %v1673_v15, %v1674_v20  ;;  %v1690_v23 = vsel %vm671_vm3, %v1688_v52, %v1689_v40  ;;  %v4721_v13 = vsel %vm687_vm4, %v1703_v26, %v1704_v29 }
 0x265   : > { %v1571_v22 = vmul.f32 %v4615_v45, %v1560_v12  ;;  %v4725_v21 = vmul.f32 0.0010283804, %v4406_v61  ;;  %v1588_v62 = vmul.f32 %v4628_v4, %v1560_v12  ;;  %v1607_v14 = vmul.f32 %v4639_v46, %v1560_v12 }
 0x266   : > { %v1627_v6 = vadd.f32 %v1617_v41, %v1598_v37  ;;  %v1636_v5 = vmul.f32 %v4641_v27, %v1560_v12  ;;  %v1566_v2 = vmul.f32 %v4637_v0, %v1560_v12  ;;  %v1665_v52 = vmul.f32 %v4643_v59, %v1560_v12 }
 0x267   : > { %v1577_v15 = vrot.slane %v1571_v22, 1  ;;  %v4733_v26 = vadd.f32 %v1545_v25, %v4635_v47  ;;  %v1594_v41 = vrot.slane %v1588_v62, 2  ;;  %v1621_v29 = vrot.slane %v1607_v14, 3 }
 0x268   : > { %1999 = vrot.lane.b32.xlu2 %v4481_v38, %s3051_s30  ;;  %1997 = vrot.lane.b32.xlu1 %v4484_v58, %s3051_s30  ;;  %v1656_v61 = vadd.f32 %v1646_v53, %v1627_v6  ;;  %v1650_v43 = vrot.slane %v1636_v5, 4  ;;  %v1679_v39 = vrot.slane %v1665_v52, 5  ;;  %v1694_v20 = vrot.slane %v1636_v5, 6 }
 0x269   : > { %1995 = vrot.lane.b32.xlu0 %v4488_v48, %s3051_s30  ;;  %v1583_v9 = vadd.f32 %v1577_v15, %v1566_v2  ;;  %v1709_v54 = vrot.slane %v1607_v14, 7  ;;  %v5646_v40 = vrot.slane %v4667_v30, 3  ;;  %v1606_v18 = vmul.f32 %v4639_v46, %v4733_v26 }
 0x26a   : > { %v1826_v36 = vpop.permute.xlu2 %1825  ;;  %v1782_v47 = vpop.permute.xlu1 %1781  ;;  %v1685_v25 = vadd.f32 %v1675_v28, %v1656_v61  ;;  %v1652_v58 = vsel %vm625_vm1, %v1650_v43, %v1651_v49  ;;  %v5647_v48 = vrot.slane %v4675_v19, 5  ;;  %v5648_v53 = vrot.slane %v4671_v33, 6 }
 0x26b   : > { %v1623_v38 = vsel %vm595_vm0, %v1621_v29, %v5646_v40  ;;  %v1780_v35 = vpop.permute.xlu0 %1779  ;;  %v1600_v12 = vadd.f32 %v1594_v41, %v1583_v9  ;;  %v1711_v28 = vsel %vm687_vm4, %v1709_v54, %v1710_v55  ;;  %v1619_v6 = vrot.slane %v1606_v18, 3 }
 0x26c   : > { %v1681_v37 = vsel %vm655_vm2, %v1679_v39, %v5647_v48  ;;  %v1696_v22 = vsel %vm671_vm3, %v1694_v20, %v5648_v53  ;;  %v1700_v30 = vadd.f32 %v1690_v23, %v1685_v25  ;;  %v1635_v49 = vmul.f32 %v4641_v27, %v4733_v26 }
 0x26d   : > { %v1664_v46 = vmul.f32 %v4643_v59, %v4733_v26  ;;  %v1629_v62 = vadd.f32 %v1623_v38, %v1600_v12  ;;  %v1707_v14 = vrot.slane %v1606_v18, 7  ;;  %v4759_v19 = vmul.f32 0.0010283804, %v4415_v31 }
 0x26e   : > { %v4762_v5 = vmul.f32 0.0010283804, %v4446_v56  ;;  %v5649_v33 = vrot.slane %v4651_v63, 3  ;;  %v1648_v23 = vrot.slane %v1635_v49, 4  ;;  %v1692_v15 = vrot.slane %v1635_v49, 6 }
 0x26f   : > { %v1677_v2 = vrot.slane %v1664_v46, 5  ;;  %v1658_v52 = vadd.f32 %v1652_v58, %v1629_v62  ;;  %v5650_v59 = vrot.slane %v4651_v63, 7  ;;  %v4776_v31 = vmul.f32 0.0010283804, %v4455_v7 }
 0x270   : > { %v1620_v55 = vsel %vm595_vm0, %v5649_v33, %v1619_v6  ;;  %2005 = vrot.lane.b32.xlu2 %v4499_v42, %s3051_s30  ;;  %2003 = vrot.lane.b32.xlu1 %v4502_v51, %s3051_s30  ;;  %v5651_v56 = vrot.slane %v4654_v16, 4  ;;  %v5652_v29 = vrot.slane %v4661_v50, 5  ;;  %v5653_v63 = vrot.slane %v4654_v16, 6 }
 0x271   : > { %v1628_v27 = vadd.f32 %v1620_v55, %v4692_v60  ;;  %v1708_v61 = vsel %vm687_vm4, %v5650_v59, %v1707_v14  ;;  %2001 = vrot.lane.b32.xlu0 %v4507_v57, %s3051_s30  ;;  %v1687_v42 = vadd.f32 %v1681_v37, %v1658_v52  ;;  %v1838_v7 = vadd.f32 %v1826_v36, %v4678_v32  ;;  %v5655_v59 = vld [vmem:[#allocation21_spill] sm:$0xff] }
 0x272   : > { %v1649_v41 = vsel %vm625_vm1, %v5651_v56, %v1648_v23  ;;  %v1678_v60 = vsel %vm655_vm2, %v5652_v29, %v1677_v2  ;;  %v1693_v43 = vsel %vm671_vm3, %v5653_v63, %v1692_v15  ;;  %v1798_v9 = vadd.f32 %v1782_v47, %v4725_v21  ;;  %v1856_v39 = vpop.permute.xlu2 %1855  ;;  %v1788_v20 = vpop.permute.xlu1 %1787 }
 0x273   : > { %v1657_v51 = vadd.f32 %v1649_v41, %v1628_v27  ;;  %v1724_v50 = vmul.f32 %v4615_v45, %v4680_v11  ;;  %v1797_v54 = vadd.f32 %v1780_v35, %v4759_v19  ;;  %v1871_v16 = vadd.f32 %v1856_v39, %v4713_v24  ;;  %v1786_v40 = vpop.permute.xlu0 %1785  ;;  %v5657_v41 = vld [vmem:[#allocation22_spill] sm:$0xff] }
 0x274   : > { %v1801_v25 = vadd.f32 %v1788_v20, %v4762_v5  ;;  %v1702_v38 = vadd.f32 %v1696_v22, %v1687_v42  ;;  %v1800_v58 = vadd.f32 %v1786_v40, %v4776_v31  ;;  %v1726_v32 = vmul.f32 %v4615_v45, %v4612_v3  ;;  %v5660_v40 = vld [vmem:[#allocation7_spill] sm:$0xff] }
 0x275   : > { %v1686_v57 = vadd.f32 %v1678_v60, %v1657_v51  ;;  %v1718_v36 = vmul.f32 %v4628_v4, %v4680_v11  ;;  %v1739_v47 = vmul.f32 %v4637_v0, %v4680_v11  ;;  %v1715_v18 = vadd.f32 %v4721_v13, %v1700_v30 }
 0x276   : > { %v1741_v24 = vmul.f32 %v4637_v0, %v4612_v3  ;;  %v1725_v12 = vmul.f32 %v4615_v45, %v4733_v26  ;;  %v1717_v48 = vadd.f32 %v1711_v28, %v1702_v38  ;;  %v1720_v37 = vmul.f32 %v4628_v4, %v4612_v3 }
 0x277   : > { %v1701_v35 = vadd.f32 %v1693_v43, %v1686_v57  ;;  %v1730_v53 = vrot.slane %v1724_v50, 1  ;;  %v1721_v22 = vadd.f32 %v1718_v36, %v1715_v18  ;;  %v1719_v49 = vmul.f32 %v4628_v4, %v4733_v26  ;;  %v5661_v57 = vld [vmem:[#allocation16_spill] sm:$0xff] }
 0x278   : > { %v1740_v11 = vmul.f32 %v4637_v0, %v4733_v26  ;;  %2023 = vrot.lane.b32.xlu2 %v4422_v8, %s3052_s4  ;;  %2021 = vrot.lane.b32.xlu1 %v4425_v34, %s3052_s4  ;;  %v1732_v45 = vrot.slane %v1726_v32, 1  ;;  %v1745_v13 = vrot.slane %v1739_v47, 2  ;;  %v1723_v3 = vadd.f32 %v1720_v37, %v1717_v48  ;;  %v5662_v32 = vld [vmem:[#allocation17_spill] sm:$0xff] }
 0x279   : > { %v1716_v6 = vadd.f32 %v1708_v61, %v1701_v35  ;;  %2019 = vrot.lane.b32.xlu0 %v4428_v44, %s3052_s4  ;;  %v1736_v28 = vadd.f32 %v1730_v53, %v1721_v22  ;;  %v1747_v30 = vrot.slane %v1741_v24, 2  ;;  %v1731_v62 = vrot.slane %v1725_v12, 1  ;;  %v3013_v53 = vld [vmem:[%s3093_s22 + $0x28] sm:$0xff] }
 0x27a   : > { %v1862_v4 = vpop.permute.xlu2 %1861  ;;  %v1818_v14 = vpop.permute.xlu1 %1817  ;;  %v1738_v55 = vadd.f32 %v1732_v45, %v1723_v3  ;;  %v1746_v23 = vrot.slane %v1740_v11, 2  ;;  %v5664_v22 = vld [vmem:[#allocation18_spill] sm:$0xff]  ;;  %v5665_v11 = vld [vmem:[#allocation19_spill] sm:$0xff]  ;;  %v5666_v3 = vld [vmem:[#allocation20_spill] sm:$0xff] }
 0x27b   : > { %v1722_v46 = vadd.f32 %v1719_v49, %v1716_v6  ;;  %v1874_v33 = vadd.f32 %v1862_v4, %v1838_v7  ;;  %v1834_v0 = vadd.f32 %v1818_v14, %v1798_v9  ;;  %v1816_v26 = vpop.permute.xlu0 %1815  ;;  %v4820_v8 = vadd.f32 %v1745_v13, %v1736_v28  ;;  %v5658_v7 = vld [vmem:[#allocation23_spill] sm:$0xff]  ;;  %v3014_v49 = vld [vmem:[%s3093_s22 + $0x20] sm:$0xff]  ;;  %v3015_v13 = vld [vmem:[%s3093_s22 + $0x18] sm:$0xff] }
 0x27c   : > { %v1833_v34 = vadd.f32 %v1816_v26, %v1797_v54  ;;  %v4822_v15 = vadd.f32 %v1747_v30, %v1738_v55  ;;  %v4877_v6 = vmul.f32 %v3013_v53, %v5664_v22  ;;  %v4881_v45 = vmul.f32 %v3014_v49, %v5665_v11 }
 0x27d   : > { %v1737_v2 = vadd.f32 %v1731_v62, %v1722_v46  ;;  %v4887_v28 = vmul.f32 %v3015_v13, %v5666_v3 }
 0x27e   : > { %v4893_v26 = vmul.f32 0.0075987587, %v4881_v45  ;;  %v4950_v49 = vmul.f32 0.1093607, %v4877_v6  ;;  %v4953_v11 = vmul.f32 0.1093607, %v4881_v45 }
 0x27f   : > { %v4826_v52 = vadd.f32 %v1746_v23, %v1737_v2  ;;  %v4896_v55 = vmul.f32 0.0075987587, %v4887_v28  ;;  %v4956_v13 = vmul.f32 0.1093607, %v4887_v28 }
 0x280   : > { %2029 = vrot.lane.b32.xlu2 %v4462_v17, %s3052_s4  ;;  %2027 = vrot.lane.b32.xlu1 %v5655_v59, %s3052_s4 }
 0x281   : > { %5654 = vst [vmem:[#allocation25_spill] sm:$0xff] %v4826_v52  ;;  %2025 = vrot.lane.b32.xlu0 %v5657_v41, %s3052_s4 }
 0x282   : > { %v1892_v29 = vpop.permute.xlu2 %1891  ;;  %v1824_v60 = vpop.permute.xlu1 %1823  ;;  %5668 = vst [vmem:[#allocation28_spill] sm:$0xff] %v4896_v55 }
 0x283   : > { %v1907_v63 = vadd.f32 %v1892_v29, %v1871_v16  ;;  %v1837_v43 = vadd.f32 %v1824_v60, %v1801_v25  ;;  %v1822_v42 = vpop.permute.xlu0 %1821  ;;  %v5659_v16 = vld [vmem:[#allocation24_spill] sm:$0xff]  ;;  %v3010_v25 = vld [vmem:[%s3093_s22 + $0x10] sm:$0xff] }
 0x284   : > { %v1836_v51 = vadd.f32 %v1822_v42, %v1800_v58  ;;  %v4850_v38 = vmul.f32 %v3010_v25, %v5660_v40  ;;  %v3012_v58 = vld [vmem:[%s3093_s22] sm:$0xff] }
 0x285   : > { %v4860_v36 = vmul.f32 %v3012_v58, %v5662_v32 }
 0x286   : > { %v4863_v48 = vmul.f32 0.0075987587, %v4850_v38  ;;  %v4905_v60 = vmul.f32 0.036000773, %v4850_v38  ;;  %v4935_v32 = vmul.f32 0.1093607, %v4850_v38 }
 0x288   : > { %2053 = vrot.lane.b32.xlu2 %v5658_v7, %s3053_s5  ;;  %2051 = vrot.lane.b32.xlu1 %v4725_v21, %s3053_s5  ;;  %v3011_v21 = vld [vmem:[%s3093_s22 + $0x8] sm:$0xff]  ;;  %s4999_s22 = smul.f32 %s4045_s17, %s4045_s17 }
 0x289   : > { %2049 = vrot.lane.b32.xlu0 %v4759_v19, %s3053_s5  ;;  %v4854_v19 = vmul.f32 %v3011_v21, %v5661_v57 }
 0x28a   : > { %v1898_v17 = vpop.permute.xlu2 %1897  ;;  %v1854_v9 = vpop.permute.xlu1 %1853  ;;  %s2141_s20 = smul.f32 0.21300554, %s4999_s22 }
 0x28b   : > { %v1910_v39 = vadd.f32 %v1898_v17, %v1874_v33  ;;  %v1870_v20 = vadd.f32 %v1854_v9, %v1834_v0  ;;  %v1852_v50 = vpop.permute.xlu0 %1851  ;;  %v4866_v37 = vmul.f32 0.0075987587, %v4854_v19  ;;  %v4890_v0 = vmul.f32 0.0075987587, %v4877_v6 }
 0x28c   : > { %v1869_v54 = vadd.f32 %v1852_v50, %v1833_v34  ;;  %v4923_v50 = vmul.f32 0.036000773, %v4881_v45 }
 0x28d   : > { %5663 = vst [vmem:[#allocation26_spill] sm:$0xff] %v4866_v37 }
 0x28e   : > { %5667 = vst [vmem:[#allocation27_spill] sm:$0xff] %v4890_v0 }
 0x290   : > { %2059 = vrot.lane.b32.xlu2 %v5659_v16, %s3053_s5  ;;  %2057 = vrot.lane.b32.xlu1 %v4762_v5, %s3053_s5 }
 0x291   : > { %2055 = vrot.lane.b32.xlu0 %v4776_v31, %s3053_s5  ;;  %v4869_v31 = vmul.f32 0.0075987587, %v4860_v36 }
 0x292   : > { %v1928_v47 = vpop.permute.xlu2 %1927  ;;  %v1860_v5 = vpop.permute.xlu1 %1859 }
 0x293   : > { %v1943_v18 = vadd.f32 %v1928_v47, %v1907_v63  ;;  %v1873_v24 = vadd.f32 %v1860_v5, %v1837_v43  ;;  %v1858_v35 = vpop.permute.xlu0 %1857  ;;  %v4908_v63 = vmul.f32 0.036000773, %v4854_v19  ;;  %v4911_v43 = vmul.f32 0.036000773, %v4860_v36 }
 0x294   : > { %v1872_v12 = vadd.f32 %v1858_v35, %v1836_v51  ;;  %v4938_v47 = vmul.f32 0.1093607, %v4854_v19  ;;  %v4941_v5 = vmul.f32 0.1093607, %v4860_v36 }
 0x298   : > { %2294 = vrot.lane.b32.xlu2 %v4863_v48, %s3044_s23  ;;  %2292 = vrot.lane.b32.xlu1 %v4866_v37, %s3044_s23 }
 0x299   : > { %2290 = vrot.lane.b32.xlu0 %v4869_v31, %s3044_s23 }
 0x29a   : > { %v1934_v30 = vpop.permute.xlu2 %1933  ;;  %v1890_v46 = vpop.permute.xlu1 %1889 }
 0x29b   : > { %v1946_v62 = vadd.f32 %v1934_v30, %v1910_v39  ;;  %v1906_v4 = vadd.f32 %v1890_v46, %v1870_v20  ;;  %v1888_v14 = vpop.permute.xlu0 %1887  ;;  %v4920_v20 = vmul.f32 0.036000773, %v4877_v6 }
 0x29c   : > { %v1905_v33 = vadd.f32 %v1888_v14, %v1869_v54  ;;  %v4926_v54 = vmul.f32 0.036000773, %v4887_v28 }
 0x2a0   : > { %2300 = vrot.lane.b32.xlu2 %v4890_v0, %s3044_s23  ;;  %2298 = vrot.lane.b32.xlu1 %v4893_v26, %s3044_s23 }
 0x2a1   : > { %2296 = vrot.lane.b32.xlu0 %v4896_v55, %s3044_s23  ;;  %s2078_s23 = smul.f32 0.0075987587, %s4999_s22 }
 0x2a2   : > { %v1952_v23 = vpop.permute.xlu2 %1951  ;;  %v1896_v34 = vpop.permute.xlu1 %1895 }
 0x2a3   : > { %v1967_v2 = vadd.f32 %v1952_v23, %v1943_v18  ;;  %v1909_v59 = vadd.f32 %v1896_v34, %v1873_v24  ;;  %v1894_v41 = vpop.permute.xlu0 %1893  ;;  %v4966_v23 = vmul.f32 0.21300554, %v4854_v19  ;;  %v2386_v34 = vmul.f32 0.21300554, %v4860_v36 }
 0x2a4   : > { %v1908_v29 = vadd.f32 %v1894_v41, %v1872_v12 }
 0x2a8   : > { %2330 = vrot.lane.b32.xlu2 %v4905_v60, %s3045_s24  ;;  %2328 = vrot.lane.b32.xlu1 %v4908_v63, %s3045_s24 }
 0x2a9   : > { %2326 = vrot.lane.b32.xlu0 %v4911_v43, %s3045_s24 }
 0x2aa   : > { %v1958_v42 = vpop.permute.xlu2 %1957  ;;  %v1926_v51 = vpop.permute.xlu1 %1925 }
 0x2ab   : > { %v1970_v7 = vadd.f32 %v1958_v42, %v1946_v62  ;;  %v1942_v17 = vadd.f32 %v1926_v51, %v1906_v4  ;;  %v1924_v9 = vpop.permute.xlu0 %1923 }
 0x2ac   : > { %v1941_v39 = vadd.f32 %v1924_v9, %v1905_v33  ;;  %v2388_v33 = vmul.f32 0.21300554, %v4850_v38  ;;  %v2390_v9 = vmul.f32 0.21300554, %v4881_v45 }
 0x2b0   : > { %2336 = vrot.lane.b32.xlu2 %v4920_v20, %s3045_s24  ;;  %2334 = vrot.lane.b32.xlu1 %v4923_v50, %s3045_s24 }
 0x2b1   : > { %2332 = vrot.lane.b32.xlu0 %v4926_v54, %s3045_s24  ;;  %s2073_s24 = smul.f32 0.0010283804, %s4999_s22 }
 0x2b2   : > { %v1976_v16 = vpop.permute.xlu2 %1975  ;;  %v1932_v25 = vpop.permute.xlu1 %1931 }
 0x2b3   : > { %v1991_v40 = vadd.f32 %v1976_v16, %v1967_v2  ;;  %v1945_v21 = vadd.f32 %v1932_v25, %v1909_v59  ;;  %v1930_v57 = vpop.permute.xlu0 %1929 }
 0x2b4   : > { %v1944_v58 = vadd.f32 %v1930_v57, %v1908_v29 }
 0x2b8   : > { %2366 = vrot.lane.b32.xlu2 %v4935_v32, %s3046_s25  ;;  %2364 = vrot.lane.b32.xlu1 %v4938_v47, %s3046_s25 }
 0x2b9   : > { %2362 = vrot.lane.b32.xlu0 %v4941_v5, %s3046_s25 }
 0x2ba   : > { %v1982_v18 = vpop.permute.xlu2 %1981  ;;  %v1950_v24 = vpop.permute.xlu1 %1949 }
 0x2bb   : > { %v1994_v35 = vadd.f32 %v1982_v18, %v1970_v7  ;;  %v1966_v12 = vadd.f32 %v1950_v24, %v1942_v17  ;;  %v1948_v53 = vpop.permute.xlu0 %1947  ;;  %v2424_v7 = vmul.f32 0.26601174, %v4850_v38  ;;  %v2422_v17 = vmul.f32 0.26601174, %v4860_v36 }
 0x2bc   : > { %v1965_v22 = vadd.f32 %v1948_v53, %v1941_v39  ;;  %v4983_v18 = vmul.f32 0.21300554, %v4887_v28  ;;  %v2426_v24 = vmul.f32 0.26601174, %v4881_v45 }
 0x2c0   : > { %2372 = vrot.lane.b32.xlu2 %v4950_v49, %s3046_s25  ;;  %2370 = vrot.lane.b32.xlu1 %v4953_v11, %s3046_s25 }
 0x2c1   : > { %2368 = vrot.lane.b32.xlu0 %v4956_v13, %s3046_s25  ;;  %s2095_s25 = smul.f32 0.036000773, %s4999_s22 }
 0x2c2   : > { %v2000_v3 = vpop.permute.xlu2 %1999  ;;  %v1956_v30 = vpop.permute.xlu1 %1955 }
 0x2c3   : > { %v2015_v46 = vadd.f32 %v2000_v3, %v1991_v40  ;;  %v1969_v62 = vadd.f32 %v1956_v30, %v1945_v21  ;;  %v1954_v4 = vpop.permute.xlu0 %1953 }
 0x2c4   : > { %v1968_v14 = vadd.f32 %v1954_v4, %v1944_v58  ;;  %v4980_v58 = vmul.f32 0.21300554, %v4877_v6 }
 0x2c8   : > { %2402 = vrot.lane.b32.xlu2 %v2388_v33, %s3047_s26  ;;  %2400 = vrot.lane.b32.xlu1 %v4966_v23, %s3047_s26 }
 0x2c9   : > { %2398 = vrot.lane.b32.xlu0 %v2386_v34, %s3047_s26 }
 0x2ca   : > { %v2006_v2 = vpop.permute.xlu2 %2005  ;;  %v1974_v59 = vpop.permute.xlu1 %1973 }
 0x2cb   : > { %v2018_v41 = vadd.f32 %v2006_v2, %v1994_v35  ;;  %v1990_v29 = vadd.f32 %v1974_v59, %v1966_v12  ;;  %v1972_v42 = vpop.permute.xlu0 %1971 }
 0x2cc   : > { %v1989_v51 = vadd.f32 %v1972_v42, %v1965_v22  ;;  %v2427_v42 = vmul.f32 0.26601174, %v4877_v6 }
 0x2d0   : > { %2438 = vrot.lane.b32.xlu2 %v2424_v7, %s3048_s27  ;;  %2434 = vrot.lane.b32.xlu1 %v2422_v17, %s3048_s27 }
 0x2d1   : > { %2406 = vrot.lane.b32.xlu0 %v2390_v9, %s3047_s26 }
 0x2d2   : > { %v2024_v39 = vpop.permute.xlu2 %2023  ;;  %v1980_v16 = vpop.permute.xlu1 %1979 }
 0x2d3   : > { %v2039_v25 = vadd.f32 %v2024_v39, %v2015_v46  ;;  %v1993_v40 = vadd.f32 %v1980_v16, %v1969_v62  ;;  %v1978_v21 = vpop.permute.xlu0 %1977  ;;  %v5008_v39 = vstv %s2078_s23  ;;  %v5013_v16 = vmul.f32 0.0010283804, %v4850_v38 }
 0x2d4   : > { %v1992_v57 = vadd.f32 %v1978_v21, %v1968_v14 }
 0x2d8   : > { %2408 = vrot.lane.b32.xlu2 %v4980_v58, %s3047_s26  ;;  %2404 = vrot.lane.b32.xlu1 %v4983_v18, %s3047_s26  ;;  %s2112_s26 = smul.f32 0.1093607, %s4999_s22 }
 0x2d9   : > { %2442 = vrot.lane.b32.xlu0 %v2426_v24, %s3048_s27 }
 0x2da   : > { %v2030_v35 = vpop.permute.xlu2 %2029  ;;  %v1998_v12 = vpop.permute.xlu1 %1997  ;;  %v5026_v24 = vstv %s2112_s26 }
 0x2db   : > { %v2042_v53 = vadd.f32 %v2030_v35, %v2018_v41  ;;  %v2014_v22 = vadd.f32 %v1998_v12, %v1990_v29  ;;  %v1996_v3 = vpop.permute.xlu0 %1995  ;;  %v2425_v41 = vmul.f32 0.26601174, %v4887_v28  ;;  %v2423_v29 = vmul.f32 0.26601174, %v4854_v19 }
 0x2dc   : > { %v2013_v30 = vadd.f32 %v1996_v3, %v1989_v51  ;;  %v5033_v12 = vstv %s2073_s24 }
 0x2e0   : > { %2466 = vrot.lane.b32.xlu2 %v2390_v9, %s3049_s28  ;;  %2462 = vrot.lane.b32.xlu1 %v2388_v33, %s3049_s28 }
 0x2e1   : > { %2458 = vrot.lane.b32.xlu0 %v2386_v34, %s3049_s28 }
 0x2e2   : > { %v2054_v46 = vpop.permute.xlu2 %2053  ;;  %v2004_v62 = vpop.permute.xlu1 %2003 }
 0x2e3   : > { %v2069_v4 = vadd.f32 %v2054_v46, %v2039_v25  ;;  %v2017_v14 = vadd.f32 %v2004_v62, %v1993_v40  ;;  %v2002_v2 = vpop.permute.xlu0 %2001  ;;  %v5047_v62 = vmul.f32 0.0010283804, %v4877_v6 }
 0x2e4   : > { %v2016_v59 = vadd.f32 %v2002_v2, %v1992_v57  ;;  %v5024_v57 = vstv %s2095_s25 }
 0x2e5   : > { %v2081_v25 = vmul.f32 %v5008_v39, %v2069_v4  ;;  %v2098_v3 = vmul.f32 %v5024_v57, %v2069_v4  ;;  %v2076_v46 = vmul.f32 %v5033_v12, %v2069_v4  ;;  %5669 = vst [vmem:[#allocation32_spill] sm:$0xff] %v5047_v62 }
 0x2e8   : > { %2444 = vrot.lane.b32.xlu2 %v2427_v42, %s3048_s27  ;;  %2440 = vrot.lane.b32.xlu1 %v2425_v41, %s3048_s27  ;;  %v2104_v42 = vrot.slane %v2098_v3, 2 }
 0x2e9   : > { %2436 = vrot.lane.b32.xlu0 %v2423_v29, %s3048_s27  ;;  %s2170_s27 = smul.f32 0.26601174, %s4999_s22 }
 0x2ea   : > { %v2060_v33 = vpop.permute.xlu2 %2059  ;;  %v2022_v34 = vpop.permute.xlu1 %2021 }
 0x2eb   : > { %v5005_v51 = vadd.f32 %v2060_v33, %v2042_v53  ;;  %v2038_v7 = vadd.f32 %v2022_v34, %v2014_v22  ;;  %v2020_v17 = vpop.permute.xlu0 %2019  ;;  %v5037_v53 = vstv %s2141_s20  ;;  %v5039_v22 = vstv %s2170_s27 }
 0x2ec   : > { %v2037_v9 = vadd.f32 %v2020_v17, %v2013_v30  ;;  %v5043_v30 = vmul.f32 %v5026_v24, %v2069_v4  ;;  %v5053_v2 = vmul.f32 %v5039_v22, %v2069_v4 }
 0x2ed   : > { %v5064_v41 = vmul.f32 %v5026_v24, %v5005_v51  ;;  %v5095_v56 = vmul.f32 %v5008_v39, %v5005_v51 }
 0x2f0   : > { %2490 = vrot.lane.b32.xlu2 %v4953_v11, %s3050_s29  ;;  %2486 = vrot.lane.b32.xlu1 %v4935_v32, %s3050_s29 }
 0x2f1   : > { %2482 = vrot.lane.b32.xlu0 %v4941_v5, %s3050_s29  ;;  %v2087_v5 = vrot.slane %v2081_v25, 1 }
 0x2f2   : > { %v2295_v40 = vpop.permute.xlu2 %2294  ;;  %v2028_v21 = vpop.permute.xlu1 %2027 }
 0x2f3   : > { %v5029_v38 = vadd.f32 %v2295_v40, %v5013_v16  ;;  %v5031_v35 = vadd.f32 %v2028_v21, %v2017_v14  ;;  %v2026_v11 = vpop.permute.xlu0 %2025  ;;  %v5050_v14 = vmul.f32 %v5037_v53, %v2069_v4  ;;  %v5068_v4 = vmul.f32 %v5037_v53, %v5005_v51 }
 0x2f4   : > { %v5035_v32 = vadd.f32 %v2026_v11, %v2016_v59  ;;  %v2093_v59 = vadd.f32 %v2087_v5, %v2076_v46 }
 0x2f6   : > { %v5083_v5 = vadd.f32 %v2104_v42, %v2093_v59 }
 0x2f8   : > { %2468 = vrot.lane.b32.xlu2 %v4980_v58, %s3049_s28  ;;  %2464 = vrot.lane.b32.xlu1 %v4983_v18, %s3049_s28  ;;  %v5073_v18 = vmul.f32 %v5039_v22, %v5005_v51 }
 0x2f9   : > { %2460 = vrot.lane.b32.xlu0 %v4966_v23, %s3049_s28  ;;  %s5204_s28 = sld [smem:[#allocation2 + $0x2]] }
 0x2fa   : > { %v2301_v29 = vpop.permute.xlu2 %2300  ;;  %v2052_v58 = vpop.permute.xlu1 %2051 }
 0x2fb   : > { %v5076_v23 = vadd.f32 %v2301_v29, %v5047_v62  ;;  %v5078_v34 = vadd.f32 %v2052_v58, %v2038_v7  ;;  %v2050_v17 = vpop.permute.xlu0 %2049 }
 0x2fc   : > { %v2067_v11 = vadd.f32 %v2050_v17, %v2037_v9 }
 0x2fd   : > { %v2115_v3 = vmul.f32 %v5026_v24, %v5078_v34  ;;  %v2144_v46 = vmul.f32 %v5037_v53, %v5078_v34  ;;  %v2173_v7 = vmul.f32 %v5039_v22, %v5078_v34 }
 0x2fe   : > { %v2080_v9 = vmul.f32 %v5008_v39, %v2067_v11  ;;  %v2075_v27 = vmul.f32 %v5033_v12, %v2067_v11  ;;  %v2097_v33 = vmul.f32 %v5024_v57, %v2067_v11  ;;  %v2114_v6 = vmul.f32 %v5026_v24, %v2067_v11 }
 0x2ff   : > { %v2127_v44 = vrot.slane %v2115_v3, 3  ;;  %v2156_v21 = vrot.slane %v2144_v46, 4  ;;  %v2185_v40 = vrot.slane %v2173_v7, 5  ;;  %v2143_v42 = vmul.f32 %v5037_v53, %v2067_v11 }
 0x300   : > { %v2086_v25 = vrot.slane %v2080_v9, 1  ;;  %2514 = vrot.lane.b32.xlu2 %v4923_v50, %s3051_s30  ;;  %2510 = vrot.lane.b32.xlu1 %v4905_v60, %s3051_s30  ;;  %v2172_v17 = vmul.f32 %v5039_v22, %v2067_v11  ;;  %v2200_v59 = vrot.slane %v2144_v46, 6  ;;  %v2215_v7 = vrot.slane %v2115_v3, 7 }
 0x301   : > { %2506 = vrot.lane.b32.xlu0 %v4911_v43, %s3051_s30  ;;  %v5113_v50 = vmul.f32 0.0010283804, %v4854_v19  ;;  %v2103_v60 = vrot.slane %v2097_v33, 2  ;;  %v2126_v62 = vrot.slane %v2114_v6, 3  ;;  %v2155_v37 = vrot.slane %v2143_v42, 4 }
 0x302   : > { %v2092_v9 = vadd.f32 %v2086_v25, %v2075_v27  ;;  %v2331_v58 = vpop.permute.xlu2 %2330  ;;  %v2058_v29 = vpop.permute.xlu1 %2057  ;;  %v2184_v55 = vrot.slane %v2172_v17, 5  ;;  %v2199_v61 = vrot.slane %v2143_v42, 6  ;;  %v2214_v52 = vrot.slane %v2114_v6, 7 }
 0x303   : > { %v2056_v0 = vpop.permute.xlu0 %2055  ;;  %v5116_v11 = vadd.f32 %v2331_v58, %v5029_v38  ;;  %v2071_v43 = vadd.f32 %v2058_v29, %v5031_v35  ;;  %v2128_v27 = vsel %vm595_vm0, %v2126_v62, %v2127_v44  ;;  %v2157_v25 = vsel %vm625_vm1, %v2155_v37, %v2156_v21 }
 0x304   : > { %v2109_v46 = vadd.f32 %v2103_v60, %v2092_v9  ;;  %v2186_v19 = vsel %vm655_vm2, %v2184_v55, %v2185_v40  ;;  %v2201_v33 = vsel %vm671_vm3, %v2199_v61, %v2200_v59  ;;  %v5124_v3 = vsel %vm687_vm4, %v2214_v52, %v2215_v7 }
 0x305   : > { %v2082_v42 = vmul.f32 %v5008_v39, %v2071_v43  ;;  %v5128_v6 = vmul.f32 0.0010283804, %v4860_v36  ;;  %v2099_v35 = vmul.f32 %v5024_v57, %v2071_v43  ;;  %v2118_v29 = vmul.f32 %v5026_v24, %v2071_v43 }
 0x306   : > { %v2138_v38 = vadd.f32 %v2128_v27, %v2109_v46  ;;  %v2147_v44 = vmul.f32 %v5037_v53, %v2071_v43  ;;  %v2077_v37 = vmul.f32 %v5033_v12, %v2071_v43  ;;  %v2176_v61 = vmul.f32 %v5039_v22, %v2071_v43 }
 0x307   : > { %v2088_v55 = vrot.slane %v2082_v42, 1  ;;  %v5136_v52 = vadd.f32 %v2056_v0, %v5035_v32  ;;  %v2105_v62 = vrot.slane %v2099_v35, 2  ;;  %v2132_v40 = vrot.slane %v2118_v29, 3 }
 0x308   : > { %2492 = vrot.lane.b32.xlu2 %v4950_v49, %s3050_s29  ;;  %2488 = vrot.lane.b32.xlu1 %v4956_v13, %s3050_s29  ;;  %v2167_v36 = vadd.f32 %v2157_v25, %v2138_v38  ;;  %v2161_v21 = vrot.slane %v2147_v44, 4  ;;  %v2190_v59 = vrot.slane %v2176_v61, 5  ;;  %v2205_v17 = vrot.slane %v2147_v44, 6 }
 0x309   : > { %2484 = vrot.lane.b32.xlu0 %v4938_v47, %s3050_s29  ;;  %v2094_v58 = vadd.f32 %v2088_v55, %v2077_v37  ;;  %v2220_v7 = vrot.slane %v2118_v29, 7  ;;  %v5670_v60 = vrot.slane %v5064_v41, 3  ;;  %v5671_v13 = vrot.slane %v5068_v4, 4  ;;  %s5212_s29 = sld [smem:[#allocation2 + $0x3]] }
 0x30a   : > { %v2337_v9 = vpop.permute.xlu2 %2336  ;;  %v2293_v0 = vpop.permute.xlu1 %2292  ;;  %v2196_v32 = vadd.f32 %v2186_v19, %v2167_v36  ;;  %v2117_v46 = vmul.f32 %v5026_v24, %v5136_v52  ;;  %v5672_v25 = vrot.slane %v5073_v18, 5  ;;  %v5673_v38 = vrot.slane %v5068_v4, 6 }
 0x30b   : > { %v2134_v49 = vsel %vm595_vm0, %v2132_v40, %v5670_v60  ;;  %v2163_v43 = vsel %vm625_vm1, %v2161_v21, %v5671_v13  ;;  %v2291_v27 = vpop.permute.xlu0 %2290  ;;  %v2111_v47 = vadd.f32 %v2105_v62, %v2094_v58  ;;  %v5674_v35 = vrot.slane %v5064_v41, 7 }
 0x30c   : > { %v2192_v42 = vsel %vm655_vm2, %v2190_v59, %v5672_v25  ;;  %v2207_v19 = vsel %vm671_vm3, %v2205_v17, %v5673_v38  ;;  %v2211_v44 = vadd.f32 %v2201_v33, %v2196_v32  ;;  %v2130_v37 = vrot.slane %v2117_v46, 3 }
 0x30d   : > { %v2222_v29 = vsel %vm687_vm4, %v2220_v7, %v5674_v35  ;;  %v2146_v55 = vmul.f32 %v5037_v53, %v5136_v52  ;;  %v2175_v24 = vmul.f32 %v5039_v22, %v5136_v52  ;;  %v2229_v18 = vmul.f32 %v5024_v57, %v5078_v34 }
 0x30e   : > { %v2140_v61 = vadd.f32 %v2134_v49, %v2111_v47  ;;  %v2218_v36 = vrot.slane %v2117_v46, 7  ;;  %v5168_v4 = vmul.f32 0.0010283804, %v4881_v45  ;;  %v5675_v41 = vrot.slane %v5043_v30, 3 }
 0x30f   : > { %v2159_v33 = vrot.slane %v2146_v55, 4  ;;  %v2188_v40 = vrot.slane %v2175_v24, 5  ;;  %v2203_v21 = vrot.slane %v2146_v55, 6  ;;  %v5676_v22 = vrot.slane %v5043_v30, 7 }
 0x310   : > { %v2131_v62 = vsel %vm595_vm0, %v5675_v41, %v2130_v37  ;;  %v2169_v58 = vadd.f32 %v2163_v43, %v2140_v61  ;;  %2538 = vrot.lane.b32.xlu2 %v4893_v26, %s3052_s4  ;;  %2534 = vrot.lane.b32.xlu1 %v4863_v48, %s3052_s4  ;;  %v5182_v45 = vmul.f32 0.0010283804, %v4887_v28  ;;  %v2235_v17 = vmul.f32 %v5008_v39, %v5078_v34 }
 0x311   : > { %v2139_v53 = vadd.f32 %v2131_v62, %v5083_v5  ;;  %v2219_v59 = vsel %vm687_vm4, %v5676_v22, %v2218_v36  ;;  %v5677_v7 = vrot.slane %v5050_v14, 4  ;;  %v5678_v30 = vrot.slane %v5053_v2, 5  ;;  %2530 = vrot.lane.b32.xlu0 %v4869_v31, %s3052_s4 }
 0x312   : > { %v5679_v60 = vrot.slane %v5050_v14, 6  ;;  %v2198_v48 = vadd.f32 %v2192_v42, %v2169_v58  ;;  %v2349_v49 = vadd.f32 %v2337_v9, %v5076_v23  ;;  %v2309_v13 = vadd.f32 %v2293_v0, %v5113_v50  ;;  %v2367_v43 = vpop.permute.xlu2 %2366  ;;  %v2299_v46 = vpop.permute.xlu1 %2298 }
 0x313   : > { %v2160_v5 = vsel %vm625_vm1, %v5677_v7, %v2159_v33  ;;  %v2189_v32 = vsel %vm655_vm2, %v5678_v30, %v2188_v40  ;;  %v2250_v2 = vmul.f32 %v5033_v12, %v5078_v34  ;;  %v2308_v47 = vadd.f32 %v2291_v27, %v5128_v6  ;;  %v2297_v38 = vpop.permute.xlu0 %2296 }
 0x314   : > { %v2204_v26 = vsel %vm671_vm3, %v5679_v60, %v2203_v21  ;;  %v2168_v28 = vadd.f32 %v2160_v5, %v2139_v53  ;;  %v2382_v14 = vadd.f32 %v2367_v43, %v5116_v11  ;;  %v2312_v25 = vadd.f32 %v2299_v46, %v5168_v4  ;;  %v5680_v53 = vld [vmem:[#allocation10_spill] sm:$0xff] }
 0x315   : > { %v2213_v31 = vadd.f32 %v2207_v19, %v2198_v48  ;;  %v2311_v23 = vadd.f32 %v2297_v38, %v5182_v45  ;;  %v2226_v9 = vadd.f32 %v5124_v3, %v2211_v44  ;;  %v2231_v0 = vmul.f32 %v5024_v57, %v5005_v51 }
 0x316   : > { %v2197_v42 = vadd.f32 %v2189_v32, %v2168_v28  ;;  %v2252_v34 = vmul.f32 %v5033_v12, %v5005_v51  ;;  %v2241_v27 = vrot.slane %v2235_v17, 1  ;;  %v2236_v35 = vmul.f32 %v5008_v39, %v5136_v52  ;;  %v5683_v32 = vld [vmem:[#allocation15_spill] sm:$0xff]  ;;  %v5685_v28 = vld [vmem:[#allocation5_spill] sm:$0xff] }
 0x317   : > { %v2228_v37 = vadd.f32 %v2222_v29, %v2213_v31  ;;  %v2232_v19 = vadd.f32 %v2229_v18, %v2226_v9  ;;  %v2243_v55 = vrot.slane %v5095_v56, 1  ;;  %v2230_v3 = vmul.f32 %v5024_v57, %v5136_v52 }
 0x318   : > { %v2212_v11 = vadd.f32 %v2204_v26, %v2197_v42  ;;  %v2251_v44 = vmul.f32 %v5033_v12, %v5136_v52  ;;  %v2256_v24 = vrot.slane %v2250_v2, 2  ;;  %2516 = vrot.lane.b32.xlu2 %v4920_v20, %s3051_s30  ;;  %2512 = vrot.lane.b32.xlu1 %v4926_v54, %s3051_s30  ;;  %v2258_v29 = vrot.slane %v2252_v34, 2  ;;  %v5687_v2 = vld [vmem:[#allocation25_spill] sm:$0xff]  ;;  %v5690_v34 = vld [vmem:[#allocation6_spill] sm:$0xff] }
 0x319   : > { %v2234_v51 = vadd.f32 %v2231_v0, %v2228_v37  ;;  %v2247_v39 = vadd.f32 %v2241_v27, %v2232_v19  ;;  %2508 = vrot.lane.b32.xlu0 %v4908_v63, %s3051_s30  ;;  %v2242_v57 = vrot.slane %v2236_v35, 1  ;;  %v5228_v40 = vstv %s5204_s28  ;;  %v5681_v63 = vld [vmem:[#allocation11_spill] sm:$0xff]  ;;  %v5692_v37 = vld [vmem:[#allocation28_spill] sm:$0xff]  ;;  %s2271_s30 = smul.f32 %s4045_s17, %s3522_s9 }
 0x31a   : > { %v2227_v61 = vadd.f32 %v2219_v59, %v2212_v11  ;;  %v2373_v18 = vpop.permute.xlu2 %2372  ;;  %v2329_v12 = vpop.permute.xlu1 %2328  ;;  %v2257_v41 = vrot.slane %v2251_v44, 2  ;;  %v5232_v59 = vstv %s5212_s29  ;;  %v5682_v5 = vsub.f32 %v4820_v8, %v4349_v10  ;;  %v5691_v35 = vld [vmem:[#allocation27_spill] sm:$0xff] }
 0x31b   : > { %v2249_v52 = vadd.f32 %v2243_v55, %v2234_v51  ;;  %v2262_v36 = vadd.f32 %v2256_v24, %v2247_v39  ;;  %v2385_v62 = vadd.f32 %v2373_v18, %v2349_v49  ;;  %v2345_v20 = vadd.f32 %v2329_v12, %v2309_v13  ;;  %v2327_v33 = vpop.permute.xlu0 %2326  ;;  %v5694_v24 = vld [vmem:[#allocation32_spill] sm:$0xff]  ;;  %s2606_s21 = smul.f32 0.036000773, %s2271_s30 }
 0x31c   : > { %v2233_v56 = vadd.f32 %v2230_v3, %v2227_v61  ;;  %v2344_v54 = vadd.f32 %v2327_v33, %v2308_v47  ;;  %v2820_v60 = vadd.f32 %v5683_v32, %v5228_v40  ;;  %v5684_v26 = vsub.f32 %v4822_v15, %v4326_v1  ;;  %s2623_s6 = smul.f32 0.1093607, %s2271_s30 }
 0x31d   : > { %v2264_v21 = vadd.f32 %v2258_v29, %v2249_v52  ;;  %v2788_v22 = vsub.f32 %v2262_v36, %v5680_v53  ;;  %v2821_v27 = vadd.f32 %v5690_v34, %v5228_v40  ;;  %s2652_s7 = smul.f32 0.21300554, %s2271_s30 }
 0x31e   : > { %v2248_v58 = vadd.f32 %v2242_v57, %v2233_v56  ;;  %s2681_s9 = smul.f32 0.26601174, %s2271_s30 }
 0x31f   : > { %v2790_v17 = vsub.f32 %v2264_v21, %v5681_v63  ;;  %v2801_v30 = vadd.f32 %v2788_v22, %v5682_v5 }
 0x320   : > { %v2263_v7 = vadd.f32 %v2257_v41, %v2248_v58  ;;  %2568 = vrot.lane.b32.xlu2 %v5168_v4, %s3053_s5  ;;  %2564 = vrot.lane.b32.xlu1 %v5013_v16, %s3053_s5  ;;  %v5686_v4 = vld [vmem:[#allocation12_spill] sm:$0xff] }
 0x321   : > { %v2803_v48 = vadd.f32 %v2790_v17, %v5684_v26  ;;  %v2804_v13 = vadd.f32 %v2801_v30, %v5232_v59  ;;  %2560 = vrot.lane.b32.xlu0 %v5128_v6, %s3053_s5  ;;  %v2822_v46 = vadd.f32 %v5686_v4, %v5228_v40  ;;  %v5688_v16 = vld [vmem:[#allocation8_spill] sm:$0xff] }
 0x322   : > { %v2789_v49 = vsub.f32 %v2263_v7, %v5685_v28  ;;  %v2403_v10 = vpop.permute.xlu2 %2402  ;;  %v2335_v8 = vpop.permute.xlu1 %2334  ;;  %v5689_v47 = vsub.f32 %v5687_v2, %v5688_v16 }
 0x323   : > { %v2806_v43 = vadd.f32 %v2803_v48, %v5232_v59  ;;  %v5257_v1 = vmul.f32 %v2820_v60, %v2804_v13  ;;  %v2418_v15 = vadd.f32 %v2403_v10, %v2382_v14  ;;  %v2348_v31 = vadd.f32 %v2335_v8, %v2312_v25  ;;  %v2333_v42 = vpop.permute.xlu0 %2332  ;;  %v5693_v14 = vld [vmem:[#allocation26_spill] sm:$0xff] }
 0x324   : > { %v2802_v38 = vadd.f32 %v2789_v49, %v5689_v47  ;;  %v2347_v9 = vadd.f32 %v2333_v42, %v2311_v23 }
 0x325   : > { %v5259_v0 = vmul.f32 %v2822_v46, %v2806_v43 }
 0x326   : > { %v2805_v6 = vadd.f32 %v2802_v38, %v5232_v59 }
 0x327   : > { %2998 = vrcp.f32 %v5259_v0 }
 0x328   : > { %v5264_v11 = vmul.f32 %v2821_v27, %v2805_v6  ;;  %2540 = vrot.lane.b32.xlu2 %v5691_v35, %s3052_s4  ;;  %2536 = vrot.lane.b32.xlu1 %v5692_v37, %s3052_s4  ;;  %3000 = vrcp.f32 %v5257_v1 }
 0x329   : > { %2532 = vrot.lane.b32.xlu0 %v5693_v14, %s3052_s4  ;;  %s2589_s4 = smul.f32 0.0075987587, %s2271_s30 }
 0x32a   : > { %v2439_v25 = vpop.permute.xlu2 %2438  ;;  %v2365_v23 = vpop.permute.xlu1 %2364  ;;  %3002 = vrcp.f32 %v5264_v11 }
 0x32b   : > { %v2454_v19 = vadd.f32 %v2439_v25, %v2418_v15  ;;  %v2381_v55 = vadd.f32 %v2365_v23, %v2345_v20  ;;  %v2363_v3 = vpop.permute.xlu0 %2362  ;;  %v5298_v34 = vstv %s2589_s4 }
 0x32c   : > { %v2380_v44 = vadd.f32 %v2363_v3, %v2344_v54 }
 0x330   : > { %2570 = vrot.lane.b32.xlu2 %v5694_v24, %s3053_s5  ;;  %2566 = vrot.lane.b32.xlu1 %v5182_v45, %s3053_s5  ;;  %v5307_v24 = vstv %s2652_s7 }
 0x331   : > { %2562 = vrot.lane.b32.xlu0 %v5113_v50, %s3053_s5  ;;  %s2584_s5 = smul.f32 0.0010283804, %s2271_s30 }
 0x332   : > { %v2409_v61 = vpop.permute.xlu2 %2408  ;;  %v2371_v51 = vpop.permute.xlu1 %2370 }
 0x333   : > { %v2421_v39 = vadd.f32 %v2409_v61, %v2385_v62  ;;  %v2384_v29 = vadd.f32 %v2371_v51, %v2348_v31  ;;  %v2369_v56 = vpop.permute.xlu0 %2368  ;;  %v5309_v61 = vstv %s2681_s9 }
 0x334   : > { %v2383_v57 = vadd.f32 %v2369_v56, %v2347_v9 }
 0x33a   : > { %v2467_v18 = vpop.permute.xlu2 %2466  ;;  %v2401_v12 = vpop.permute.xlu1 %2400 }
 0x33b   : > { %v5278_v52 = vadd.f32 %v2401_v12, %v2381_v55  ;;  %v2399_v36 = vpop.permute.xlu0 %2398  ;;  %v5303_v55 = vstv %s2606_s21 }
 0x33c   : > { %v2416_v41 = vadd.f32 %v2399_v36, %v2380_v44  ;;  %v5305_v44 = vstv %s2623_s6 }
 0x342   : > { %v2445_v20 = vpop.permute.xlu2 %2444  ;;  %v2435_v33 = vpop.permute.xlu1 %2434 }
 0x343   : > { %v2452_v54 = vadd.f32 %v2435_v33, %v2416_v41  ;;  %v2407_v21 = vpop.permute.xlu0 %2406  ;;  %v2457_v6 = vadd.f32 %v2445_v20, %v2421_v39 }
 0x344   : > { %v2420_v45 = vadd.f32 %v2407_v21, %v2384_v29 }
 0x34a   : > { %v2491_v58 = vpop.permute.xlu2 %2490  ;;  %v2405_v53 = vpop.permute.xlu1 %2404 }
 0x34b   : > { %v5280_v50 = vadd.f32 %v2405_v53, %v2383_v57  ;;  %v2443_v22 = vpop.permute.xlu0 %2442 }
 0x34c   : > { %v2456_v62 = vadd.f32 %v2443_v22, %v2420_v45 }
 0x34e   : > { %v2480_v63 = vadd.f32 %v2467_v18, %v2456_v62 }
 0x350   : > { %v2504_v16 = vadd.f32 %v2491_v58, %v2480_v63 }
 0x352   : > { %v2469_v17 = vpop.permute.xlu2 %2468  ;;  %v2463_v7 = vpop.permute.xlu1 %2462 }
 0x353   : > { %v2478_v5 = vadd.f32 %v2463_v7, %v2454_v19  ;;  %v2459_v30 = vpop.permute.xlu0 %2458  ;;  %v2481_v37 = vadd.f32 %v2469_v17, %v2457_v6  ;;  %v5301_v19 = vstv %s2584_s5 }
 0x354   : > { %v2476_v32 = vadd.f32 %v2459_v30, %v2452_v54 }
 0x35a   : > { %v2515_v60 = vpop.permute.xlu2 %2514  ;;  %v5282_v26 = vpop.permute.xlu1 %2440 }
 0x35b   : > { %v5284_v48 = vpop.permute.xlu0 %2436  ;;  %v2528_v31 = vadd.f32 %v2515_v60, %v2504_v16 }
 0x362   : > { %v2493_v28 = vpop.permute.xlu2 %2492  ;;  %v2487_v49 = vpop.permute.xlu1 %2486 }
 0x363   : > { %v2483_v13 = vpop.permute.xlu0 %2482  ;;  %v2505_v23 = vadd.f32 %v2493_v28, %v2481_v37  ;;  %v2502_v39 = vadd.f32 %v2487_v49, %v2478_v5 }
 0x364   : > { %v2500_v21 = vadd.f32 %v2483_v13, %v2476_v32 }
 0x36a   : > { %v2539_v10 = vpop.permute.xlu2 %2538  ;;  %v5286_v8 = vpop.permute.xlu1 %2464 }
 0x36b   : > { %v5288_v43 = vpop.permute.xlu0 %2460  ;;  %v2552_v42 = vadd.f32 %v2539_v10, %v2528_v31 }
 0x372   : > { %v2517_v4 = vpop.permute.xlu2 %2516  ;;  %v2511_v46 = vpop.permute.xlu1 %2510 }
 0x373   : > { %v5290_v2 = vpop.permute.xlu0 %2506  ;;  %v2529_v3 = vadd.f32 %v2517_v4, %v2505_v23  ;;  %v2526_v45 = vadd.f32 %v2511_v46, %v2502_v39  ;;  %v2453_v39 = vadd.f32 %v5284_v48, %v5278_v52 }
 0x37a   : > { %v2569_v47 = vpop.permute.xlu2 %2568  ;;  %v5294_v38 = vpop.permute.xlu1 %2488 }
 0x37b   : > { %v5296_v15 = vpop.permute.xlu0 %2484  ;;  %v2582_v9 = vadd.f32 %v2569_v47, %v2552_v42 }
 0x37d   : > { %v2593_v25 = vmul.f32 %v5298_v34, %v2582_v9  ;;  %v2610_v29 = vmul.f32 %v5303_v55, %v2582_v9  ;;  %v2588_v57 = vmul.f32 %v5301_v19, %v2582_v9  ;;  %v2629_v18 = vmul.f32 %v5305_v44, %v2582_v9 }
 0x37e   : > { %v2658_v12 = vmul.f32 %v5307_v24, %v2582_v9  ;;  %v2687_v36 = vmul.f32 %v5309_v61, %v2582_v9  ;;  %v2524_v9 = vadd.f32 %v5290_v2, %v2500_v21  ;;  %v5695_v21 = vld [vmem:[#allocation13_spill] sm:$0xff] }
 0x37f   : > { %v2599_v51 = vrot.slane %v2593_v25, 1  ;;  %v2616_v53 = vrot.slane %v2610_v29, 2  ;;  %v2643_v17 = vrot.slane %v2629_v18, 3  ;;  %v2731_v16 = vrot.slane %v2629_v18, 7  ;;  %v5333_v18 = vpop.eup %2998 }
 0x380   : > { %v2672_v7 = vrot.slane %v2658_v12, 4  ;;  %v2701_v5 = vrot.slane %v2687_v36, 5  ;;  %v2716_v30 = vrot.slane %v2658_v12, 6 }
 0x381   : > { %v2605_v58 = vadd.f32 %v2599_v51, %v2588_v57  ;;  %v2455_v51 = vadd.f32 %v5282_v26, %v5280_v50  ;;  %v2477_v57 = vadd.f32 %v5288_v43, %v2453_v39 }
 0x382   : > { %v2541_v27 = vpop.permute.xlu2 %2540  ;;  %v2535_v35 = vpop.permute.xlu1 %2534 }
 0x383   : > { %v2531_v14 = vpop.permute.xlu0 %2530  ;;  %v2553_v56 = vadd.f32 %v2541_v27, %v2529_v3  ;;  %v2622_v4 = vadd.f32 %v2616_v53, %v2605_v58  ;;  %v2550_v32 = vadd.f32 %v2535_v35, %v2526_v45  ;;  %v2479_v2 = vadd.f32 %v5286_v8, %v2455_v51 }
 0x384   : > { %v2548_v35 = vadd.f32 %v2531_v14, %v2524_v9  ;;  %v2501_v14 = vadd.f32 %v5296_v15, %v2477_v57  ;;  %v5341_v45 = vmul.f32 2.0, %v5695_v21 }
 0x385   : > { %v2503_v12 = vadd.f32 %v5294_v38, %v2479_v2  ;;  %v5346_v38 = vmul.f32 %v5333_v18, %v5259_v0 }
 0x38a   : > { %v2571_v41 = vpop.permute.xlu2 %2570  ;;  %v2513_v20 = vpop.permute.xlu1 %2512 }
 0x38b   : > { %v2583_v33 = vadd.f32 %v2571_v41, %v2553_v56  ;;  %v2509_v54 = vpop.permute.xlu0 %2508  ;;  %v2527_v8 = vadd.f32 %v2513_v20, %v2503_v12 }
 0x38c   : > { %v2525_v43 = vadd.f32 %v2509_v54, %v2501_v14 }
 0x38d   : > { %v2630_v22 = vmul.f32 %v5305_v44, %v2583_v33  ;;  %v2659_v62 = vmul.f32 %v5307_v24, %v2583_v33  ;;  %v2688_v63 = vmul.f32 %v5309_v61, %v2583_v33  ;;  %v2748_v36 = vmul.f32 %v5298_v34, %v2583_v33 }
 0x38e   : > { %v2763_v50 = vmul.f32 %v5301_v19, %v2583_v33 }
 0x38f   : > { %v2644_v60 = vrot.slane %v2630_v22, 3  ;;  %v2673_v28 = vrot.slane %v2659_v62, 4  ;;  %v2702_v49 = vrot.slane %v2688_v63, 5  ;;  %v2717_v10 = vrot.slane %v2659_v62, 6 }
 0x390   : > { %v2732_v13 = vrot.slane %v2630_v22, 7  ;;  %v2742_v63 = vmul.f32 %v5303_v55, %v2583_v33 }
 0x391   : > { %v2645_v46 = vsel %vm595_vm0, %v2643_v17, %v2644_v60  ;;  %v2674_v47 = vsel %vm625_vm1, %v2672_v7, %v2673_v28  ;;  %v2703_v31 = vsel %vm655_vm2, %v2701_v5, %v2702_v49  ;;  %v2718_v42 = vsel %vm671_vm3, %v2716_v30, %v2717_v10 }
 0x392   : > { %v2651_v6 = vadd.f32 %v2645_v46, %v2622_v4  ;;  %v2565_v27 = vpop.permute.xlu1 %2564  ;;  %v2733_v37 = vsel %vm687_vm4, %v2731_v16, %v2732_v13  ;;  %v2754_v17 = vrot.slane %v2748_v36, 1  ;;  %v2769_v7 = vrot.slane %v2763_v50, 2 }
 0x393   : > { %v2580_v25 = vadd.f32 %v2565_v27, %v2550_v32  ;;  %v2561_v23 = vpop.permute.xlu0 %2560 }
 0x394   : > { %v2680_v3 = vadd.f32 %v2674_v47, %v2651_v6  ;;  %v2578_v56 = vadd.f32 %v2561_v23, %v2548_v35 }
 0x395   : > { %v2592_v29 = vmul.f32 %v5298_v34, %v2580_v25  ;;  %v2609_v58 = vmul.f32 %v5303_v55, %v2580_v25  ;;  %v2587_v15 = vmul.f32 %v5301_v19, %v2580_v25  ;;  %v5350_v22 = vmul.f32 %v5305_v44, %v2580_v25 }
 0x396   : > { %v2591_v52 = vmul.f32 %v5298_v34, %v2578_v56  ;;  %v2709_v41 = vadd.f32 %v2703_v31, %v2680_v3  ;;  %v5353_v62 = vmul.f32 %v5307_v24, %v2580_v25  ;;  %v2685_v20 = vmul.f32 %v5309_v61, %v2580_v25 }
 0x397   : > { %v2598_v26 = vrot.slane %v2592_v29, 1  ;;  %v2586_v30 = vmul.f32 %v5301_v19, %v2578_v56  ;;  %v2608_v60 = vmul.f32 %v5303_v55, %v2578_v56  ;;  %v2615_v28 = vrot.slane %v2609_v58, 2 }
 0x398   : > { %v2724_v54 = vadd.f32 %v2718_v42, %v2709_v41  ;;  %v2597_v0 = vrot.slane %v2591_v52, 1  ;;  %v2625_v49 = vmul.f32 %v5305_v44, %v2578_v56  ;;  %v2654_v10 = vmul.f32 %v5307_v24, %v2578_v56 }
 0x399   : > { %v2604_v5 = vadd.f32 %v2598_v26, %v2587_v15  ;;  %v2640_v16 = vrot.slane %v5350_v22, 3  ;;  %v2669_v33 = vrot.slane %v5353_v62, 4  ;;  %v2728_v32 = vrot.slane %v5350_v22, 7 }
 0x39a   : > { %v2537_v48 = vpop.permute.xlu1 %2536  ;;  %v2739_v4 = vadd.f32 %v2733_v37, %v2724_v54  ;;  %v2683_v13 = vmul.f32 %v5309_v61, %v2578_v56  ;;  %v2698_v46 = vrot.slane %v2685_v20, 5  ;;  %v2713_v47 = vrot.slane %v5353_v62, 6 }
 0x39b   : > { %v2533_v53 = vpop.permute.xlu0 %2532  ;;  %v2551_v31 = vadd.f32 %v2537_v48, %v2527_v8  ;;  %v2621_v9 = vadd.f32 %v2615_v28, %v2604_v5  ;;  %v2603_v6 = vadd.f32 %v2597_v0, %v2586_v30  ;;  %v2614_v27 = vrot.slane %v2608_v60, 2 }
 0x39c   : > { %v2745_v42 = vadd.f32 %v2742_v63, %v2739_v4  ;;  %v2549_v25 = vadd.f32 %v2533_v53, %v2525_v43  ;;  %v2637_v35 = vrot.slane %v2625_v49, 3  ;;  %v2666_v37 = vrot.slane %v2654_v10, 4 }
 0x39d   : > { %v2695_v29 = vrot.slane %v2683_v13, 5  ;;  %v2710_v2 = vrot.slane %v2654_v10, 6  ;;  %v2725_v57 = vrot.slane %v2625_v49, 7  ;;  %v2620_v26 = vadd.f32 %v2614_v27, %v2603_v6 }
 0x39e   : > { %v2760_v39 = vadd.f32 %v2754_v17, %v2745_v42  ;;  %v2834_v10 = vsub.f32 2.0, %v5346_v38 }
 0x3a0   : > { %v2775_v50 = vadd.f32 %v2769_v7, %v2760_v39 }
 0x3a2   : > { %v2567_v23 = vpop.permute.xlu1 %2566 }
 0x3a3   : > { %v2581_v3 = vadd.f32 %v2567_v23, %v2551_v31  ;;  %v2563_v51 = vpop.permute.xlu0 %2562 }
 0x3a4   : > { %v2579_v12 = vadd.f32 %v2563_v51, %v2549_v25 }
 0x3a5   : > { %v2628_v56 = vmul.f32 %v5305_v44, %v2581_v3  ;;  %v2657_v14 = vmul.f32 %v5307_v24, %v2581_v3  ;;  %v2686_v36 = vmul.f32 %v5309_v61, %v2581_v3  ;;  %v2747_v6 = vmul.f32 %v5298_v34, %v2581_v3 }
 0x3a6   : > { %v2626_v52 = vmul.f32 %v5305_v44, %v2579_v12  ;;  %v2655_v48 = vmul.f32 %v5307_v24, %v2579_v12  ;;  %v2684_v41 = vmul.f32 %v5309_v61, %v2579_v12  ;;  %v2793_v61 = vsub.f32 %v2775_v50, %v5695_v21 }
 0x3a7   : > { %v2641_v8 = vrot.slane %v2628_v56, 3  ;;  %v2670_v43 = vrot.slane %v2657_v14, 4  ;;  %v2699_v58 = vrot.slane %v2686_v36, 5  ;;  %v2714_v53 = vrot.slane %v2657_v14, 6 }
 0x3a8   : > { %v2729_v15 = vrot.slane %v2628_v56, 7  ;;  %v2638_v22 = vrot.slane %v2626_v52, 3  ;;  %v2667_v62 = vrot.slane %v2655_v48, 4  ;;  %v2696_v63 = vrot.slane %v2684_v41, 5 }
 0x3a9   : > { %v2642_v20 = vsel %vm595_vm0, %v2640_v16, %v2641_v8  ;;  %v2671_v54 = vsel %vm625_vm1, %v2669_v33, %v2670_v43  ;;  %v2711_v17 = vrot.slane %v2655_v48, 6  ;;  %v2726_v7 = vrot.slane %v2626_v52, 7 }
 0x3aa   : > { %v2650_v5 = vadd.f32 %v2642_v20, %v2621_v9  ;;  %v2639_v44 = vsel %vm595_vm0, %v2637_v35, %v2638_v22  ;;  %v2668_v24 = vsel %vm625_vm1, %v2666_v37, %v2667_v62  ;;  %v2700_v0 = vsel %vm655_vm2, %v2698_v46, %v2699_v58  ;;  %v5697_v58 = vld [vmem:[#allocation14_spill] sm:$0xff] }
 0x3ab   : > { %v2649_v30 = vadd.f32 %v2639_v44, %v2620_v26  ;;  %v2715_v60 = vsel %vm671_vm3, %v2713_v47, %v2714_v53  ;;  %v2730_v28 = vsel %vm687_vm4, %v2728_v32, %v2729_v15  ;;  %v2796_v49 = vmul.f32 2.0, %v2793_v61 }
 0x3ac   : > { %v2679_v4 = vadd.f32 %v2671_v54, %v2650_v5  ;;  %v2697_v33 = vsel %vm655_vm2, %v2695_v29, %v2696_v63  ;;  %v2712_v13 = vsel %vm671_vm3, %v2710_v2, %v2711_v17  ;;  %v2727_v31 = vsel %vm687_vm4, %v2725_v57, %v2726_v7  ;;  %v3001_v2 = vpop.eup %3000 }
 0x3ad   : > { %v2678_v16 = vadd.f32 %v2668_v24, %v2649_v30  ;;  %v2800_v21 = vadd.f32 %v5232_v59, %v2796_v49  ;;  %v2813_v46 = vadd.f32 %v5228_v40, %v5341_v45  ;;  %v2837_v47 = vmul.f32 %v5333_v18, %v2834_v10  ;;  %v3003_v14 = vpop.eup %3002 }
 0x3ae   : > { %v2708_v42 = vadd.f32 %v2700_v0, %v2679_v4  ;;  %v2746_v25 = vmul.f32 %v5298_v34, %v2579_v12  ;;  %v2741_v45 = vmul.f32 %v5303_v55, %v2581_v3  ;;  %v2762_v37 = vmul.f32 %v5301_v19, %v2581_v3 }
 0x3af   : > { %v2707_v32 = vadd.f32 %v2697_v33, %v2678_v16  ;;  %v2816_v38 = vmul.f32 %v2813_v46, %v2800_v21  ;;  %v2740_v39 = vmul.f32 %v5303_v55, %v2579_v12  ;;  %v2761_v29 = vmul.f32 %v5301_v19, %v2579_v12  ;;  %v5696_v19 = vld [vmem:[#allocation9_spill] sm:$0xff] }
 0x3b0   : > { %v2723_v9 = vadd.f32 %v2715_v60, %v2708_v42  ;;  %v2753_v56 = vrot.slane %v2747_v6, 1  ;;  %v2752_v34 = vrot.slane %v2746_v25, 1  ;;  %v2768_v26 = vrot.slane %v2762_v37, 2 }
 0x3b1   : > { %v2722_v27 = vadd.f32 %v2712_v13, %v2707_v32  ;;  %v2840_v23 = vmul.f32 %v2837_v47, %v2816_v38  ;;  %v2767_v48 = vrot.slane %v2761_v29, 2  ;;  %v2830_v3 = vmul.f32 %v3003_v14, %v5264_v11 }
 0x3b2   : > { %v2738_v35 = vadd.f32 %v2730_v28, %v2723_v9  ;;  %v2829_v55 = vmul.f32 %v3001_v2, %v5257_v1  ;;  %v2808_v43 = vmul.f32 2.0, %v5696_v19  ;;  %v2807_v15 = vmul.f32 2.0, %v5697_v58 }
 0x3b3   : > { %v2737_v51 = vadd.f32 %v2727_v31, %v2722_v27  ;;  %v2848_v18 = vsel %vm2841_vm5, %v2840_v23, 0.0  ;;  %v2833_v62 = vsub.f32 2.0, %v2830_v3 }
 0x3b4   : > { %v2744_v57 = vadd.f32 %v2741_v45, %v2738_v35  ;;  %2849 = vadd.xlane.f32.xlu2 %v2848_v18  ;;  %v2832_v20 = vsub.f32 2.0, %v2829_v55  ;;  %v2812_v17 = vadd.f32 %v5228_v40, %v2808_v43  ;;  %v2811_v1 = vadd.f32 %v5228_v40, %v2807_v15 }
 0x3b5   : > { %v2743_v36 = vadd.f32 %v2740_v39, %v2737_v51  ;;  %v2836_v5 = vmul.f32 %v3003_v14, %v2833_v62 }
 0x3b6   : > { %v2759_v50 = vadd.f32 %v2753_v56, %v2744_v57  ;;  %v2835_v24 = vmul.f32 %v3001_v2, %v2832_v20 }
 0x3b7   : > { %v2758_v52 = vadd.f32 %v2752_v34, %v2743_v36 }
 0x3b8   : > { %v2774_v41 = vadd.f32 %v2768_v26, %v2759_v50 }
 0x3b9   : > { %v2773_v8 = vadd.f32 %v2767_v48, %v2758_v52 }
 0x3ba   : > { %v2792_v12 = vsub.f32 %v2774_v41, %v5696_v19 }
 0x3bb   : > { %v2791_v53 = vsub.f32 %v2773_v8, %v5697_v58 }
 0x3bc   : > { %v2795_v22 = vmul.f32 2.0, %v2792_v12 }
 0x3bd   : > { %v2794_v63 = vmul.f32 2.0, %v2791_v53 }
 0x3be   : > { %v2799_v54 = vadd.f32 %v5232_v59, %v2795_v22 }
 0x3bf   : > { %v2798_v11 = vadd.f32 %v5232_v59, %v2794_v63 }
 0x3c0   : > { %v2815_v7 = vmul.f32 %v2812_v17, %v2799_v54 }
 0x3c1   : > { %v2814_v44 = vmul.f32 %v2811_v1, %v2798_v11 }
 0x3c2   : > { %v2839_v61 = vmul.f32 %v2836_v5, %v2815_v7 }
 0x3c3   : > { %v2838_v30 = vmul.f32 %v2835_v24, %v2814_v44 }
 0x3c4   : > { %v2845_v0 = vsel %vm2841_vm5, %v2839_v61, 0.0 }
 0x3c5   : > { %2846 = vadd.xlane.f32.xlu1 %v2845_v0  ;;  %v2842_v60 = vsel %vm2841_vm5, %v2838_v30, 0.0 }
 0x3c6   : > { %2843 = vadd.xlane.f32.xlu0 %v2842_v60 }
 0x427   : > { %v2850_v28 = vpop.xlane.xlu2 %2849 }
 0x428   : > { %v2866_v49 = vsel %vm2851_vm6, %v2850_v28, 0.0 }
 0x429   : > { %v2867_v59 = vrot.slane %v2866_v49, 4 }
 0x42b   : > { %v2868_v10 = vadd.f32 %v2867_v59, %v2866_v49 }
 0x42d   : > { %v2869_v40 = vrot.slane %v2868_v10, 2 }
 0x42f   : > { %v2870_v4 = vadd.f32 %v2869_v40, %v2868_v10 }
 0x431   : > { %v2871_v16 = vrot.slane %v2870_v4, 1 }
 0x433   : > { %v2872_v33 = vadd.f32 %v2871_v16, %v2870_v4 }
 0x435   : > { %2876 = vst.msk [vmem:[%s212_s8 + $0x2] sm:$0x1] %vm2873_vm7, %v2872_v33 }
 0x438   : > { %v2847_v13 = vpop.xlane.xlu1 %2846 }
 0x439   : > { %v2859_v31 = vsel %vm2851_vm6, %v2847_v13, 0.0  ;;  %v2844_v21 = vpop.xlane.xlu0 %2843 }
 0x43a   : > { %v2860_v46 = vrot.slane %v2859_v31, 4  ;;  %v2852_v42 = vsel %vm2851_vm6, %v2844_v21, 0.0 }
 0x43b   : > { %v2853_v32 = vrot.slane %v2852_v42, 4 }
 0x43c   : > { %v2861_v38 = vadd.f32 %v2860_v46, %v2859_v31 }
 0x43d   : > { %v2854_v47 = vadd.f32 %v2853_v32, %v2852_v42 }
 0x43e   : > { %v2862_v9 = vrot.slane %v2861_v38, 2 }
 0x43f   : > { %v2855_v6 = vrot.slane %v2854_v47, 2 }
 0x440   : > { %v2863_v27 = vadd.f32 %v2862_v9, %v2861_v38 }
 0x441   : > { %v2856_v25 = vadd.f32 %v2855_v6, %v2854_v47 }
 0x442   : > { %v2864_v23 = vrot.slane %v2863_v27, 1 }
 0x443   : > { %v2857_v35 = vrot.slane %v2856_v25, 1 }
 0x444   : > { %v2865_v45 = vadd.f32 %v2864_v23, %v2863_v27 }
 0x445   : > { %v2858_v37 = vadd.f32 %v2857_v35, %v2856_v25 }
 0x446   : > { %2875 = vst.msk [vmem:[%s212_s8 + $0x1] sm:$0x1] %vm2873_vm7, %v2865_v45 }
 0x447   : > { %2874 = vst.msk [vmem:[%s212_s8] sm:$0x1] %vm2873_vm7, %v2858_v37 }
 0x448 PF: > { %s14_s12 = sadd.s32 1, %s3041_s12  }
 0x449   : > { %p11_p7 = scmp.ge.s32.totalorder %s14_s12, 4  }
 0x44b   :  { %13 = sbr.rel (!%p11_p7) target bundleno = 1 (0x1), region = 70 }
 0x450   :  { %2897 = vsyncpa [#allocation3], 1 }
 0x451   :  { %2899 = vsyncpa [#allocation3 + $0x1], 1 }

</bundles_post_ra>
